<compile_context>
chip_gen: v6e
topology: v6e:2x2x1
jax: 0.10.0
libtpu: 0.0.40
codegen_flags: <defaults>
</compile_context>

<pallas_src>
import jax
import jax.numpy as jnp
from jax.experimental import pallas as pl
from jax.experimental.pallas import tpu as pltpu

# ---------------- small synthetic configuration ----------------
B = 2                       # batch
C_IN = 16                   # in_channels
C_T = 16                    # inner_channels (transform_channels)
NUM_CLASS = 6               # num_class == K
H = W = 16
NUM_H = NUM_W = 4           # patch_size
PH, PW = H // NUM_H, W // NUM_W
S = PH * PW                 # pixels per patch (16)
NP = NUM_H * NUM_W          # patches per batch element (16)
HW = H * W                  # 256
KNP = NUM_CLASS * NP        # 96
EPS = 1e-5

# column offsets inside the packed weight slab (all matrices have C_IN rows)
_O_DEC = 0
_O_Q1 = _O_DEC + NUM_CLASS          # 6
_O_Q2 = _O_Q1 + C_T                 # 22
_O_K1 = _O_Q2 + C_T                 # 38
_O_K2 = _O_K1 + C_T                 # 54
_O_V = _O_K2 + C_T                  # 70
_O_OT = _O_V + C_T                  # 86
_O_W1 = _O_OT + C_T                 # 102
_O_W2 = _O_W1 + 9 * 2 * C_IN        # 390
_W_COLS = _O_W2 + 9 * C_IN          # 534


# =====================================================================
# Fused kernel: feat_decoder -> SpatialGather -> SelfAttentionBlock ->
#               patch_recover (implicit, pixels never permuted) -> cat_conv.
# grid = (B,) "parallel"; one batch element per grid step.
# =====================================================================
def mram_fused_kernel(feat_ref, gc_ref, aux_ref, wslab_ref, sbrow_ref,
                      sbcol_ref, out_ref):
  b = pl.program_id(0)

  ws = wslab_ref[...]                       # (C_IN, 534) all weight matrices
  sbr = sbrow_ref[...]                      # (11, C_IN)  row-vector scale/bias
  sbc = sbcol_ref[...]                      # (C_IN, 6)   col-vector scale/bias
  aux = aux_ref[...]                        # (NP+2, HW)  masks (constant)
  mskT = aux[:NP, :]                        # (NP, HW) pixel->patch one-hot
  msk = jnp.transpose(mskT)                 # (HW, NP)

  feat_cf = feat_ref[0]                     # (C, HW) channels-first
  feat_px = jnp.transpose(feat_cf)          # (HW, C) pixel-major (raw hw order)

  def affine_relu_row(y, si, bi):           # BN(+fold) + ReLU, pixel-major rows
    return jnp.maximum(y * sbr[si:si + 1, :] + sbr[bi:bi + 1, :], 0.0)

  # ---- feat_decoder + first q projection: one merged (256,16)@(16,22) matmul
  z = jnp.dot(feat_px, ws[:, _O_DEC:_O_Q2],
              preferred_element_type=jnp.float32)                    # (HW, 22)
  pred = z[:, :NUM_CLASS] + sbr[0:1, :NUM_CLASS]                     # (HW, K)
  q1 = jnp.maximum(z[:, NUM_CLASS:] * sbr[1:2, :] + sbr[2:3, :], 0.0)
  q = affine_relu_row(
      jnp.dot(q1, ws[:, _O_Q2:_O_K1], preferred_element_type=jnp.float32),
      3, 4)                                                          # (HW, T)

  # ---- SpatialGatherModule: softmax over pixels within each (patch, class)
  # (per-class global max shift == per-patch shift up to fp noise)
  e = jnp.exp(pred - jnp.max(pred, axis=0, keepdims=True))           # (HW, K)
  denom = jnp.dot(mskT, e, preferred_element_type=jnp.float32)       # (NP, K)
  inv_px = jnp.dot(msk, 1.0 / denom,
                   preferred_element_type=jnp.float32)               # (HW, K)
  probs = e * inv_px                                                 # (HW, K)

  # ---- local centers: single block-diagonal (96,256)@(256,16) MXU matmul
  probsT = jnp.transpose(probs)                                      # (K, HW)
  p_bd = (probsT[:, None, :] * mskT[None, :, :]).reshape(KNP, HW)    # (96, HW)
  lc = jnp.dot(p_bd, feat_px, preferred_element_type=jnp.float32)    # (96, C)

  # ---- key projection (1x1 conv + BN + ReLU, twice)
  k1 = affine_relu_row(
      jnp.dot(lc, ws[:, _O_K1:_O_K2], preferred_element_type=jnp.float32), 5, 6)
  key = affine_relu_row(
      jnp.dot(k1, ws[:, _O_K2:_O_V], preferred_element_type=jnp.float32), 7, 8)

  # ---- value projection: both batches' global centers in one (12,16) matmul
  gc_all = gc_ref[...]                                               # (B, C, K)
  gcat = jnp.concatenate(
      [jnp.transpose(gc_all[0]), jnp.transpose(gc_all[1])], axis=0)  # (2K, C)
  v_all = affine_relu_row(
      jnp.dot(gcat, ws[:, _O_V:_O_OT], preferred_element_type=jnp.float32),
      9, 10)                                                         # (2K, T)
  v0, v1 = v_all[:NUM_CLASS], v_all[NUM_CLASS:]
  # torch global_center.repeat(num_h*num_w,...) pairing: patch n -> gc[n % B],
  # with n the GLOBAL patch index (robust to any future grid split).
  n_glob = b * NP + jax.lax.broadcasted_iota(jnp.int32, (1, NP, 1), 1)
  vv = jnp.where((n_glob % B) == 0, v0[:, None, :],
                 v1[:, None, :]).reshape(KNP, C_T)                   # (96, T)

  # ---- attention over the K class centers, block-diagonal masked softmax
  sim = jax.lax.dot_general(q, key, (((1,), (1,)), ((), ())),
                            preferred_element_type=jnp.float32)      # (HW, 96)
  valid = jnp.tile(msk, (1, NUM_CLASS)) > 0.5     # col j=k*NP+n valid iff n==pid(p)
  logits = jnp.where(valid, sim * (float(C_T) ** -0.5), -1e30)
  lmax = jnp.max(logits, axis=-1, keepdims=True)
  le = jnp.exp(logits - lmax)
  attn = le * (1.0 / jnp.sum(le, axis=-1, keepdims=True))            # (HW, 96)
  ctx = jnp.dot(attn, vv, preferred_element_type=jnp.float32)        # (HW, T)

  # ---- out_project, emitted channels-first (lane-dense 256-wide rows)
  new_cf = jax.lax.dot_general(ws[:, _O_OT:_O_W1], ctx,
                               (((1,), (1,)), ((), ())),
                               preferred_element_type=jnp.float32)   # (C, HW)
  new_cf = jnp.maximum(new_cf * sbc[:, 0:1] + sbc[:, 1:2], 0.0)

  # ---- cat_conv: concat + 2x (3x3 conv + folded BN + ReLU); dropout = id
  mask_r = aux[NP:NP + 1, :]       # (1, HW): 1 where a right neighbor exists
  mask_l = aux[NP + 1:NP + 2, :]   # (1, HW): 1 where a left neighbor exists

  def conv3x3_bn_relu(x, wmat, scol, bcol):
    rows = x.shape[0]
    pieces = []
    for oh in (-1, 0, 1):
      for ow in (-1, 0, 1):
        shift = oh * W + ow
        if shift == 0:
          sh = x
        elif shift > 0:
          sh = jnp.concatenate(
              [x[:, shift:], jnp.zeros((rows, shift), x.dtype)], axis=1)
        else:
          sh = jnp.concatenate(
              [jnp.zeros((rows, -shift), x.dtype), x[:, :HW + shift]], axis=1)
        if ow == 1:
          sh = sh * mask_r
        elif ow == -1:
          sh = sh * mask_l
        pieces.append(sh)
    patches = jnp.concatenate(pieces, axis=0)              # (9*rows, HW)
    y = jnp.dot(wmat, patches, preferred_element_type=jnp.float32)  # (C, HW)
    return jnp.maximum(y * scol + bcol, 0.0)

  x0 = jnp.concatenate([feat_cf, new_cf], axis=0)          # (2C, HW)
  y1 = conv3x3_bn_relu(x0, ws[:, _O_W1:_O_W2], sbc[:, 2:3], sbc[:, 3:4])
  y2 = conv3x3_bn_relu(y1, ws[:, _O_W2:_W_COLS], sbc[:, 4:5], sbc[:, 5:6])
  out_ref[0] = y2.astype(out_ref.dtype)


# =====================================================================
# One-time parameter packing (hoisted out of the per-call forward).
# =====================================================================
def prepare_params(p):
  w1t = p['w_cat1'].transpose(2, 0, 1).reshape(C_IN, 9 * 2 * C_IN)
  w2t = p['w_cat2'].transpose(2, 0, 1).reshape(C_IN, 9 * C_IN)
  wslab = jnp.concatenate(
      [p['w_dec'], p['w_q1'], p['w_q2'], p['w_k1'], p['w_k2'], p['w_v'],
       p['w_o'].T, w1t, w2t], axis=1).astype(jnp.float32)            # (16, 534)
  assert wslab.shape == (C_IN, _W_COLS)

  b_dec_row = jnp.pad(p['b_dec'], ((0, 0), (0, C_IN - NUM_CLASS)))
  sbrow = jnp.concatenate(
      [b_dec_row,
       jnp.stack([p['s_q1'], p['b_q1'], p['s_q2'], p['b_q2'],
                  p['s_k1'], p['b_k1'], p['s_k2'], p['b_k2'],
                  p['s_v'], p['b_v']])], axis=0).astype(jnp.float32)  # (11, 16)
  sbcol = jnp.stack([p['s_o'], p['b_o'], p['s_cat1'], p['b_cat1'],
                     p['s_cat2'], p['b_cat2']], axis=1).astype(jnp.float32)

  # pixel -> patch one-hot mask (raw h*W+w pixel order) + conv border masks
  hh = jnp.arange(H)[:, None]
  ww = jnp.arange(W)[None, :]
  pid = ((hh // PH) * NUM_W + (ww // PW)).reshape(1, HW)
  mskT = (pid == jnp.arange(NP)[:, None]).astype(jnp.float32)        # (16, 256)
  w_of_p = (jnp.arange(HW) % W).reshape(1, HW)
  mask_r = (w_of_p < W - 1).astype(jnp.float32)
  mask_l = (w_of_p > 0).astype(jnp.float32)
  aux = jnp.concatenate([mskT, mask_r, mask_l], axis=0)              # (18, 256)

  return {'wslab': wslab, 'sbrow': sbrow, 'sbcol': sbcol, 'aux': aux}


# =====================================================================
# Forward: only free reshapes outside the single fused pallas_call.
# =====================================================================
@jax.jit
def mram_forward(feat, global_center, packed):
  feat_flat = feat.reshape(B, C_IN, HW)
  gcr = global_center.reshape(B, C_IN, NUM_CLASS)

  out = pl.pallas_call(
      mram_fused_kernel,
      out_shape=jax.ShapeDtypeStruct((B, C_IN, HW), jnp.float32),
      grid=(B,),
      in_specs=[
          pl.BlockSpec((1, C_IN, HW), lambda b: (b, 0, 0)),
          pl.BlockSpec((B, C_IN, NUM_CLASS), lambda b: (0, 0, 0)),
          pl.BlockSpec((NP + 2, HW), lambda b: (0, 0)),
          pl.BlockSpec((C_IN, _W_COLS), lambda b: (0, 0)),
          pl.BlockSpec((11, C_IN), lambda b: (0, 0)),
          pl.BlockSpec((C_IN, 6), lambda b: (0, 0)),
      ],
      out_specs=pl.BlockSpec((1, C_IN, HW), lambda b: (b, 0, 0)),
      compiler_params=pltpu.CompilerParams(dimension_semantics=("parallel",)),
  )(feat_flat, gcr, packed['aux'], packed['wslab'], packed['sbrow'],
    packed['sbcol'])

  return out.reshape(B, C_IN, H, W)


# =====================================================================
# Deterministic parameter construction (BatchNorm folded to scale/bias)
# =====================================================================
def fold_bn(key, c):
  k1, k2, k3, k4 = jax.random.split(key, 4)
  gamma = 1.0 + 0.1 * jax.random.normal(k1, (c,))
  beta = 0.1 * jax.random.normal(k2, (c,))
  mean = 0.1 * jax.random.normal(k3, (c,))
  var = 1.0 + 0.1 * jax.random.uniform(k4, (c,))
  scale = gamma / jnp.sqrt(var + EPS)
  bias = beta - mean * scale
  return scale.astype(jnp.float32), bias.astype(jnp.float32)


def make_params(key):
  keys = iter(jax.random.split(key, 24))

  def w(shape, fan_in):
    return (jax.random.normal(next(keys), shape) /
            jnp.sqrt(float(fan_in))).astype(jnp.float32)

  p = {}
  p['w_dec'] = w((C_IN, NUM_CLASS), C_IN)
  p['b_dec'] = (0.1 * jax.random.normal(next(keys), (1, NUM_CLASS))
                ).astype(jnp.float32)
  p['w_q1'] = w((C_IN, C_T), C_IN); p['s_q1'], p['b_q1'] = fold_bn(next(keys), C_T)
  p['w_q2'] = w((C_T, C_T), C_T);   p['s_q2'], p['b_q2'] = fold_bn(next(keys), C_T)
  p['w_k1'] = w((C_IN, C_T), C_IN); p['s_k1'], p['b_k1'] = fold_bn(next(keys), C_T)
  p['w_k2'] = w((C_T, C_T), C_T);   p['s_k2'], p['b_k2'] = fold_bn(next(keys), C_T)
  p['w_v'] = w((C_IN, C_T), C_IN);  p['s_v'], p['b_v'] = fold_bn(next(keys), C_T)
  p['w_o'] = w((C_T, C_IN), C_T);   p['s_o'], p['b_o'] = fold_bn(next(keys), C_IN)
  p['w_cat1'] = w((9, 2 * C_IN, C_IN), 9 * 2 * C_IN)
  p['s_cat1'], p['b_cat1'] = fold_bn(next(keys), C_IN)
  p['w_cat2'] = w((9, C_IN, C_IN), 9 * C_IN)
  p['s_cat2'], p['b_cat2'] = fold_bn(next(keys), C_IN)
  return p


# =====================================================================
# Pure-JAX reference (float32 everywhere; mirrors the PyTorch forward)
# =====================================================================
def mram_reference(feat, global_center, p):
  hp = jax.lax.Precision.HIGHEST
  pred = jnp.einsum('bchw,ck->bkhw', feat, p['w_dec'], precision=hp) \
      + p['b_dec'][0][None, :, None, None]

  def patch_split(x):
    Bx, Cx = x.shape[0], x.shape[1]
    y = x.reshape(Bx, Cx, NUM_H, PH, NUM_W, PW).transpose(0, 2, 4, 1, 3, 5)
    return y.reshape(-1, Cx, PH, PW)

  N = B * NP
  patch_feat = patch_split(feat)
  patch_pred = patch_split(pred)
  logits = patch_pred.reshape(N, NUM_CLASS, S)
  probs = jax.nn.softmax(logits, axis=2)
  feats = patch_feat.reshape(N, C_IN, S).transpose(0, 2, 1)          # (N, S, C)
  local_center = jnp.einsum('nks,nsc->nkc', probs, feats, precision=hp)
  gc_rep = jnp.tile(global_center[..., 0].transpose(0, 2, 1), (NP, 1, 1))

  def proj(x, wmat, s, bias):
    return jnp.maximum(
        jnp.einsum('...c,ct->...t', x, wmat, precision=hp) * s + bias, 0.0)

  q = proj(proj(feats, p['w_q1'], p['s_q1'], p['b_q1']),
           p['w_q2'], p['s_q2'], p['b_q2'])
  k = proj(proj(local_center, p['w_k1'], p['s_k1'], p['b_k1']),
           p['w_k2'], p['s_k2'], p['b_k2'])
  v = proj(gc_rep, p['w_v'], p['s_v'], p['b_v'])
  sim = jnp.einsum('nst,nkt->nsk', q, k, precision=hp) * (float(C_T) ** -0.5)
  attn = jax.nn.softmax(sim, axis=-1)
  ctx = jnp.einsum('nsk,nkt->nst', attn, v, precision=hp)
  out = proj(ctx, p['w_o'], p['s_o'], p['b_o'])                      # (N, S, C)
  nf = out.reshape(B, NUM_H, NUM_W, PH, PW, C_IN)
  new_feat = nf.transpose(0, 5, 1, 3, 2, 4).reshape(B, C_IN, H, W)

  cat = jnp.concatenate([feat, new_feat], axis=1)

  def conv3(x_nchw, wf, s, bias):
    xh = x_nchw.transpose(0, 2, 3, 1)
    wk = wf.reshape(3, 3, xh.shape[-1], -1)
    y = jax.lax.conv_general_dilated(
        xh, wk, (1, 1), 'SAME',
        dimension_numbers=('NHWC', 'HWIO', 'NHWC'),
        precision=hp, preferred_element_type=jnp.float32)
    y = jnp.maximum(y * s + bias, 0.0)
    return y.transpose(0, 3, 1, 2)

  x = conv3(cat, p['w_cat1'], p['s_cat1'], p['b_cat1'])
  x = conv3(x, p['w_cat2'], p['s_cat2'], p['b_cat2'])
  return x


if __name__ == "__main__":
  key = jax.random.PRNGKey(0)
  kf, kg, kp = jax.random.split(key, 3)
  feat = jax.random.normal(kf, (B, C_IN, H, W), jnp.float32)
  global_center = jax.random.normal(kg, (B, C_IN, NUM_CLASS, 1), jnp.float32)
  params = make_params(kp)
  packed = prepare_params(params)   # one-time weight packing (outside the jit)

  out = jax.block_until_ready(mram_forward(feat, global_center, packed))
  assert out.shape == (B, C_IN, H, W) and out.dtype == jnp.float32

  ref = jax.block_until_ready(mram_reference(feat, global_center, params))
  max_err = float(jnp.max(jnp.abs(out - ref)))
  assert max_err < 2e-2, f"mismatch vs reference: {max_err}"

  print("KERNEL_OK")
</pallas_src>

<mosaic_0001>
module attributes {stable_mosaic.version = 11 : i64} {
  func.func @mram_fused_kernel(%arg0: i32, %arg1: memref<1x16x256xf32, #tpu.memory_space<vmem>>, %arg2: memref<2x16x6xf32, #tpu.memory_space<vmem>>, %arg3: memref<18x256xf32, #tpu.memory_space<vmem>>, %arg4: memref<16x534xf32, #tpu.memory_space<vmem>>, %arg5: memref<11x16xf32, #tpu.memory_space<vmem>>, %arg6: memref<16x6xf32, #tpu.memory_space<vmem>>, %arg7: memref<1x16x256xf32, #tpu.memory_space<vmem>>) attributes {dimension_semantics = [#tpu.dimension_semantics<parallel>], iteration_bounds = array<i64: 2>, scalar_prefetch = 0 : i64, scratch_operands = 0 : i64, tpu.core_type = #tpu.core_type<tc>, window_params = [{transform_indices = @transform_0, window_bounds = array<i64: 1, 16, 256>}, {pipeline_mode = #tpu.pipeline_mode<synchronous>, transform_indices = @transform_1, window_bounds = array<i64: 2, 16, 6>}, {pipeline_mode = #tpu.pipeline_mode<synchronous>, transform_indices = @transform_2, window_bounds = array<i64: 18, 256>}, {pipeline_mode = #tpu.pipeline_mode<synchronous>, transform_indices = @transform_3, window_bounds = array<i64: 16, 534>}, {pipeline_mode = #tpu.pipeline_mode<synchronous>, transform_indices = @transform_4, window_bounds = array<i64: 11, 16>}, {pipeline_mode = #tpu.pipeline_mode<synchronous>, transform_indices = @transform_5, window_bounds = array<i64: 16, 6>}, {transform_indices = @transform_6, window_bounds = array<i64: 1, 16, 256>}]} {
    %c0 = arith.constant 0 : index
    %c0_0 = arith.constant 0 : index
    %0 = vector.load %arg4[%c0, %c0_0] : memref<16x534xf32, #tpu.memory_space<vmem>>, vector<16x534xf32>
    %c0_1 = arith.constant 0 : index
    %c0_2 = arith.constant 0 : index
    %1 = vector.load %arg5[%c0_1, %c0_2] : memref<11x16xf32, #tpu.memory_space<vmem>>, vector<11x16xf32>
    %c0_3 = arith.constant 0 : index
    %c0_4 = arith.constant 0 : index
    %2 = vector.load %arg6[%c0_3, %c0_4] : memref<16x6xf32, #tpu.memory_space<vmem>>, vector<16x6xf32>
    %c0_5 = arith.constant 0 : index
    %c0_6 = arith.constant 0 : index
    %3 = vector.load %arg3[%c0_5, %c0_6] : memref<18x256xf32, #tpu.memory_space<vmem>>, vector<18x256xf32>
    %4 = vector.extract_strided_slice %3 {offsets = [0, 0], sizes = [16, 256], strides = [1, 1]} : vector<18x256xf32> to vector<16x256xf32>
    %5 = tpu.transpose %4, [1, 0] : vector<16x256xf32> -> vector<256x16xf32>
    %c0_7 = arith.constant 0 : index
    %c0_8 = arith.constant 0 : index
    %c0_9 = arith.constant 0 : index
    %6 = vector.load %arg1[%c0_7, %c0_8, %c0_9] : memref<1x16x256xf32, #tpu.memory_space<vmem>>, vector<1x16x256xf32>
    %7 = vector.shape_cast %6 : vector<1x16x256xf32> to vector<16x256xf32>
    %8 = tpu.transpose %7, [1, 0] : vector<16x256xf32> -> vector<256x16xf32>
    %9 = vector.extract_strided_slice %0 {offsets = [0, 0], sizes = [16, 22], strides = [1, 1]} : vector<16x534xf32> to vector<16x22xf32>
    %cst = arith.constant dense<0.000000e+00> : vector<256x22xf32>
    %10 = tpu.matmul %8, %9, %cst {dimension_numbers = #tpu.dot_dimension_numbers<[1], [0], [0], [1], [0, 0, 1, 1], [], []>} : vector<256x16xf32>, vector<16x22xf32>, vector<256x22xf32> -> vector<256x22xf32>
    %11 = vector.extract_strided_slice %10 {offsets = [0, 0], sizes = [256, 6], strides = [1, 1]} : vector<256x22xf32> to vector<256x6xf32>
    %12 = vector.extract_strided_slice %1 {offsets = [0, 0], sizes = [1, 6], strides = [1, 1]} : vector<11x16xf32> to vector<1x6xf32>
    %13 = vector.broadcast %12 : vector<1x6xf32> to vector<256x6xf32>
    %14 = arith.addf %11, %13 : vector<256x6xf32>
    %15 = vector.extract_strided_slice %10 {offsets = [0, 6], sizes = [256, 16], strides = [1, 1]} : vector<256x22xf32> to vector<256x16xf32>
    %16 = vector.extract_strided_slice %1 {offsets = [1, 0], sizes = [1, 16], strides = [1, 1]} : vector<11x16xf32> to vector<1x16xf32>
    %17 = vector.broadcast %16 : vector<1x16xf32> to vector<256x16xf32>
    %18 = arith.mulf %15, %17 : vector<256x16xf32>
    %19 = vector.extract_strided_slice %1 {offsets = [2, 0], sizes = [1, 16], strides = [1, 1]} : vector<11x16xf32> to vector<1x16xf32>
    %20 = vector.broadcast %19 : vector<1x16xf32> to vector<256x16xf32>
    %21 = arith.addf %18, %20 : vector<256x16xf32>
    %cst_10 = arith.constant 0.000000e+00 : f32
    %22 = vector.broadcast %cst_10 : f32 to vector<256x16xf32>
    %23 = arith.maximumf %21, %22 : vector<256x16xf32>
    %24 = vector.extract_strided_slice %0 {offsets = [0, 22], sizes = [16, 16], strides = [1, 1]} : vector<16x534xf32> to vector<16x16xf32>
    %cst_11 = arith.constant dense<0.000000e+00> : vector<256x16xf32>
    %25 = tpu.matmul %23, %24, %cst_11 {dimension_numbers = #tpu.dot_dimension_numbers<[1], [0], [0], [1], [0, 0, 1, 1], [], []>} : vector<256x16xf32>, vector<16x16xf32>, vector<256x16xf32> -> vector<256x16xf32>
    %26 = vector.extract_strided_slice %1 {offsets = [3, 0], sizes = [1, 16], strides = [1, 1]} : vector<11x16xf32> to vector<1x16xf32>
    %27 = vector.broadcast %26 : vector<1x16xf32> to vector<256x16xf32>
    %28 = arith.mulf %25, %27 : vector<256x16xf32>
    %29 = vector.extract_strided_slice %1 {offsets = [4, 0], sizes = [1, 16], strides = [1, 1]} : vector<11x16xf32> to vector<1x16xf32>
    %30 = vector.broadcast %29 : vector<1x16xf32> to vector<256x16xf32>
    %31 = arith.addf %28, %30 : vector<256x16xf32>
    %cst_12 = arith.constant 0.000000e+00 : f32
    %32 = vector.broadcast %cst_12 : f32 to vector<256x16xf32>
    %33 = arith.maximumf %31, %32 : vector<256x16xf32>
    %cst_13 = arith.constant dense<0xFF800000> : vector<6xf32>
    %34 = vector.multi_reduction <maximumf>, %14, %cst_13 [0] : vector<256x6xf32> to vector<6xf32>
    %35 = vector.shape_cast %34 : vector<6xf32> to vector<1x6xf32>
    %36 = vector.broadcast %35 : vector<1x6xf32> to vector<256x6xf32>
    %37 = arith.subf %14, %36 : vector<256x6xf32>
    %38 = math.exp %37 : vector<256x6xf32>
    %cst_14 = arith.constant dense<0.000000e+00> : vector<16x6xf32>
    %39 = tpu.matmul %4, %38, %cst_14 {dimension_numbers = #tpu.dot_dimension_numbers<[1], [0], [0], [1], [0, 0, 1, 1], [], []>} : vector<16x256xf32>, vector<256x6xf32>, vector<16x6xf32> -> vector<16x6xf32>
    %cst_15 = arith.constant 1.000000e+00 : f32
    %40 = vector.broadcast %cst_15 : f32 to vector<16x6xf32>
    %41 = arith.divf %40, %39 : vector<16x6xf32>
    %cst_16 = arith.constant dense<0.000000e+00> : vector<256x6xf32>
    %42 = tpu.matmul %5, %41, %cst_16 {dimension_numbers = #tpu.dot_dimension_numbers<[1], [0], [0], [1], [0, 0, 1, 1], [], []>} : vector<256x16xf32>, vector<16x6xf32>, vector<256x6xf32> -> vector<256x6xf32>
    %43 = arith.mulf %38, %42 : vector<256x6xf32>
    %44 = tpu.transpose %43, [1, 0] : vector<256x6xf32> -> vector<6x256xf32>
    %45 = vector.shape_cast %44 : vector<6x256xf32> to vector<6x1x256xf32>
    %46 = vector.shape_cast %4 : vector<16x256xf32> to vector<1x16x256xf32>
    %47 = vector.broadcast %45 : vector<6x1x256xf32> to vector<6x16x256xf32>
    %48 = vector.broadcast %46 : vector<1x16x256xf32> to vector<6x16x256xf32>
    %49 = arith.mulf %47, %48 : vector<6x16x256xf32>
    %50 = vector.shape_cast %49 : vector<6x16x256xf32> to vector<96x256xf32>
    %cst_17 = arith.constant dense<0.000000e+00> : vector<96x16xf32>
    %51 = tpu.matmul %50, %8, %cst_17 {dimension_numbers = #tpu.dot_dimension_numbers<[1], [0], [0], [1], [0, 0, 1, 1], [], []>} : vector<96x256xf32>, vector<256x16xf32>, vector<96x16xf32> -> vector<96x16xf32>
    %52 = vector.extract_strided_slice %0 {offsets = [0, 38], sizes = [16, 16], strides = [1, 1]} : vector<16x534xf32> to vector<16x16xf32>
    %cst_18 = arith.constant dense<0.000000e+00> : vector<96x16xf32>
    %53 = tpu.matmul %51, %52, %cst_18 {dimension_numbers = #tpu.dot_dimension_numbers<[1], [0], [0], [1], [0, 0, 1, 1], [], []>} : vector<96x16xf32>, vector<16x16xf32>, vector<96x16xf32> -> vector<96x16xf32>
    %54 = vector.extract_strided_slice %1 {offsets = [5, 0], sizes = [1, 16], strides = [1, 1]} : vector<11x16xf32> to vector<1x16xf32>
    %55 = vector.broadcast %54 : vector<1x16xf32> to vector<96x16xf32>
    %56 = arith.mulf %53, %55 : vector<96x16xf32>
    %57 = vector.extract_strided_slice %1 {offsets = [6, 0], sizes = [1, 16], strides = [1, 1]} : vector<11x16xf32> to vector<1x16xf32>
    %58 = vector.broadcast %57 : vector<1x16xf32> to vector<96x16xf32>
    %59 = arith.addf %56, %58 : vector<96x16xf32>
    %cst_19 = arith.constant 0.000000e+00 : f32
    %60 = vector.broadcast %cst_19 : f32 to vector<96x16xf32>
    %61 = arith.maximumf %59, %60 : vector<96x16xf32>
    %62 = vector.extract_strided_slice %0 {offsets = [0, 54], sizes = [16, 16], strides = [1, 1]} : vector<16x534xf32> to vector<16x16xf32>
    %cst_20 = arith.constant dense<0.000000e+00> : vector<96x16xf32>
    %63 = tpu.matmul %61, %62, %cst_20 {dimension_numbers = #tpu.dot_dimension_numbers<[1], [0], [0], [1], [0, 0, 1, 1], [], []>} : vector<96x16xf32>, vector<16x16xf32>, vector<96x16xf32> -> vector<96x16xf32>
    %64 = vector.extract_strided_slice %1 {offsets = [7, 0], sizes = [1, 16], strides = [1, 1]} : vector<11x16xf32> to vector<1x16xf32>
    %65 = vector.broadcast %64 : vector<1x16xf32> to vector<96x16xf32>
    %66 = arith.mulf %63, %65 : vector<96x16xf32>
    %67 = vector.extract_strided_slice %1 {offsets = [8, 0], sizes = [1, 16], strides = [1, 1]} : vector<11x16xf32> to vector<1x16xf32>
    %68 = vector.broadcast %67 : vector<1x16xf32> to vector<96x16xf32>
    %69 = arith.addf %66, %68 : vector<96x16xf32>
    %cst_21 = arith.constant 0.000000e+00 : f32
    %70 = vector.broadcast %cst_21 : f32 to vector<96x16xf32>
    %71 = arith.maximumf %69, %70 : vector<96x16xf32>
    %c0_22 = arith.constant 0 : index
    %c0_23 = arith.constant 0 : index
    %c0_24 = arith.constant 0 : index
    %72 = vector.load %arg2[%c0_22, %c0_23, %c0_24] : memref<2x16x6xf32, #tpu.memory_space<vmem>>, vector<2x16x6xf32>
    %73 = vector.extract_strided_slice %72 {offsets = [0, 0, 0], sizes = [1, 16, 6], strides = [1, 1, 1]} : vector<2x16x6xf32> to vector<1x16x6xf32>
    %74 = vector.shape_cast %73 : vector<1x16x6xf32> to vector<16x6xf32>
    %75 = tpu.transpose %74, [1, 0] : vector<16x6xf32> -> vector<6x16xf32>
    %76 = vector.extract_strided_slice %72 {offsets = [1, 0, 0], sizes = [1, 16, 6], strides = [1, 1, 1]} : vector<2x16x6xf32> to vector<1x16x6xf32>
    %77 = vector.shape_cast %76 : vector<1x16x6xf32> to vector<16x6xf32>
    %78 = tpu.transpose %77, [1, 0] : vector<16x6xf32> -> vector<6x16xf32>
    %79 = tpu.concatenate %75, %78 in 0 : vector<6x16xf32>, vector<6x16xf32> -> vector<12x16xf32>
    %80 = vector.extract_strided_slice %0 {offsets = [0, 70], sizes = [16, 16], strides = [1, 1]} : vector<16x534xf32> to vector<16x16xf32>
    %cst_25 = arith.constant dense<0.000000e+00> : vector<12x16xf32>
    %81 = tpu.matmul %79, %80, %cst_25 {dimension_numbers = #tpu.dot_dimension_numbers<[1], [0], [0], [1], [0, 0, 1, 1], [], []>} : vector<12x16xf32>, vector<16x16xf32>, vector<12x16xf32> -> vector<12x16xf32>
    %82 = vector.extract_strided_slice %1 {offsets = [9, 0], sizes = [1, 16], strides = [1, 1]} : vector<11x16xf32> to vector<1x16xf32>
    %83 = vector.broadcast %82 : vector<1x16xf32> to vector<12x16xf32>
    %84 = arith.mulf %81, %83 : vector<12x16xf32>
    %85 = vector.extract_strided_slice %1 {offsets = [10, 0], sizes = [1, 16], strides = [1, 1]} : vector<11x16xf32> to vector<1x16xf32>
    %86 = vector.broadcast %85 : vector<1x16xf32> to vector<12x16xf32>
    %87 = arith.addf %84, %86 : vector<12x16xf32>
    %cst_26 = arith.constant 0.000000e+00 : f32
    %88 = vector.broadcast %cst_26 : f32 to vector<12x16xf32>
    %89 = arith.maximumf %87, %88 : vector<12x16xf32>
    %90 = vector.extract_strided_slice %89 {offsets = [0, 0], sizes = [6, 16], strides = [1, 1]} : vector<12x16xf32> to vector<6x16xf32>
    %91 = vector.extract_strided_slice %89 {offsets = [6, 0], sizes = [6, 16], strides = [1, 1]} : vector<12x16xf32> to vector<6x16xf32>
    %c16_i32 = arith.constant 16 : i32
    %92 = arith.muli %arg0, %c16_i32 : i32
    %93 = tpu.iota {dimensions = array<i32: 1>} : vector<1x16x1xi32>
    %94 = vector.broadcast %92 : i32 to vector<1x16x1xi32>
    %95 = arith.addi %94, %93 : vector<1x16x1xi32>
    %c2_i32 = arith.constant 2 : i32
    %c0_i32 = arith.constant 0 : i32
    %96 = arith.cmpi eq, %c2_i32, %c0_i32 : i32
    %c1_i32 = arith.constant 1 : i32
    %97 = arith.select %96, %c1_i32, %c2_i32 : i32
    %98 = vector.broadcast %97 : i32 to vector<1x16x1xi32>
    %99 = arith.remsi %95, %98 : vector<1x16x1xi32>
    %c0_i32_27 = arith.constant 0 : i32
    %100 = vector.broadcast %c0_i32_27 : i32 to vector<1x16x1xi32>
    %101 = arith.cmpi ne, %99, %100 : vector<1x16x1xi32>
    %c0_i32_28 = arith.constant 0 : i32
    %102 = vector.broadcast %c0_i32_28 : i32 to vector<1x16x1xi32>
    %103 = arith.cmpi slt, %99, %102 : vector<1x16x1xi32>
    %c0_i32_29 = arith.constant 0 : i32
    %104 = arith.cmpi slt, %97, %c0_i32_29 : i32
    %105 = vector.broadcast %104 : i1 to vector<1x16x1xi1>
    %106 = vector.broadcast %105 : vector<1x16x1xi1> to vector<1x16x1xi1>
    %107 = arith.xori %103, %106 : vector<1x16x1xi1>
    %108 = arith.andi %107, %101 : vector<1x16x1xi1>
    %109 = vector.broadcast %97 : i32 to vector<1x16x1xi32>
    %110 = arith.addi %99, %109 : vector<1x16x1xi32>
    %111 = arith.select %108, %110, %99 : vector<1x16x1xi1>, vector<1x16x1xi32>
    %c0_i32_30 = arith.constant 0 : i32
    %112 = vector.broadcast %c0_i32_30 : i32 to vector<1x16x1xi32>
    %113 = arith.cmpi eq, %111, %112 : vector<1x16x1xi32>
    %114 = vector.shape_cast %90 : vector<6x16xf32> to vector<6x1x16xf32>
    %115 = vector.shape_cast %91 : vector<6x16xf32> to vector<6x1x16xf32>
    %116 = vector.shape_cast %113 : vector<1x16x1xi1> to vector<1x16x1xi1>
    %117 = vector.broadcast %116 : vector<1x16x1xi1> to vector<6x16x16xi1>
    %118 = vector.shape_cast %114 : vector<6x1x16xf32> to vector<6x1x16xf32>
    %119 = vector.broadcast %118 : vector<6x1x16xf32> to vector<6x16x16xf32>
    %120 = vector.shape_cast %115 : vector<6x1x16xf32> to vector<6x1x16xf32>
    %121 = vector.broadcast %120 : vector<6x1x16xf32> to vector<6x16x16xf32>
    %122 = arith.select %117, %119, %121 : vector<6x16x16xi1>, vector<6x16x16xf32>
    %123 = vector.shape_cast %122 : vector<6x16x16xf32> to vector<96x16xf32>
    %cst_31 = arith.constant dense<0.000000e+00> : vector<256x96xf32>
    %124 = tpu.matmul %33, %71, %cst_31 {dimension_numbers = #tpu.dot_dimension_numbers<[1], [1], [0], [0], [0, 0, 1, 0], [], []>} : vector<256x16xf32>, vector<96x16xf32>, vector<256x96xf32> -> vector<256x96xf32>
    %125 = tpu.concatenate %5, %5, %5, %5, %5, %5 in 1 : vector<256x16xf32>, vector<256x16xf32>, vector<256x16xf32>, vector<256x16xf32>, vector<256x16xf32>, vector<256x16xf32> -> vector<256x96xf32>
    %cst_32 = arith.constant 5.000000e-01 : f32
    %126 = vector.broadcast %cst_32 : f32 to vector<256x96xf32>
    %127 = arith.cmpf ogt, %125, %126 : vector<256x96xf32>
    %cst_33 = arith.constant 2.500000e-01 : f32
    %128 = vector.broadcast %cst_33 : f32 to vector<256x96xf32>
    %129 = arith.mulf %124, %128 : vector<256x96xf32>
    %cst_34 = arith.constant -1.000000e+30 : f32
    %130 = vector.broadcast %cst_34 : f32 to vector<256x96xf32>
    %131 = arith.select %127, %129, %130 : vector<256x96xi1>, vector<256x96xf32>
    %cst_35 = arith.constant dense<0xFF800000> : vector<256xf32>
    %132 = vector.multi_reduction <maximumf>, %131, %cst_35 [1] : vector<256x96xf32> to vector<256xf32>
    %133 = vector.shape_cast %132 : vector<256xf32> to vector<256x1xf32>
    %134 = vector.broadcast %133 : vector<256x1xf32> to vector<256x96xf32>
    %135 = arith.subf %131, %134 : vector<256x96xf32>
    %136 = math.exp %135 : vector<256x96xf32>
    %cst_36 = arith.constant dense<0.000000e+00> : vector<256xf32>
    %137 = vector.multi_reduction <add>, %136, %cst_36 [1] : vector<256x96xf32> to vector<256xf32>
    %138 = vector.shape_cast %137 : vector<256xf32> to vector<256x1xf32>
    %cst_37 = arith.constant 1.000000e+00 : f32
    %139 = vector.broadcast %cst_37 : f32 to vector<256x1xf32>
    %140 = arith.divf %139, %138 : vector<256x1xf32>
    %141 = vector.broadcast %140 : vector<256x1xf32> to vector<256x96xf32>
    %142 = arith.mulf %136, %141 : vector<256x96xf32>
    %cst_38 = arith.constant dense<0.000000e+00> : vector<256x16xf32>
    %143 = tpu.matmul %142, %123, %cst_38 {dimension_numbers = #tpu.dot_dimension_numbers<[1], [0], [0], [1], [0, 0, 1, 1], [], []>} : vector<256x96xf32>, vector<96x16xf32>, vector<256x16xf32> -> vector<256x16xf32>
    %144 = vector.extract_strided_slice %0 {offsets = [0, 86], sizes = [16, 16], strides = [1, 1]} : vector<16x534xf32> to vector<16x16xf32>
    %cst_39 = arith.constant dense<0.000000e+00> : vector<16x256xf32>
    %145 = tpu.matmul %144, %143, %cst_39 {dimension_numbers = #tpu.dot_dimension_numbers<[1], [1], [0], [0], [0, 0, 1, 0], [], []>} : vector<16x16xf32>, vector<256x16xf32>, vector<16x256xf32> -> vector<16x256xf32>
    %146 = vector.extract_strided_slice %2 {offsets = [0, 0], sizes = [16, 1], strides = [1, 1]} : vector<16x6xf32> to vector<16x1xf32>
    %147 = vector.broadcast %146 : vector<16x1xf32> to vector<16x256xf32>
    %148 = arith.mulf %145, %147 : vector<16x256xf32>
    %149 = vector.extract_strided_slice %2 {offsets = [0, 1], sizes = [16, 1], strides = [1, 1]} : vector<16x6xf32> to vector<16x1xf32>
    %150 = vector.broadcast %149 : vector<16x1xf32> to vector<16x256xf32>
    %151 = arith.addf %148, %150 : vector<16x256xf32>
    %cst_40 = arith.constant 0.000000e+00 : f32
    %152 = vector.broadcast %cst_40 : f32 to vector<16x256xf32>
    %153 = arith.maximumf %151, %152 : vector<16x256xf32>
    %154 = vector.extract_strided_slice %3 {offsets = [16, 0], sizes = [1, 256], strides = [1, 1]} : vector<18x256xf32> to vector<1x256xf32>
    %155 = vector.extract_strided_slice %3 {offsets = [17, 0], sizes = [1, 256], strides = [1, 1]} : vector<18x256xf32> to vector<1x256xf32>
    %156 = tpu.concatenate %7, %153 in 0 : vector<16x256xf32>, vector<16x256xf32> -> vector<32x256xf32>
    %157 = vector.extract_strided_slice %0 {offsets = [0, 102], sizes = [16, 288], strides = [1, 1]} : vector<16x534xf32> to vector<16x288xf32>
    %158 = vector.extract_strided_slice %2 {offsets = [0, 2], sizes = [16, 1], strides = [1, 1]} : vector<16x6xf32> to vector<16x1xf32>
    %159 = vector.extract_strided_slice %2 {offsets = [0, 3], sizes = [16, 1], strides = [1, 1]} : vector<16x6xf32> to vector<16x1xf32>
    %cst_41 = arith.constant 0.000000e+00 : f32
    %160 = vector.broadcast %cst_41 : f32 to vector<32x17xf32>
    %161 = vector.extract_strided_slice %156 {offsets = [0, 0], sizes = [32, 239], strides = [1, 1]} : vector<32x256xf32> to vector<32x239xf32>
    %162 = tpu.concatenate %160, %161 in 1 : vector<32x17xf32>, vector<32x239xf32> -> vector<32x256xf32>
    %163 = vector.broadcast %155 : vector<1x256xf32> to vector<32x256xf32>
    %164 = arith.mulf %162, %163 : vector<32x256xf32>
    %cst_42 = arith.constant 0.000000e+00 : f32
    %165 = vector.broadcast %cst_42 : f32 to vector<32x16xf32>
    %166 = vector.extract_strided_slice %156 {offsets = [0, 0], sizes = [32, 240], strides = [1, 1]} : vector<32x256xf32> to vector<32x240xf32>
    %167 = tpu.concatenate %165, %166 in 1 : vector<32x16xf32>, vector<32x240xf32> -> vector<32x256xf32>
    %cst_43 = arith.constant 0.000000e+00 : f32
    %168 = vector.broadcast %cst_43 : f32 to vector<32x15xf32>
    %169 = vector.extract_strided_slice %156 {offsets = [0, 0], sizes = [32, 241], strides = [1, 1]} : vector<32x256xf32> to vector<32x241xf32>
    %170 = tpu.concatenate %168, %169 in 1 : vector<32x15xf32>, vector<32x241xf32> -> vector<32x256xf32>
    %171 = vector.broadcast %154 : vector<1x256xf32> to vector<32x256xf32>
    %172 = arith.mulf %170, %171 : vector<32x256xf32>
    %cst_44 = arith.constant 0.000000e+00 : f32
    %173 = vector.broadcast %cst_44 : f32 to vector<32x1xf32>
    %174 = vector.extract_strided_slice %156 {offsets = [0, 0], sizes = [32, 255], strides = [1, 1]} : vector<32x256xf32> to vector<32x255xf32>
    %175 = tpu.concatenate %173, %174 in 1 : vector<32x1xf32>, vector<32x255xf32> -> vector<32x256xf32>
    %176 = vector.broadcast %155 : vector<1x256xf32> to vector<32x256xf32>
    %177 = arith.mulf %175, %176 : vector<32x256xf32>
    %178 = vector.extract_strided_slice %156 {offsets = [0, 1], sizes = [32, 255], strides = [1, 1]} : vector<32x256xf32> to vector<32x255xf32>
    %cst_45 = arith.constant 0.000000e+00 : f32
    %179 = vector.broadcast %cst_45 : f32 to vector<32x1xf32>
    %180 = tpu.concatenate %178, %179 in 1 : vector<32x255xf32>, vector<32x1xf32> -> vector<32x256xf32>
    %181 = vector.broadcast %154 : vector<1x256xf32> to vector<32x256xf32>
    %182 = arith.mulf %180, %181 : vector<32x256xf32>
    %183 = vector.extract_strided_slice %156 {offsets = [0, 15], sizes = [32, 241], strides = [1, 1]} : vector<32x256xf32> to vector<32x241xf32>
    %cst_46 = arith.constant 0.000000e+00 : f32
    %184 = vector.broadcast %cst_46 : f32 to vector<32x15xf32>
    %185 = tpu.concatenate %183, %184 in 1 : vector<32x241xf32>, vector<32x15xf32> -> vector<32x256xf32>
    %186 = vector.broadcast %155 : vector<1x256xf32> to vector<32x256xf32>
    %187 = arith.mulf %185, %186 : vector<32x256xf32>
    %188 = vector.extract_strided_slice %156 {offsets = [0, 16], sizes = [32, 240], strides = [1, 1]} : vector<32x256xf32> to vector<32x240xf32>
    %cst_47 = arith.constant 0.000000e+00 : f32
    %189 = vector.broadcast %cst_47 : f32 to vector<32x16xf32>
    %190 = tpu.concatenate %188, %189 in 1 : vector<32x240xf32>, vector<32x16xf32> -> vector<32x256xf32>
    %191 = vector.extract_strided_slice %156 {offsets = [0, 17], sizes = [32, 239], strides = [1, 1]} : vector<32x256xf32> to vector<32x239xf32>
    %cst_48 = arith.constant 0.000000e+00 : f32
    %192 = vector.broadcast %cst_48 : f32 to vector<32x17xf32>
    %193 = tpu.concatenate %191, %192 in 1 : vector<32x239xf32>, vector<32x17xf32> -> vector<32x256xf32>
    %194 = vector.broadcast %154 : vector<1x256xf32> to vector<32x256xf32>
    %195 = arith.mulf %193, %194 : vector<32x256xf32>
    %196 = tpu.concatenate %164, %167, %172, %177, %156, %182, %187, %190, %195 in 0 : vector<32x256xf32>, vector<32x256xf32>, vector<32x256xf32>, vector<32x256xf32>, vector<32x256xf32>, vector<32x256xf32>, vector<32x256xf32>, vector<32x256xf32>, vector<32x256xf32> -> vector<288x256xf32>
    %cst_49 = arith.constant dense<0.000000e+00> : vector<16x256xf32>
    %197 = tpu.matmul %157, %196, %cst_49 {dimension_numbers = #tpu.dot_dimension_numbers<[1], [0], [0], [1], [0, 0, 1, 1], [], []>} : vector<16x288xf32>, vector<288x256xf32>, vector<16x256xf32> -> vector<16x256xf32>
    %198 = vector.broadcast %158 : vector<16x1xf32> to vector<16x256xf32>
    %199 = arith.mulf %197, %198 : vector<16x256xf32>
    %200 = vector.broadcast %159 : vector<16x1xf32> to vector<16x256xf32>
    %201 = arith.addf %199, %200 : vector<16x256xf32>
    %cst_50 = arith.constant 0.000000e+00 : f32
    %202 = vector.broadcast %cst_50 : f32 to vector<16x256xf32>
    %203 = arith.maximumf %201, %202 : vector<16x256xf32>
    %204 = vector.extract_strided_slice %0 {offsets = [0, 390], sizes = [16, 144], strides = [1, 1]} : vector<16x534xf32> to vector<16x144xf32>
    %205 = vector.extract_strided_slice %2 {offsets = [0, 4], sizes = [16, 1], strides = [1, 1]} : vector<16x6xf32> to vector<16x1xf32>
    %206 = vector.extract_strided_slice %2 {offsets = [0, 5], sizes = [16, 1], strides = [1, 1]} : vector<16x6xf32> to vector<16x1xf32>
    %cst_51 = arith.constant 0.000000e+00 : f32
    %207 = vector.broadcast %cst_51 : f32 to vector<16x17xf32>
    %208 = vector.extract_strided_slice %203 {offsets = [0, 0], sizes = [16, 239], strides = [1, 1]} : vector<16x256xf32> to vector<16x239xf32>
    %209 = tpu.concatenate %207, %208 in 1 : vector<16x17xf32>, vector<16x239xf32> -> vector<16x256xf32>
    %210 = vector.broadcast %155 : vector<1x256xf32> to vector<16x256xf32>
    %211 = arith.mulf %209, %210 : vector<16x256xf32>
    %cst_52 = arith.constant 0.000000e+00 : f32
    %212 = vector.broadcast %cst_52 : f32 to vector<16x16xf32>
    %213 = vector.extract_strided_slice %203 {offsets = [0, 0], sizes = [16, 240], strides = [1, 1]} : vector<16x256xf32> to vector<16x240xf32>
    %214 = tpu.concatenate %212, %213 in 1 : vector<16x16xf32>, vector<16x240xf32> -> vector<16x256xf32>
    %cst_53 = arith.constant 0.000000e+00 : f32
    %215 = vector.broadcast %cst_53 : f32 to vector<16x15xf32>
    %216 = vector.extract_strided_slice %203 {offsets = [0, 0], sizes = [16, 241], strides = [1, 1]} : vector<16x256xf32> to vector<16x241xf32>
    %217 = tpu.concatenate %215, %216 in 1 : vector<16x15xf32>, vector<16x241xf32> -> vector<16x256xf32>
    %218 = vector.broadcast %154 : vector<1x256xf32> to vector<16x256xf32>
    %219 = arith.mulf %217, %218 : vector<16x256xf32>
    %cst_54 = arith.constant 0.000000e+00 : f32
    %220 = vector.broadcast %cst_54 : f32 to vector<16x1xf32>
    %221 = vector.extract_strided_slice %203 {offsets = [0, 0], sizes = [16, 255], strides = [1, 1]} : vector<16x256xf32> to vector<16x255xf32>
    %222 = tpu.concatenate %220, %221 in 1 : vector<16x1xf32>, vector<16x255xf32> -> vector<16x256xf32>
    %223 = vector.broadcast %155 : vector<1x256xf32> to vector<16x256xf32>
    %224 = arith.mulf %222, %223 : vector<16x256xf32>
    %225 = vector.extract_strided_slice %203 {offsets = [0, 1], sizes = [16, 255], strides = [1, 1]} : vector<16x256xf32> to vector<16x255xf32>
    %cst_55 = arith.constant 0.000000e+00 : f32
    %226 = vector.broadcast %cst_55 : f32 to vector<16x1xf32>
    %227 = tpu.concatenate %225, %226 in 1 : vector<16x255xf32>, vector<16x1xf32> -> vector<16x256xf32>
    %228 = vector.broadcast %154 : vector<1x256xf32> to vector<16x256xf32>
    %229 = arith.mulf %227, %228 : vector<16x256xf32>
    %230 = vector.extract_strided_slice %203 {offsets = [0, 15], sizes = [16, 241], strides = [1, 1]} : vector<16x256xf32> to vector<16x241xf32>
    %cst_56 = arith.constant 0.000000e+00 : f32
    %231 = vector.broadcast %cst_56 : f32 to vector<16x15xf32>
    %232 = tpu.concatenate %230, %231 in 1 : vector<16x241xf32>, vector<16x15xf32> -> vector<16x256xf32>
    %233 = vector.broadcast %155 : vector<1x256xf32> to vector<16x256xf32>
    %234 = arith.mulf %232, %233 : vector<16x256xf32>
    %235 = vector.extract_strided_slice %203 {offsets = [0, 16], sizes = [16, 240], strides = [1, 1]} : vector<16x256xf32> to vector<16x240xf32>
    %cst_57 = arith.constant 0.000000e+00 : f32
    %236 = vector.broadcast %cst_57 : f32 to vector<16x16xf32>
    %237 = tpu.concatenate %235, %236 in 1 : vector<16x240xf32>, vector<16x16xf32> -> vector<16x256xf32>
    %238 = vector.extract_strided_slice %203 {offsets = [0, 17], sizes = [16, 239], strides = [1, 1]} : vector<16x256xf32> to vector<16x239xf32>
    %cst_58 = arith.constant 0.000000e+00 : f32
    %239 = vector.broadcast %cst_58 : f32 to vector<16x17xf32>
    %240 = tpu.concatenate %238, %239 in 1 : vector<16x239xf32>, vector<16x17xf32> -> vector<16x256xf32>
    %241 = vector.broadcast %154 : vector<1x256xf32> to vector<16x256xf32>
    %242 = arith.mulf %240, %241 : vector<16x256xf32>
    %243 = tpu.concatenate %211, %214, %219, %224, %203, %229, %234, %237, %242 in 0 : vector<16x256xf32>, vector<16x256xf32>, vector<16x256xf32>, vector<16x256xf32>, vector<16x256xf32>, vector<16x256xf32>, vector<16x256xf32>, vector<16x256xf32>, vector<16x256xf32> -> vector<144x256xf32>
    %cst_59 = arith.constant dense<0.000000e+00> : vector<16x256xf32>
    %244 = tpu.matmul %204, %243, %cst_59 {dimension_numbers = #tpu.dot_dimension_numbers<[1], [0], [0], [1], [0, 0, 1, 1], [], []>} : vector<16x144xf32>, vector<144x256xf32>, vector<16x256xf32> -> vector<16x256xf32>
    %245 = vector.broadcast %205 : vector<16x1xf32> to vector<16x256xf32>
    %246 = arith.mulf %244, %245 : vector<16x256xf32>
    %247 = vector.broadcast %206 : vector<16x1xf32> to vector<16x256xf32>
    %248 = arith.addf %246, %247 : vector<16x256xf32>
    %cst_60 = arith.constant 0.000000e+00 : f32
    %249 = vector.broadcast %cst_60 : f32 to vector<16x256xf32>
    %250 = arith.maximumf %248, %249 : vector<16x256xf32>
    %c0_61 = arith.constant 0 : index
    %c0_62 = arith.constant 0 : index
    %c0_63 = arith.constant 0 : index
    %251 = vector.load %arg7[%c0_61, %c0_62, %c0_63] : memref<1x16x256xf32, #tpu.memory_space<vmem>>, vector<1x16x256xf32>
    %252 = vector.shape_cast %251 : vector<1x16x256xf32> to vector<16x256xf32>
    %253 = vector.shape_cast %250 : vector<16x256xf32> to vector<1x16x256xf32>
    tpu.vector_store %arg7[%c0_61, %c0_62, %c0_63], %253 {strides = array<i32>} : memref<1x16x256xf32, #tpu.memory_space<vmem>>, vector<1x16x256xf32>,
    return
  }
  func.func @transform_0(%arg0: i32) -> (i32, i32, i32) {
    %c0_i32 = arith.constant 0 : i32
    %c0_i32_0 = arith.constant 0 : i32
    %c0_i32_1 = arith.constant 0 : i32
    return %arg0, %c0_i32, %c0_i32_0 : i32, i32, i32
  }
  func.func @transform_1(%arg0: i32) -> (i32, i32, i32) {
    %c0_i32 = arith.constant 0 : i32
    %c0_i32_0 = arith.constant 0 : i32
    %c0_i32_1 = arith.constant 0 : i32
    %c0_i32_2 = arith.constant 0 : i32
    return %c0_i32, %c0_i32_0, %c0_i32_1 : i32, i32, i32
  }
  func.func @transform_2(%arg0: i32) -> (i32, i32) {
    %c0_i32 = arith.constant 0 : i32
    %c0_i32_0 = arith.constant 0 : i32
    %c0_i32_1 = arith.constant 0 : i32
    return %c0_i32, %c0_i32_0 : i32, i32
  }
  func.func @transform_3(%arg0: i32) -> (i32, i32) {
    %c0_i32 = arith.constant 0 : i32
    %c0_i32_0 = arith.constant 0 : i32
    %c0_i32_1 = arith.constant 0 : i32
    return %c0_i32, %c0_i32_0 : i32, i32
  }
  func.func @transform_4(%arg0: i32) -> (i32, i32) {
    %c0_i32 = arith.constant 0 : i32
    %c0_i32_0 = arith.constant 0 : i32
    %c0_i32_1 = arith.constant 0 : i32
    return %c0_i32, %c0_i32_0 : i32, i32
  }
  func.func @transform_5(%arg0: i32) -> (i32, i32) {
    %c0_i32 = arith.constant 0 : i32
    %c0_i32_0 = arith.constant 0 : i32
    %c0_i32_1 = arith.constant 0 : i32
    return %c0_i32, %c0_i32_0 : i32, i32
  }
  func.func @transform_6(%arg0: i32) -> (i32, i32, i32) {
    %c0_i32 = arith.constant 0 : i32
    %c0_i32_0 = arith.constant 0 : i32
    %c0_i32_1 = arith.constant 0 : i32
    return %arg0, %c0_i32, %c0_i32_0 : i32, i32, i32
  }
}

</mosaic_0001>

<bundles_post_ra>
// kernel: mram_forward.1
= control target key start
LH: loop header
LB: loop body
LE: loop exit
PB: predicated region body
PF: predicated region fallthrough
CT: control target
= control target key end

     0   :  { %s7306_s21 = smov 0   ;;  %s10839_s0 = inlined_call_operand.vmem [shape: f32[2,16,256], index: 0, kind: input, shape index: {}]   ;;  %s10840_s1 = inlined_call_operand.vmem [shape: f32[2,16,6], index: 1, kind: input, shape index: {}]   ;;  %s10841_s2 = inlined_call_operand.vmem [shape: f32[18,256], index: 2, kind: input, shape index: {}]   ;;  %s10842_s3 = inlined_call_operand.vmem [shape: f32[16,534], index: 3, kind: input, shape index: {}]   ;;  %s10843_s4 = inlined_call_operand.vmem [shape: f32[11,16], index: 4, kind: input, shape index: {}]   ;;  %s10844_s5 = inlined_call_operand.vmem [shape: f32[16,6], index: 5, kind: input, shape index: {}]   ;;  %s10845_s6 = inlined_call_operand.vmem [shape: f32[2,16,256], index: 6, kind: output, shape index: {}]  }
   0x1 LB: > { %s7312_s22 = sadd.s32 4294967295, %s7241_s21   ;;  %p5982_p0 = scmp.ge.s32.totalorder %s7241_s21, 1  ;;  %s7241_s21 = sphi %s7306_s21, %s16_s21  }
   0x2   : > { %p212_p1 = scmp.lt.s32.totalorder %s7241_s21, 3 }
   0x4   : > { %p213_p2 = pnand %p5982_p0, %p212_p1 }
   0x6   : > { %216 = sbr.rel (%p213_p2) target bundleno = 3631 (0xe2f), region = 44 }
   0xb   : > { %p242_p3 = scmp.lt.s32.totalorder %s7312_s22, 1  ;;  %v7323_v0 = vld [vmem:[%s10842_s3 + $0x28] sm:$0xff]  ;;  %v7330_v1 = vld [vmem:[%s10842_s3] sm:$0xff]  ;;  %v726_v6 = vlaneseq  ;;  %s7243_s10 = smov 6   ;;  %vm404_vm0 = vcmask 130048   ;;  %vm1371_vm1 = vcmask 48128  }
   0xc   : > { %6612 = vmatprep.subr.mxu0 %v7323_v0  ;;  %v7352_v9 = vld [vmem:[%s10843_s4] sm:$0xff]  ;;  %s7244_s11 = smov 106   ;;  %s7245_s12 = smov 122   ;;  %vm2785_vm2 = vcmask 1045504   ;;  %vm3940_vm13 = vcmask 261120   ;;  %vm4006_vm14 = vcmask 523264  }
   0xd   : > { %s7318_s23 = scalar_select %p242_p3, %s7312_s22, 1  ;;  %6613 = vmatpush3.msra.mxu0 %v7323_v0  ;;  %v7346_v7 = vshrl.u32 %v726_v6, 7  ;;  %vm3973_vm15 = vcmask 392192  }
   0xe   : > { %6614 = vmatprep.subr.mxu0 %v7330_v1  ;;  %s7246_s27 = smov 90   ;;  %s7247_s30 = smov 74  }
   0xf   : > { %s6246_s26 = sshll.u32 %s7318_s23, 5  ;;  %6615 = vmatpush3.msra.mxu0 %v7330_v1  ;;  %10938 = vst [vmem:[#allocation2_spill] sm:$0xff] %v7346_v7  ;;  %v10846_v8 = vsub.s32 2, %v7346_v7  ;;  %v7358_v11 = vsub.s32 1, %v7346_v7  ;;  %v7493_v45 = vsub.s32 0, %v7346_v7  ;;  %s7249_s19 = smov 58  }
  0x10   : > { %s7337_s7 = scalar_lea.vmem %s10839_s0, %s6246_s26  ;;  %s7250_s20 = smov 16  }
  0x11   : > { %v336_v2 = vld [vmem:[%s7337_s7] sm:$0xff]  ;;  %v337_v3 = vld [vmem:[%s7337_s7 + $0x8] sm:$0xff]  ;;  %v338_v4 = vld [vmem:[%s7337_s7 + $0x10] sm:$0xff]  ;;  %v805_v10 = vrot.slane %v7352_v9, %v10846_v8  ;;  %10939 = vst [vmem:[#allocation3_spill] sm:$0xff] %v7358_v11  ;;  %v765_v12 = vrot.slane %v7352_v9, %v7358_v11  ;;  %v7497_v46 = vrot.slane %v7352_v9, %v7493_v45  ;;  %s7251_s24 = smov 32   ;;  %s7252_s25 = smov 48  }
  0x12   : > { %340 = vxpose.xlu0.b32.start [1/2] (short) %v336_v2, 128  ;;  %372 = vxpose.xlu1.b32.start [1/2] (short) %v337_v3, 128  ;;  %v339_v5 = vld [vmem:[%s7337_s7 + $0x18] sm:$0xff]  ;;  %10963 = vst [vmem:[#allocation27_spill] sm:$0xff] %v7493_v45  ;;  %s7253_s8 = smov 80   ;;  %s6109_s17 = sshll.u32 %s7312_s22, 4 }
  0x13   : > { %s7259_s9 = smov 15   ;;  %s7263_s13 = smov 127  }
  0x14   : > { %s7264_s14 = smov 111  }
  0x16   : > { %341 = vxpose.xlu0.b32.end [2/2] (short) %v338_v4, 128  ;;  %373 = vxpose.xlu1.b32.end [2/2] (short) %v339_v5, 128 }
  0x6c   : > { %807 = vrot.lane.b32.xlu1 %v805_v10, %s7243_s10 }
  0x70   : > { %974 = vrot.lane.b32.xlu1 %v7323_v0, %s7244_s11 }
  0x74   : > { %972 = vrot.lane.b32.xlu1 %v7330_v1, %s7244_s11  ;;  %s7254_s11 = smov 64  }
  0x77   : > { %767 = vrot.lane.b32.xlu0 %v765_v12, %s7243_s10  ;;  %s7261_s10 = smov 112  }
  0x8e   : > { %v7362_v13 = vpop.trf.xlu0  ;;  %v7364_v14 = vpop.trf.xlu1 }
  0x8f   : > { %10940 = vst [vmem:[#allocation4_spill] sm:$0xff] %v7362_v13  ;;  %10941 = vst [vmem:[#allocation5_spill] sm:$0xff] %v7364_v14  ;;  %6616 = vmatprep.mubr.msk.f32.mxu0 %vm404_vm0, %v7362_v13 }
  0x92   : > { %v7368_v15 = vpop.trf.xlu0  ;;  %v7372_v16 = vpop.trf.xlu1 }
  0x93   : > { %10942 = vst [vmem:[#allocation6_spill] sm:$0xff] %v7368_v15  ;;  %6617 = vmatmul.mubr.msk.f32.vlgmr.msra.gmra.mxu0 %vm404_vm0, %v7368_v15  ;;  %10943 = vst [vmem:[#allocation7_spill] sm:$0xff] %v7372_v16 }
  0x96   : > { %v7374_v17 = vpop.trf.xlu0  ;;  %v7380_v19 = vpop.trf.xlu1 }
  0x97   : > { %10944 = vst [vmem:[#allocation8_spill] sm:$0xff] %v7374_v17  ;;  %6619 = vmatprep.mubr.msk.f32.mxu0 %vm404_vm0, %v7374_v17  ;;  %10946 = vst [vmem:[#allocation10_spill] sm:$0xff] %v7380_v19 }
  0x9a   : > { %v7378_v18 = vpop.trf.xlu0  ;;  %v7388_v21 = vpop.trf.xlu1 }
  0x9b   : > { %10945 = vst [vmem:[#allocation9_spill] sm:$0xff] %v7378_v18  ;;  %6620 = vmatmul.mubr.msk.f32.gmra.mxu0 %vm404_vm0, %v7378_v18  ;;  %10948 = vst [vmem:[#allocation12_spill] sm:$0xff] %v7388_v21 }
  0x9e   : > { %v7384_v20 = vpop.trf.xlu0  ;;  %v7396_v24 = vpop.trf.xlu1 }
  0x9f   : > { %10947 = vst [vmem:[#allocation11_spill] sm:$0xff] %v7384_v20  ;;  %6622 = vmatprep.mubr.msk.f32.mxu0 %vm404_vm0, %v7384_v20  ;;  %10951 = vst [vmem:[#allocation15_spill] sm:$0xff] %v7396_v24 }
  0xa2   : > { %v7390_v22 = vpop.trf.xlu0  ;;  %v7404_v26 = vpop.trf.xlu1 }
  0xa3   : > { %10949 = vst [vmem:[#allocation13_spill] sm:$0xff] %v7390_v22  ;;  %6623 = vmatmul.mubr.msk.f32.gmra.mxu0 %vm404_vm0, %v7390_v22  ;;  %10953 = vst [vmem:[#allocation17_spill] sm:$0xff] %v7404_v26 }
  0xa6   : > { %v7394_v23 = vpop.trf.xlu0  ;;  %v7412_v29 = vpop.trf.xlu1 }
  0xa7   : > { %10950 = vst [vmem:[#allocation14_spill] sm:$0xff] %v7394_v23  ;;  %6625 = vmatprep.mubr.msk.f32.mxu0 %vm404_vm0, %v7394_v23  ;;  %10956 = vst [vmem:[#allocation20_spill] sm:$0xff] %v7412_v29 }
  0xaa   : > { %v7400_v25 = vpop.trf.xlu0  ;;  %v7420_v31 = vpop.trf.xlu1 }
  0xab   : > { %10952 = vst [vmem:[#allocation16_spill] sm:$0xff] %v7400_v25  ;;  %6626 = vmatmul.mubr.msk.f32.gmra.mxu0 %vm404_vm0, %v7400_v25  ;;  %10958 = vst [vmem:[#allocation22_spill] sm:$0xff] %v7420_v31 }
  0xae   : > { %v7406_v27 = vpop.trf.xlu0  ;;  %v7428_v34 = vpop.trf.xlu1 }
  0xaf   : > { %10954 = vst [vmem:[#allocation18_spill] sm:$0xff] %v7406_v27  ;;  %6628 = vmatprep.mubr.msk.f32.mxu0 %vm404_vm0, %v7406_v27  ;;  %10960 = vst [vmem:[#allocation24_spill] sm:$0xff] %v7428_v34 }
  0xb2   : > { %v7410_v28 = vpop.trf.xlu0  ;;  %v7436_v36 = vpop.trf.xlu1 }
  0xb3   : > { %10955 = vst [vmem:[#allocation19_spill] sm:$0xff] %v7410_v28  ;;  %6629 = vmatmul.mubr.msk.f32.gmra.mxu0 %vm404_vm0, %v7410_v28  ;;  %10961 = vst [vmem:[#allocation25_spill] sm:$0xff] %v7436_v36 }
  0xb6   : > { %v7416_v30 = vpop.trf.xlu0  ;;  %v7444_v39 = vpop.trf.xlu1 }
  0xb7   : > { %10957 = vst [vmem:[#allocation21_spill] sm:$0xff] %v7416_v30  ;;  %6631 = vmatprep.mubr.msk.f32.mxu0 %vm404_vm0, %v7416_v30  ;;  %10962 = vst [vmem:[#allocation26_spill] sm:$0xff] %v7444_v39 }
  0xba   : > { %v7422_v32 = vpop.trf.xlu0  ;;  %v7454_v40 = vpop.trf.xlu1 }
  0xbb   : > { %10959 = vst [vmem:[#allocation23_spill] sm:$0xff] %v7422_v32  ;;  %6632 = vmatmul.mubr.msk.f32.gmra.mxu0 %vm404_vm0, %v7422_v32 }
  0xbe   : > { %v7426_v33 = vpop.trf.xlu0  ;;  %v7461_v41 = vpop.trf.xlu1 }
  0xbf   : > { %6634 = vmatprep.mubr.msk.f32.mxu0 %vm404_vm0, %v7426_v33 }
  0xc2   : > { %v7432_v35 = vpop.trf.xlu0  ;;  %v7472_v42 = vpop.trf.xlu1 }
  0xc3   : > { %6635 = vmatmul.mubr.msk.f32.gmra.mxu0 %vm404_vm0, %v7432_v35 }
  0xc6   : > { %v7438_v37 = vpop.trf.xlu0  ;;  %v7478_v43 = vpop.trf.xlu1 }
  0xc7   : > { %6637 = vmatprep.mubr.msk.f32.mxu0 %vm404_vm0, %v7438_v37 }
  0xca   : > { %v7442_v38 = vpop.trf.xlu0  ;;  %v7488_v44 = vpop.trf.xlu1 }
  0xcb   : > { %6638 = vmatmul.mubr.msk.f32.gmra.mxu0 %vm404_vm0, %v7442_v38 }
  0xcc   : > { %6640 = vmatprep.mubr.msk.f32.mxu0 %vm404_vm0, %v7364_v14 }
  0xcf   : > { %6641 = vmatmul.mubr.msk.f32.gmra.mxu0 %vm404_vm0, %v7372_v16 }
  0xd0   : > { %6643 = vmatprep.mubr.msk.f32.mxu0 %vm404_vm0, %v7380_v19 }
  0xd3   : > { %6644 = vmatmul.mubr.msk.f32.gmra.mxu0 %vm404_vm0, %v7388_v21 }
  0xd4   : > { %6646 = vmatprep.mubr.msk.f32.mxu0 %vm404_vm0, %v7396_v24 }
  0xd7   : > { %6647 = vmatmul.mubr.msk.f32.gmra.mxu0 %vm404_vm0, %v7404_v26 }
  0xd8   : > { %6649 = vmatprep.mubr.msk.f32.mxu0 %vm404_vm0, %v7412_v29 }
  0xdb   : > { %6650 = vmatmul.mubr.msk.f32.gmra.mxu0 %vm404_vm0, %v7420_v31 }
  0xdc   : > { %6652 = vmatprep.mubr.msk.f32.mxu0 %vm404_vm0, %v7428_v34 }
  0xde   : > { %v7501_v49 = vpop.permute.xlu1 %807 }
  0xdf   : > { %6653 = vmatmul.mubr.msk.f32.gmra.mxu0 %vm404_vm0, %v7436_v36 }
  0xe0   : > { %6655 = vmatprep.mubr.msk.f32.mxu0 %vm404_vm0, %v7444_v39 }
  0xe3   : > { %6656 = vmatmul.mubr.msk.f32.gmra.mxu0 %vm404_vm0, %v7454_v40 }
  0xe4   : > { %6658 = vmatprep.mubr.msk.f32.mxu0 %vm404_vm0, %v7461_v41 }
  0xe7   : > { %6659 = vmatmul.mubr.msk.f32.gmra.mxu0 %vm404_vm0, %v7472_v42 }
  0xe8   : > { %6661 = vmatprep.mubr.msk.f32.mxu0 %vm404_vm0, %v7478_v43 }
  0xe9   : > { %v7499_v47 = vpop.permute.xlu0 %767 }
  0xeb   : > { %6662 = vmatmul.mubr.msk.f32.gmra.mxu0 %vm404_vm0, %v7488_v44 }
 0x153   : > { %v6618_v48 = vpop.f32.mrf.mxu0 }
 0x154   : > { %v7504_v50 = vadd.f32 %v6618_v48, %v7497_v46  ;;  %v771_v51 = vmul.f32 %v6618_v48, %v7499_v47 }
 0x155   : > { %v567_v52 = vpop.f32.mrf.mxu0 }
 0x156   : > { %v770_v53 = vmul.f32 %v7499_v47, %v567_v52  ;;  %v811_v54 = vadd.f32 %v7501_v49, %v771_v51  ;;  %v7524_v5 = vadd.f32 %v7497_v46, %v567_v52  ;;  %v1373_v10 = vsel %vm1371_vm1, %v7504_v50, -inf }
 0x158   : > { %v843_v55 = vmax.f32 %v811_v54, 0.0  ;;  %v810_v56 = vadd.f32 %v7501_v49, %v770_v53 }
 0x15a   : > { %908 = vrot.lane.b32.xlu0 %v843_v55, %s7245_s12  ;;  %v842_v57 = vmax.f32 %v810_v56, 0.0  ;;  %v1372_v55 = vsel %vm1371_vm1, %v7524_v5, -inf }
 0x15b   : > { %v6621_v58 = vpop.f32.mrf.mxu0 }
 0x15c   : > { %v7512_v59 = vadd.f32 %v6621_v58, %v7497_v46  ;;  %v773_v60 = vmul.f32 %v6621_v58, %v7499_v47  ;;  %906 = vrot.lane.b32.xlu1 %v842_v57, %s7245_s12 }
 0x15d   : > { %v577_v61 = vpop.f32.mrf.mxu0 }
 0x15e   : > { %v813_v62 = vadd.f32 %v7501_v49, %v773_v60  ;;  %v7518_v63 = vadd.f32 %v7497_v46, %v577_v61  ;;  %v772_v0 = vmul.f32 %v7499_v47, %v577_v61 }
 0x160   : > { %v812_v1 = vadd.f32 %v7501_v49, %v772_v0  ;;  %v845_v2 = vmax.f32 %v813_v62, 0.0  ;;  %v975_v62 = vpop.permute.xlu1 %974 }
 0x161   : > { %6664 = vmatprep.subr.mxu1 %v975_v62 }
 0x162   : > { %912 = vrot.lane.b32.xlu0 %v845_v2, %s7245_s12  ;;  %v844_v3 = vmax.f32 %v812_v1, 0.0  ;;  %6665 = vmatpush3.msra.mxu1 %v975_v62 }
 0x163   : > { %v6624_v4 = vpop.f32.mrf.mxu0 }
 0x164   : > { %v7527_v6 = vadd.f32 %v6624_v4, %v7497_v46  ;;  %v775_v9 = vmul.f32 %v6624_v4, %v7499_v47  ;;  %910 = vrot.lane.b32.xlu1 %v844_v3, %s7245_s12  ;;  %v1375_v3 = vsel %vm1371_vm1, %v7512_v59, -inf }
 0x165   : > { %v587_v12 = vpop.f32.mrf.mxu0 }
 0x166   : > { %v815_v48 = vadd.f32 %v7501_v49, %v775_v9  ;;  %v1378_v51 = vsel %vm1371_vm1, %v7527_v6, -inf  ;;  %v7537_v53 = vadd.f32 %v7497_v46, %v587_v12  ;;  %v774_v52 = vmul.f32 %v7499_v47, %v587_v12 }
 0x167   : > { %v1379_v54 = vmax.f32 %v1373_v10, %v1378_v51  ;;  %v973_v51 = vpop.permute.xlu1 %972 }
 0x168   : > { %v814_v56 = vadd.f32 %v7501_v49, %v774_v52  ;;  %v1376_v57 = vsel %vm1371_vm1, %v7537_v53, -inf  ;;  %v847_v58 = vmax.f32 %v815_v48, 0.0  ;;  %6666 = vmatprep.subr.mxu1 %v973_v51 }
 0x169   : > { %v1377_v60 = vmax.f32 %v1372_v55, %v1376_v57  ;;  %v1374_v55 = vsel %vm1371_vm1, %v7518_v63, -inf  ;;  %6667 = vmatpush3.msra.mxu1 %v973_v51 }
 0x16a   : > { %916 = vrot.lane.b32.xlu0 %v847_v58, %s7245_s12  ;;  %v846_v61 = vmax.f32 %v814_v56, 0.0 }
 0x16b   : > { %v6627_v0 = vpop.f32.mrf.mxu0 }
 0x16c   : > { %v7547_v1 = vadd.f32 %v6627_v0, %v7497_v46  ;;  %v777_v2 = vmul.f32 %v6627_v0, %v7499_v47  ;;  %914 = vrot.lane.b32.xlu1 %v846_v61, %s7245_s12 }
 0x16d   : > { %v597_v4 = vpop.f32.mrf.mxu0 }
 0x16e   : > { %v817_v9 = vadd.f32 %v7501_v49, %v777_v2  ;;  %v1382_v10 = vsel %vm1371_vm1, %v7547_v1, -inf  ;;  %v7557_v12 = vadd.f32 %v7497_v46, %v597_v4  ;;  %v776_v48 = vmul.f32 %v7499_v47, %v597_v4 }
 0x16f   : > { %v1383_v52 = vmax.f32 %v1375_v3, %v1382_v10 }
 0x170   : > { %v816_v56 = vadd.f32 %v7501_v49, %v776_v48  ;;  %v1380_v57 = vsel %vm1371_vm1, %v7557_v12, -inf  ;;  %v849_v58 = vmax.f32 %v817_v9, 0.0 }
 0x171   : > { %v1381_v61 = vmax.f32 %v1374_v55, %v1380_v57 }
 0x172   : > { %920 = vrot.lane.b32.xlu0 %v849_v58, %s7245_s12  ;;  %v848_v62 = vmax.f32 %v816_v56, 0.0 }
 0x173   : > { %v6630_v0 = vpop.f32.mrf.mxu0 }
 0x174   : > { %v7567_v2 = vadd.f32 %v6630_v0, %v7497_v46  ;;  %v779_v3 = vmul.f32 %v6630_v0, %v7499_v47  ;;  %918 = vrot.lane.b32.xlu1 %v848_v62, %s7245_s12 }
 0x175   : > { %v607_v4 = vpop.f32.mrf.mxu0 }
 0x176   : > { %v819_v10 = vadd.f32 %v7501_v49, %v779_v3  ;;  %v1386_v48 = vsel %vm1371_vm1, %v7567_v2, -inf  ;;  %v7575_v9 = vadd.f32 %v7497_v46, %v607_v4  ;;  %v778_v51 = vmul.f32 %v7499_v47, %v607_v4 }
 0x177   : > { %v1387_v55 = vmax.f32 %v1379_v54, %v1386_v48 }
 0x178   : > { %v818_v56 = vadd.f32 %v7501_v49, %v778_v51  ;;  %v1384_v57 = vsel %vm1371_vm1, %v7575_v9, -inf  ;;  %v851_v58 = vmax.f32 %v819_v10, 0.0 }
 0x179   : > { %v7581_v0 = vmax.f32 %v1377_v60, %v1384_v57 }
 0x17a   : > { %924 = vrot.lane.b32.xlu0 %v851_v58, %s7245_s12  ;;  %v850_v62 = vmax.f32 %v818_v56, 0.0 }
 0x17b   : > { %v6633_v3 = vpop.f32.mrf.mxu0 }
 0x17c   : > { %v7585_v8 = vadd.f32 %v6633_v3, %v7497_v46  ;;  %v781_v11 = vmul.f32 %v6633_v3, %v7499_v47  ;;  %922 = vrot.lane.b32.xlu1 %v850_v62, %s7245_s12 }
 0x17d   : > { %v617_v54 = vpop.f32.mrf.mxu0 }
 0x17e   : > { %v821_v4 = vadd.f32 %v7501_v49, %v781_v11  ;;  %v1390_v48 = vsel %vm1371_vm1, %v7585_v8, -inf  ;;  %v7593_v60 = vadd.f32 %v7497_v46, %v617_v54  ;;  %v780_v10 = vmul.f32 %v7499_v47, %v617_v54 }
 0x17f   : > { %v1391_v51 = vmax.f32 %v1383_v52, %v1390_v48 }
 0x180   : > { %v820_v56 = vadd.f32 %v7501_v49, %v780_v10  ;;  %v1388_v57 = vsel %vm1371_vm1, %v7593_v60, -inf  ;;  %v853_v58 = vmax.f32 %v821_v4, 0.0 }
 0x181   : > { %v7599_v3 = vmax.f32 %v1381_v61, %v1388_v57 }
 0x182   : > { %928 = vrot.lane.b32.xlu0 %v853_v58, %s7245_s12  ;;  %v852_v11 = vmax.f32 %v820_v56, 0.0 }
 0x183   : > { %v6636_v62 = vpop.f32.mrf.mxu0 }
 0x184   : > { %v7603_v45 = vadd.f32 %v6636_v62, %v7497_v46  ;;  %v783_v7 = vmul.f32 %v6636_v62, %v7499_v47  ;;  %926 = vrot.lane.b32.xlu1 %v852_v11, %s7245_s12 }
 0x185   : > { %v627_v52 = vpop.f32.mrf.mxu0 }
 0x186   : > { %v823_v54 = vadd.f32 %v7501_v49, %v783_v7  ;;  %v1394_v48 = vsel %vm1371_vm1, %v7603_v45, -inf  ;;  %v7611_v61 = vadd.f32 %v7497_v46, %v627_v52  ;;  %v782_v4 = vmul.f32 %v7499_v47, %v627_v52 }
 0x187   : > { %v1395_v10 = vmax.f32 %v1387_v55, %v1394_v48 }
 0x188   : > { %v822_v56 = vadd.f32 %v7501_v49, %v782_v4  ;;  %v1392_v57 = vsel %vm1371_vm1, %v7611_v61, -inf  ;;  %v855_v58 = vmax.f32 %v823_v54, 0.0 }
 0x189   : > { %v1393_v11 = vmax.f32 %v7581_v0, %v1392_v57 }
 0x18a   : > { %932 = vrot.lane.b32.xlu0 %v855_v58, %s7245_s12  ;;  %v854_v7 = vmax.f32 %v822_v56, 0.0 }
 0x18b   : > { %v6639_v62 = vpop.f32.mrf.mxu0 }
 0x18c   : > { %v7620_v13 = vadd.f32 %v6639_v62, %v7497_v46  ;;  %v785_v14 = vmul.f32 %v6639_v62, %v7499_v47  ;;  %930 = vrot.lane.b32.xlu1 %v854_v7, %s7245_s12 }
 0x18d   : > { %v637_v55 = vpop.f32.mrf.mxu0 }
 0x18e   : > { %v825_v52 = vadd.f32 %v7501_v49, %v785_v14  ;;  %v1398_v48 = vsel %vm1371_vm1, %v7620_v13, -inf  ;;  %v7628_v54 = vadd.f32 %v7497_v46, %v637_v55  ;;  %v784_v0 = vmul.f32 %v7499_v47, %v637_v55 }
 0x18f   : > { %v1399_v4 = vmax.f32 %v1391_v51, %v1398_v48  ;;  %v6642_v56 = vpop.f32.mrf.mxu0 }
 0x190   : > { %v824_v57 = vadd.f32 %v7501_v49, %v784_v0  ;;  %v1396_v58 = vsel %vm1371_vm1, %v7628_v54, -inf  ;;  %v7635_v7 = vadd.f32 %v6642_v56, %v7497_v46  ;;  %v787_v14 = vmul.f32 %v6642_v56, %v7499_v47 }
 0x191   : > { %v1397_v62 = vmax.f32 %v7599_v3, %v1396_v58  ;;  %v647_v15 = vpop.f32.mrf.mxu0  ;;  %v857_v16 = vmax.f32 %v825_v52, 0.0 }
 0x192   : > { %v827_v17 = vadd.f32 %v7501_v49, %v787_v14  ;;  %v1402_v51 = vsel %vm1371_vm1, %v7635_v7, -inf  ;;  %v7643_v55 = vadd.f32 %v7497_v46, %v647_v15  ;;  %v786_v48 = vmul.f32 %v7499_v47, %v647_v15 }
 0x193   : > { %v7646_v0 = vmax.f32 %v1395_v10, %v1402_v51  ;;  %936 = vrot.lane.b32.xlu0 %v857_v16, %s7245_s12  ;;  %v6645_v19 = vpop.f32.mrf.mxu0  ;;  %v856_v56 = vmax.f32 %v824_v57, 0.0 }
 0x194   : > { %v826_v3 = vadd.f32 %v7501_v49, %v786_v48  ;;  %v1400_v52 = vsel %vm1371_vm1, %v7643_v55, -inf  ;;  %v7653_v58 = vadd.f32 %v6645_v19, %v7497_v46  ;;  %v789_v14 = vmul.f32 %v6645_v19, %v7499_v47 }
 0x195   : > { %v7656_v18 = vmax.f32 %v1393_v11, %v1400_v52  ;;  %934 = vrot.lane.b32.xlu1 %v856_v56, %s7245_s12  ;;  %v657_v15 = vpop.f32.mrf.mxu0  ;;  %v859_v10 = vmax.f32 %v827_v17, 0.0  ;;  %v7672_v17 = vld [vmem:[%s10841_s2 + $0x8] sm:$0xff] }
 0x196   : > { %v829_v16 = vadd.f32 %v7501_v49, %v789_v14  ;;  %v1406_v57 = vsel %vm1371_vm1, %v7653_v58, -inf  ;;  %v7663_v51 = vadd.f32 %v7497_v46, %v657_v15  ;;  %v788_v48 = vmul.f32 %v7499_v47, %v657_v15  ;;  %1601 = vmatprep.mubr.f32.mxu0 %v7672_v17 }
 0x197   : > { %v7666_v21 = vmax.f32 %v1399_v4, %v1406_v57  ;;  %940 = vrot.lane.b32.xlu0 %v859_v10, %s7245_s12  ;;  %v6648_v19 = vpop.f32.mrf.mxu0  ;;  %v858_v11 = vmax.f32 %v826_v3, 0.0 }
 0x198   : > { %v828_v56 = vadd.f32 %v7501_v49, %v788_v48  ;;  %v1404_v52 = vsel %vm1371_vm1, %v7663_v51, -inf  ;;  %v7678_v14 = vadd.f32 %v6648_v19, %v7497_v46  ;;  %v791_v4 = vmul.f32 %v6648_v19, %v7499_v47 }
 0x199   : > { %v7682_v15 = vmax.f32 %v1397_v62, %v1404_v52  ;;  %938 = vrot.lane.b32.xlu1 %v858_v11, %s7245_s12  ;;  %v667_v3 = vpop.f32.mrf.mxu0  ;;  %v861_v10 = vmax.f32 %v829_v16, 0.0 }
 0x19a   : > { %v831_v57 = vadd.f32 %v7501_v49, %v791_v4  ;;  %v1410_v48 = vsel %vm1371_vm1, %v7678_v14, -inf  ;;  %v7689_v20 = vadd.f32 %v7497_v46, %v667_v3  ;;  %v790_v24 = vmul.f32 %v7499_v47, %v667_v3 }
 0x19b   : > { %v1411_v19 = vmax.f32 %v7646_v0, %v1410_v48  ;;  %944 = vrot.lane.b32.xlu0 %v861_v10, %s7245_s12  ;;  %v6651_v62 = vpop.f32.mrf.mxu0  ;;  %v860_v52 = vmax.f32 %v828_v56, 0.0 }
 0x19c   : > { %v830_v11 = vadd.f32 %v7501_v49, %v790_v24  ;;  %v1408_v16 = vsel %vm1371_vm1, %v7689_v20, -inf  ;;  %v7698_v4 = vadd.f32 %v6651_v62, %v7497_v46  ;;  %v793_v22 = vmul.f32 %v6651_v62, %v7499_v47 }
 0x19d   : > { %v1409_v26 = vmax.f32 %v7656_v18, %v1408_v16  ;;  %942 = vrot.lane.b32.xlu1 %v860_v52, %s7245_s12  ;;  %v677_v3 = vpop.f32.mrf.mxu0  ;;  %v863_v0 = vmax.f32 %v831_v57, 0.0 }
 0x19e   : > { %v833_v10 = vadd.f32 %v7501_v49, %v793_v22  ;;  %v1414_v56 = vsel %vm1371_vm1, %v7698_v4, -inf  ;;  %v7707_v24 = vadd.f32 %v7497_v46, %v677_v3  ;;  %v792_v48 = vmul.f32 %v7499_v47, %v677_v3 }
 0x19f   : > { %v1415_v23 = vmax.f32 %v7666_v21, %v1414_v56  ;;  %948 = vrot.lane.b32.xlu0 %v863_v0, %s7245_s12  ;;  %v6654_v62 = vpop.f32.mrf.mxu0  ;;  %v862_v18 = vmax.f32 %v830_v11, 0.0 }
 0x1a0   : > { %v832_v52 = vadd.f32 %v7501_v49, %v792_v48  ;;  %v1412_v57 = vsel %vm1371_vm1, %v7707_v24, -inf  ;;  %v7716_v22 = vadd.f32 %v6654_v62, %v7497_v46  ;;  %v795_v16 = vmul.f32 %v6654_v62, %v7499_v47 }
 0x1a1   : > { %v1413_v29 = vmax.f32 %v7682_v15, %v1412_v57  ;;  %946 = vrot.lane.b32.xlu1 %v862_v18, %s7245_s12  ;;  %v687_v3 = vpop.f32.mrf.mxu0  ;;  %v865_v21 = vmax.f32 %v833_v10, 0.0 }
 0x1a2   : > { %v835_v0 = vadd.f32 %v7501_v49, %v795_v16  ;;  %v1418_v11 = vsel %vm1371_vm1, %v7716_v22, -inf  ;;  %v7725_v56 = vadd.f32 %v7497_v46, %v687_v3  ;;  %v794_v48 = vmul.f32 %v7499_v47, %v687_v3 }
 0x1a3   : > { %v1419_v25 = vmax.f32 %v1411_v19, %v1418_v11  ;;  %952 = vrot.lane.b32.xlu0 %v865_v21, %s7245_s12  ;;  %v6657_v62 = vpop.f32.mrf.mxu0  ;;  %v864_v31 = vmax.f32 %v832_v52, 0.0 }
 0x1a4   : > { %v834_v15 = vadd.f32 %v7501_v49, %v794_v48  ;;  %v1416_v10 = vsel %vm1371_vm1, %v7725_v56, -inf  ;;  %v7733_v18 = vadd.f32 %v6657_v62, %v7497_v46  ;;  %v797_v57 = vmul.f32 %v6657_v62, %v7499_v47 }
 0x1a5   : > { %v1417_v16 = vmax.f32 %v1409_v26, %v1416_v10  ;;  %950 = vrot.lane.b32.xlu1 %v864_v31, %s7245_s12  ;;  %v697_v27 = vpop.f32.mrf.mxu0  ;;  %v867_v3 = vmax.f32 %v835_v0, 0.0 }
 0x1a6   : > { %v837_v19 = vadd.f32 %v7501_v49, %v797_v57  ;;  %v1422_v52 = vsel %vm1371_vm1, %v7733_v18, -inf  ;;  %v7741_v21 = vadd.f32 %v7497_v46, %v697_v27  ;;  %v796_v11 = vmul.f32 %v7499_v47, %v697_v27 }
 0x1a7   : > { %v1423_v48 = vmax.f32 %v1415_v23, %v1422_v52  ;;  %956 = vrot.lane.b32.xlu0 %v867_v3, %s7245_s12  ;;  %v6660_v34 = vpop.f32.mrf.mxu0  ;;  %v866_v62 = vmax.f32 %v834_v15, 0.0 }
 0x1a8   : > { %v836_v26 = vadd.f32 %v7501_v49, %v796_v11  ;;  %v1420_v31 = vsel %vm1371_vm1, %v7741_v21, -inf  ;;  %v7749_v0 = vadd.f32 %v6660_v34, %v7497_v46  ;;  %v799_v10 = vmul.f32 %v6660_v34, %v7499_v47 }
 0x1a9   : > { %v1421_v57 = vmax.f32 %v1413_v29, %v1420_v31  ;;  %954 = vrot.lane.b32.xlu1 %v866_v62, %s7245_s12  ;;  %v707_v28 = vpop.f32.mrf.mxu0  ;;  %v869_v27 = vmax.f32 %v837_v19, 0.0 }
 0x1aa   : > { %v839_v23 = vadd.f32 %v7501_v49, %v799_v10  ;;  %v1426_v15 = vsel %vm1371_vm1, %v7749_v0, -inf  ;;  %v7757_v3 = vadd.f32 %v7497_v46, %v707_v28  ;;  %v798_v52 = vmul.f32 %v7499_v47, %v707_v28 }
 0x1ab   : > { %v1427_v11 = vmax.f32 %v1419_v25, %v1426_v15  ;;  %960 = vrot.lane.b32.xlu0 %v869_v27, %s7245_s12  ;;  %v6663_v36 = vpop.f32.mrf.mxu0  ;;  %v868_v34 = vmax.f32 %v836_v26, 0.0 }
 0x1ac   : > { %v838_v29 = vadd.f32 %v7501_v49, %v798_v52  ;;  %v1424_v19 = vsel %vm1371_vm1, %v7757_v3, -inf  ;;  %v7765_v62 = vadd.f32 %v6663_v36, %v7497_v46  ;;  %v801_v31 = vmul.f32 %v6663_v36, %v7499_v47 }
 0x1ad   : > { %v1425_v10 = vmax.f32 %v1417_v16, %v1424_v19  ;;  %958 = vrot.lane.b32.xlu1 %v868_v34, %s7245_s12  ;;  %v717_v30 = vpop.f32.mrf.mxu0  ;;  %v871_v28 = vmax.f32 %v839_v23, 0.0 }
 0x1ae   : > { %v841_v25 = vadd.f32 %v7501_v49, %v801_v31  ;;  %v1430_v26 = vsel %vm1371_vm1, %v7765_v62, -inf  ;;  %v7773_v27 = vadd.f32 %v7497_v46, %v717_v30  ;;  %v800_v15 = vmul.f32 %v7499_v47, %v717_v30 }
 0x1af   : > { %v1432_v52 = vmax.f32 %v1425_v10, %v1427_v11  ;;  %v1431_v39 = vmax.f32 %v1423_v48, %v1430_v26  ;;  %964 = vrot.lane.b32.xlu0 %v871_v28, %s7245_s12  ;;  %v870_v36 = vmax.f32 %v838_v29, 0.0 }
 0x1b0   : > { %v840_v16 = vadd.f32 %v7501_v49, %v800_v15  ;;  %v1428_v23 = vsel %vm1371_vm1, %v7773_v27, -inf  ;;  %v873_v34 = vmax.f32 %v841_v25, 0.0  ;;  %vm4039_vm1 = vcmask 654336  }
 0x1b1   : > { %v1429_v19 = vmax.f32 %v1421_v57, %v1428_v23  ;;  %962 = vrot.lane.b32.xlu1 %v870_v36, %s7245_s12 }
 0x1b2   : > { %v872_v31 = vmax.f32 %v840_v16, 0.0 }
 0x1b3   : > { %v1433_v32 = vmax.f32 %v1429_v19, %v1431_v39  ;;  %968 = vrot.lane.b32.xlu0 %v873_v34, %s7245_s12 }
 0x1b5   : > { %v1434_v46 = vmax.f32 %v1432_v52, %v1433_v32  ;;  %966 = vrot.lane.b32.xlu1 %v872_v31, %s7245_s12 }
 0x1b7   : > { %v1435_v30 = vrot.slane %v1434_v46, 4 }
 0x1b9   : > { %v1436_v47 = vmax.f32 %v1434_v46, %v1435_v30 }
 0x1bb   : > { %v1437_v48 = vrot.slane %v1436_v47, 2 }
 0x1bd   : > { %v1438_v11 = vmax.f32 %v1436_v47, %v1437_v48 }
 0x1bf   : > { %v1439_v29 = vrot.slane %v1438_v11, 1 }
 0x1c1   : > { %v7783_v49 = vmax.f32 %v1438_v11, %v1439_v29 }
 0x1c3   : > { %v1471_v10 = vsub.f32 %v7773_v27, %v7783_v49  ;;  %v1447_v27 = vsub.f32 %v7557_v12, %v7783_v49  ;;  %v1448_v15 = vsub.f32 %v7547_v1, %v7783_v49  ;;  %v1449_v52 = vsub.f32 %v7575_v9, %v7783_v49 }
 0x1c4   : > { %v1450_v36 = vsub.f32 %v7567_v2, %v7783_v49  ;;  %v1451_v16 = vsub.f32 %v7593_v60, %v7783_v49  ;;  %v1452_v23 = vsub.f32 %v7585_v8, %v7783_v49  ;;  %v1453_v34 = vsub.f32 %v7611_v61, %v7783_v49 }
 0x1c5   : > { %v1454_v19 = vsub.f32 %v7603_v45, %v7783_v49  ;;  %v1455_v31 = vsub.f32 %v7628_v54, %v7783_v49  ;;  %v1456_v46 = vsub.f32 %v7620_v13, %v7783_v49  ;;  %v1463_v13 = vsub.f32 %v7707_v24, %v7783_v49 }
 0x1c6   : > { %v1464_v48 = vsub.f32 %v7698_v4, %v7783_v49  ;;  %v1465_v11 = vsub.f32 %v7725_v56, %v7783_v49  ;;  %v1466_v29 = vsub.f32 %v7716_v22, %v7783_v49  ;;  %v1467_v57 = vsub.f32 %v7741_v21, %v7783_v49  ;;  %v7855_v22 = vld [vmem:[%s10841_s2 + $0x18] sm:$0xff] }
 0x1c7   : > { %v1468_v30 = vsub.f32 %v7733_v18, %v7783_v49  ;;  %v1469_v39 = vsub.f32 %v7757_v3, %v7783_v49  ;;  %v1470_v47 = vsub.f32 %v7749_v0, %v7783_v49  ;;  %v1472_v32 = vsub.f32 %v7765_v62, %v7783_v49  ;;  %v7863_v0 = vld [vmem:[%s10841_s2] sm:$0xff]  ;;  %v7871_v62 = vld [vmem:[%s10841_s2 + $0x10] sm:$0xff] }
 0x1c8   : > { %v1533_v28 = vmul.f32 1.442695, %v1471_v10  ;;  %v1501_v61 = vmul.f32 1.442695, %v1455_v31  ;;  %v1497_v45 = vmul.f32 1.442695, %v1453_v34  ;;  %v10965_v31 = vsub.f32 %v7527_v6, %v7783_v49 }
 0x1c9   : > { %v1529_v25 = vmul.f32 1.442695, %v1469_v39  ;;  %v1527_v54 = vmul.f32 1.442695, %v1468_v30  ;;  %v1525_v10 = vmul.f32 1.442695, %v1467_v57 }
 0x1ca   : > { %v1523_v39 = vmul.f32 1.442695, %v1466_v29  ;;  %v1521_v34 = vmul.f32 1.442695, %v1465_v11  ;;  %v1519_v60 = vmul.f32 1.442695, %v1464_v48 }
 0x1cb   : > { %v1517_v9 = vmul.f32 1.442695, %v1463_v13  ;;  %v1483_v30 = vmul.f32 1.442695, %v10965_v31  ;;  %v10968_v13 = vsub.f32 %v7653_v58, %v7783_v49  ;;  %v10970_v58 = vsub.f32 %v7663_v51, %v7783_v49 }
 0x1cc   : > { %v909_v56 = vpop.permute.xlu0 %908 }
 0x1ce   : > { %v907_v8 = vpop.permute.xlu1 %906 }
 0x1cf   : > { %6668 = vmatprep.mubr.msk.f32.mxu1 %vm404_vm0, %v907_v8  ;;  %v1503_v8 = vmul.f32 1.442695, %v1456_v46 }
 0x1d0   : > { %6669 = vmatmul.mubr.msk.f32.vlgmr.msra.gmra.mxu1 %vm404_vm0, %v909_v56 }
 0x1d1   : > { %304 = vxpose.xlu0.b32.start [1/2] (short) %v7672_v17, 128  ;;  %7024 = vpow2.f32 %v1503_v8 }
 0x1d4   : > { %v913_v21 = vpop.permute.xlu0 %912 }
 0x1d5   : > { %305 = vxpose.xlu0.b32.end [2/2] (short) %v7855_v22, 128 }
 0x1d6   : > { %v911_v18 = vpop.permute.xlu1 %910 }
 0x1d7   : > { %6671 = vmatprep.mubr.msk.f32.mxu1 %vm404_vm0, %v911_v18  ;;  %v1535_v18 = vmul.f32 1.442695, %v1472_v32  ;;  %v1495_v32 = vmul.f32 1.442695, %v1452_v23 }
 0x1d8   : > { %6672 = vmatmul.mubr.msk.f32.gmra.mxu1 %vm404_vm0, %v913_v21 }
 0x1d9   : > { %7026 = vpow2.f32 %v1535_v18 }
 0x1da   : > { %7028 = vpow2.f32 %v1533_v28  ;;  %v1491_v28 = vmul.f32 1.442695, %v1450_v36  ;;  %v1487_v36 = vmul.f32 1.442695, %v1448_v15  ;;  %v10964_v15 = vsub.f32 %v7678_v14, %v7783_v49 }
 0x1db   : > { %7030 = vpow2.f32 %v1501_v61  ;;  %v10967_v61 = vsub.f32 %v7537_v53, %v7783_v49  ;;  %v10969_v53 = vsub.f32 %v7512_v59, %v7783_v49  ;;  %v10971_v59 = vsub.f32 %v7518_v63, %v7783_v49 }
 0x1dc   : > { %v917_v17 = vpop.permute.xlu0 %916  ;;  %v1515_v23 = vmul.f32 1.442695, %v10964_v15 }
 0x1dd   : > { %v1479_v29 = vmul.f32 1.442695, %v10969_v53 }
 0x1de   : > { %v915_v3 = vpop.permute.xlu1 %914  ;;  %272 = vxpose.xlu1.b32.start [1/2] (short) %v7863_v0, 128 }
 0x1df   : > { %6674 = vmatprep.mubr.msk.f32.mxu1 %vm404_vm0, %v915_v3  ;;  %v1531_v3 = vmul.f32 1.442695, %v1470_v47 }
 0x1e0   : > { %6675 = vmatmul.mubr.msk.f32.gmra.mxu1 %vm404_vm0, %v917_v17  ;;  %v1499_v17 = vmul.f32 1.442695, %v1454_v19  ;;  %v1493_v19 = vmul.f32 1.442695, %v1451_v16 }
 0x1e1   : > { %7032 = vpow2.f32 %v1531_v3 }
 0x1e2   : > { %273 = vxpose.xlu1.b32.end [2/2] (short) %v7871_v62, 128  ;;  %7034 = vpow2.f32 %v1499_v17  ;;  %v10972_v17 = vsub.f32 %v7635_v7, %v7783_v49 }
 0x1e3   : > { %7036 = vpow2.f32 %v1529_v25  ;;  %v7887_v25 = vpop.eup %7024 }
 0x1e4   : > { %v921_v21 = vpop.permute.xlu0 %920  ;;  %7038 = vpow2.f32 %v1497_v45  ;;  %v1481_v45 = vmul.f32 1.442695, %v10967_v61 }
 0x1e5   : > { %7040 = vpow2.f32 %v1527_v54 }
 0x1e6   : > { %v919_v56 = vpop.permute.xlu1 %918  ;;  %7042 = vpow2.f32 %v1495_v32  ;;  %v7893_v2 = vpop.eup %7026  ;;  %v10973_v32 = vsub.f32 %v7504_v50, %v7783_v49 }
 0x1e7   : > { %6677 = vmatprep.mubr.msk.f32.mxu1 %vm404_vm0, %v919_v56  ;;  %7044 = vpow2.f32 %v1525_v10  ;;  %6316 = vmatprep.subr.mxu0 %v7893_v2  ;;  %v7903_v4 = vpop.eup %7028  ;;  %v1509_v56 = vmul.f32 1.442695, %v10970_v58 }
 0x1e8   : > { %6678 = vmatmul.mubr.msk.f32.gmra.mxu1 %vm404_vm0, %v921_v21  ;;  %7046 = vpow2.f32 %v1493_v19  ;;  %6317 = vmatpush3.msra.mxu0 %v7887_v25  ;;  %v7909_v1 = vpop.eup %7030  ;;  %v1477_v21 = vmul.f32 1.442695, %v10971_v59  ;;  %v1475_v10 = vmul.f32 1.442695, %v10973_v32  ;;  %v10974_v19 = vsub.f32 %v7643_v55, %v7783_v49  ;;  %v10982_v32 = vld [vmem:[#allocation18_spill] sm:$0xff] }
 0x1e9   : > { %7048 = vpow2.f32 %v1523_v39  ;;  %6318 = vmatprep.subr.mxu0 %v7903_v4 }
 0x1ea   : > { %7050 = vpow2.f32 %v1491_v28  ;;  %6319 = vmatpush3.msra.mxu0 %v7909_v1  ;;  %v1505_v39 = vmul.f32 1.442695, %v10974_v19  ;;  %v10984_v19 = vld [vmem:[#allocation16_spill] sm:$0xff] }
 0x1eb   : > { %7052 = vpow2.f32 %v1521_v34  ;;  %v10975_v34 = vsub.f32 %v7524_v5, %v7783_v49 }
 0x1ec   : > { %v925_v46 = vpop.permute.xlu0 %924 }
 0x1ed   : > { %v1473_v50 = vmul.f32 1.442695, %v10975_v34  ;;  %v10986_v34 = vld [vmem:[#allocation14_spill] sm:$0xff] }
 0x1ee   : > { %v923_v26 = vpop.permute.xlu1 %922  ;;  %v7915_v24 = vpop.eup %7032 }
 0x1ef   : > { %6680 = vmatprep.mubr.msk.f32.mxu1 %vm404_vm0, %v923_v26  ;;  %v1489_v26 = vmul.f32 1.442695, %v1449_v52  ;;  %v1485_v52 = vmul.f32 1.442695, %v1447_v27  ;;  %v7921_v12 = vpop.eup %7034  ;;  %v10966_v27 = vsub.f32 %v7689_v20, %v7783_v49  ;;  %6320 = vmatprep.subr.mxu0 %v7915_v24  ;;  %v1511_v20 = vmul.f32 1.442695, %v10968_v13 }
 0x1f0   : > { %6681 = vmatmul.mubr.msk.f32.gmra.mxu1 %vm404_vm0, %v925_v46  ;;  %v7927_v14 = vpop.eup %7036  ;;  %6321 = vmatpush3.msra.mxu0 %v7921_v12  ;;  %v1507_v46 = vmul.f32 1.442695, %v10972_v17 }
 0x1f1   : > { %7054 = vpow2.f32 %v1489_v26  ;;  %v1513_v47 = vmul.f32 1.442695, %v10966_v27  ;;  %v7933_v54 = vpop.eup %7038  ;;  %6322 = vmatprep.subr.mxu0 %v7927_v14 }
 0x1f2   : > { %7056 = vpow2.f32 %v1519_v60  ;;  %v7940_v11 = vpop.eup %7040  ;;  %6323 = vmatpush3.msra.mxu0 %v7933_v54 }
 0x1f3   : > { %7058 = vpow2.f32 %v1487_v36  ;;  %v7947_v8 = vpop.eup %7042  ;;  %6324 = vmatprep.subr.mxu0 %v7940_v11 }
 0x1f4   : > { %v929_v16 = vpop.permute.xlu0 %928  ;;  %7060 = vpow2.f32 %v1517_v9  ;;  %v7953_v18 = vpop.eup %7044  ;;  %6325 = vmatpush3.msra.mxu0 %v7947_v8 }
 0x1f5   : > { %7062 = vpow2.f32 %v1485_v52  ;;  %v7959_v3 = vpop.eup %7046  ;;  %6326 = vmatprep.subr.mxu0 %v7953_v18 }
 0x1f6   : > { %v927_v57 = vpop.permute.xlu1 %926  ;;  %7064 = vpow2.f32 %v1515_v23  ;;  %v7965_v51 = vpop.eup %7048  ;;  %6327 = vmatpush3.msra.mxu0 %v7959_v3 }
 0x1f7   : > { %6683 = vmatprep.mubr.msk.f32.mxu1 %vm404_vm0, %v927_v57  ;;  %7066 = vpow2.f32 %v1483_v30  ;;  %v7971_v63 = vpop.eup %7050  ;;  %6328 = vmatprep.subr.mxu0 %v7965_v51 }
 0x1f8   : > { %6684 = vmatmul.mubr.msk.f32.gmra.mxu1 %vm404_vm0, %v929_v16  ;;  %7068 = vpow2.f32 %v1513_v47  ;;  %v7977_v28 = vpop.eup %7052  ;;  %6329 = vmatpush3.msra.mxu0 %v7971_v63 }
 0x1f9   : > { %7070 = vpow2.f32 %v1481_v45  ;;  %6330 = vmatprep.subr.mxu0 %v7977_v28 }
 0x1fa   : > { %7072 = vpow2.f32 %v1511_v20 }
 0x1fb   : > { %7074 = vpow2.f32 %v1479_v29 }
 0x1fc   : > { %v933_v48 = vpop.permute.xlu0 %932  ;;  %7076 = vpow2.f32 %v1509_v56 }
 0x1fd   : > { %7078 = vpow2.f32 %v1477_v21 }
 0x1fe   : > { %v931_v6 = vpop.permute.xlu1 %930  ;;  %v7983_v26 = vpop.eup %7054  ;;  %7080 = vpow2.f32 %v1507_v46  ;;  %v10980_v46 = vld [vmem:[#allocation19_spill] sm:$0xff] }
 0x1ff   : > { %6686 = vmatprep.mubr.msk.f32.mxu1 %vm404_vm0, %v931_v6  ;;  %v7986_v57 = vpop.eup %7056  ;;  %7082 = vpow2.f32 %v1475_v10  ;;  %6331 = vmatpush3.msra.mxu0 %v7983_v26  ;;  %v10983_v10 = vld [vmem:[#allocation22_spill] sm:$0xff] }
 0x200   : > { %6687 = vmatmul.mubr.msk.f32.gmra.mxu1 %vm404_vm0, %v933_v48  ;;  %v7990_v60 = vpop.eup %7058  ;;  %7084 = vpow2.f32 %v1505_v39  ;;  %6332 = vmatprep.subr.mxu0 %v7986_v57 }
 0x201   : > { %v7994_v49 = vpop.eup %7060  ;;  %7086 = vpow2.f32 %v1473_v50  ;;  %6333 = vmatpush3.msra.mxu0 %v7990_v60  ;;  %v10987_v50 = vld [vmem:[#allocation17_spill] sm:$0xff] }
 0x202   : > { %v7997_v16 = vpop.eup %7062  ;;  %6334 = vmatprep.subr.mxu0 %v7994_v49 }
 0x203   : > { %v8000_v9 = vpop.eup %7064  ;;  %6335 = vmatpush3.msra.mxu0 %v7997_v16 }
 0x204   : > { %v8004_v52 = vpop.eup %7066  ;;  %6336 = vmatprep.subr.mxu0 %v8000_v9 }
 0x205   : > { %v937_v7 = vpop.permute.xlu0 %936  ;;  %v8008_v23 = vpop.eup %7068  ;;  %6337 = vmatpush3.msra.mxu0 %v8004_v52 }
 0x206   : > { %v8011_v31 = vpop.eup %7070  ;;  %6338 = vmatprep.subr.mxu0 %v8008_v23 }
 0x207   : > { %v935_v55 = vpop.permute.xlu1 %934  ;;  %v8014_v27 = vpop.eup %7072  ;;  %6339 = vmatpush3.msra.mxu0 %v8011_v31 }
 0x208   : > { %6689 = vmatprep.mubr.msk.f32.mxu1 %vm404_vm0, %v935_v55  ;;  %v8018_v47 = vpop.eup %7074  ;;  %6340 = vmatprep.subr.mxu0 %v8014_v27  ;;  %v10988_v55 = vld [vmem:[#allocation13_spill] sm:$0xff] }
 0x209   : > { %v941_v5 = vpop.permute.xlu0 %940  ;;  %6690 = vmatmul.mubr.msk.f32.gmra.mxu1 %vm404_vm0, %v937_v7  ;;  %v8022_v45 = vpop.eup %7076  ;;  %6341 = vmatpush3.msra.mxu0 %v8018_v47  ;;  %v10985_v7 = vld [vmem:[#allocation20_spill] sm:$0xff] }
 0x20a   : > { %v8025_v6 = vpop.eup %7078  ;;  %6342 = vmatprep.subr.mxu0 %v8022_v45 }
 0x20b   : > { %v939_v36 = vpop.permute.xlu1 %938  ;;  %v8028_v20 = vpop.eup %7080  ;;  %6343 = vmatpush3.msra.mxu0 %v8025_v6 }
 0x20c   : > { %6692 = vmatprep.mubr.msk.f32.mxu1 %vm404_vm0, %v939_v36  ;;  %v8032_v48 = vpop.eup %7082  ;;  %6344 = vmatprep.subr.mxu0 %v8028_v20  ;;  %v10990_v36 = vld [vmem:[#allocation11_spill] sm:$0xff] }
 0x20d   : > { %v945_v15 = vpop.permute.xlu0 %944  ;;  %6693 = vmatmul.mubr.msk.f32.gmra.mxu1 %vm404_vm0, %v941_v5  ;;  %v8036_v29 = vpop.eup %7084  ;;  %6345 = vmatpush3.msra.mxu0 %v8032_v48  ;;  %v10989_v5 = vld [vmem:[#allocation15_spill] sm:$0xff] }
 0x20e   : > { %v8039_v58 = vpop.eup %7086  ;;  %6346 = vmatprep.subr.mxu0 %v8036_v29 }
 0x20f   : > { %v943_v30 = vpop.permute.xlu1 %942  ;;  %6347 = vmatpush3.msra.mxu0 %v8039_v58 }
 0x210   : > { %6695 = vmatprep.mubr.msk.f32.mxu1 %vm404_vm0, %v943_v30  ;;  %1602 = vmatmul.mubr.f32.vlgmr.msra.gmra.mxu0 %v7863_v0  ;;  %v10992_v30 = vld [vmem:[#allocation9_spill] sm:$0xff] }
 0x211   : > { %v949_v61 = vpop.permute.xlu0 %948  ;;  %6696 = vmatmul.mubr.msk.f32.gmra.mxu1 %vm404_vm0, %v945_v15  ;;  %6388 = vmatprep.subr.mxu0 %v7488_v44  ;;  %v10991_v15 = vld [vmem:[#allocation12_spill] sm:$0xff] }
 0x212   : > { %6389 = vmatpush3.msra.mxu0 %v7442_v38  ;;  %1606 = vmatprep.mubr.f32.mxu0 %v7855_v22 }
 0x213   : > { %v947_v13 = vpop.permute.xlu1 %946  ;;  %6390 = vmatprep.subr.mxu0 %v7478_v43  ;;  %v10977_v43 = vld [vmem:[#allocation26_spill] sm:$0xff] }
 0x214   : > { %6698 = vmatprep.mubr.msk.f32.mxu1 %vm404_vm0, %v947_v13  ;;  %6391 = vmatpush3.msra.mxu0 %v7438_v37  ;;  %v10976_v37 = vld [vmem:[#allocation23_spill] sm:$0xff]  ;;  %v10994_v13 = vld [vmem:[#allocation8_spill] sm:$0xff] }
 0x215   : > { %v953_v53 = vpop.permute.xlu0 %952  ;;  %6699 = vmatmul.mubr.msk.f32.gmra.mxu1 %vm404_vm0, %v949_v61  ;;  %1607 = vmatmul.mubr.f32.gmra.mxu0 %v7871_v62  ;;  %v10993_v61 = vld [vmem:[#allocation10_spill] sm:$0xff] }
 0x216   : > { %6392 = vmatprep.subr.mxu0 %v7472_v42 }
 0x217   : > { %v951_v56 = vpop.permute.xlu1 %950  ;;  %6393 = vmatpush3.msra.mxu0 %v7432_v35  ;;  %v10978_v35 = vld [vmem:[#allocation21_spill] sm:$0xff] }
 0x218   : > { %6701 = vmatprep.mubr.msk.f32.mxu1 %vm404_vm0, %v951_v56  ;;  %6394 = vmatprep.subr.mxu0 %v7461_v41  ;;  %v10979_v41 = vld [vmem:[#allocation25_spill] sm:$0xff]  ;;  %v10996_v56 = vld [vmem:[#allocation6_spill] sm:$0xff] }
 0x219   : > { %v957_v59 = vpop.permute.xlu0 %956  ;;  %6702 = vmatmul.mubr.msk.f32.gmra.mxu1 %vm404_vm0, %v953_v53  ;;  %6395 = vmatpush3.msra.mxu0 %v7426_v33  ;;  %v10981_v33 = vld [vmem:[#allocation24_spill] sm:$0xff]  ;;  %v10995_v53 = vld [vmem:[#allocation7_spill] sm:$0xff] }
 0x21a   : > { %6396 = vmatprep.subr.mxu0 %v7454_v40 }
 0x21b   : > { %v955_v21 = vpop.permute.xlu1 %954  ;;  %6397 = vmatpush3.msra.mxu0 %v10976_v37 }
 0x21c   : > { %6704 = vmatprep.mubr.msk.f32.mxu1 %vm404_vm0, %v955_v21  ;;  %6398 = vmatprep.subr.mxu0 %v10977_v43  ;;  %v10998_v21 = vld [vmem:[#allocation4_spill] sm:$0xff] }
 0x21d   : > { %v961_v44 = vpop.permute.xlu0 %960  ;;  %6705 = vmatmul.mubr.msk.f32.gmra.mxu1 %vm404_vm0, %v957_v59  ;;  %6399 = vmatpush3.msra.mxu0 %v10978_v35  ;;  %v10997_v59 = vld [vmem:[#allocation5_spill] sm:$0xff] }
 0x21e   : > { %6400 = vmatprep.subr.mxu0 %v10979_v41 }
 0x21f   : > { %v959_v38 = vpop.permute.xlu1 %958  ;;  %6401 = vmatpush3.msra.mxu0 %v10980_v46 }
 0x220   : > { %6707 = vmatprep.mubr.msk.f32.mxu1 %vm404_vm0, %v959_v38  ;;  %6402 = vmatprep.subr.mxu0 %v10981_v33 }
 0x221   : > { %6708 = vmatmul.mubr.msk.f32.gmra.mxu1 %vm404_vm0, %v961_v44  ;;  %v965_v17 = vpop.permute.xlu0 %964  ;;  %6403 = vmatpush3.msra.mxu0 %v10982_v32 }
 0x222   : > { %6404 = vmatprep.subr.mxu0 %v10983_v10 }
 0x223   : > { %v963_v42 = vpop.permute.xlu1 %962  ;;  %6405 = vmatpush3.msra.mxu0 %v10984_v19 }
 0x224   : > { %6710 = vmatprep.mubr.msk.f32.mxu1 %vm404_vm0, %v963_v42  ;;  %6406 = vmatprep.subr.mxu0 %v10985_v7 }
 0x225   : > { %6711 = vmatmul.mubr.msk.f32.gmra.mxu1 %vm404_vm0, %v965_v17  ;;  %v969_v39 = vpop.permute.xlu0 %968  ;;  %6407 = vmatpush3.msra.mxu0 %v10986_v34 }
 0x226   : > { %6408 = vmatprep.subr.mxu0 %v10987_v50 }
 0x227   : > { %v967_v40 = vpop.permute.xlu1 %966  ;;  %6409 = vmatpush3.msra.mxu0 %v10988_v55 }
 0x228   : > { %6713 = vmatprep.mubr.msk.f32.mxu1 %vm404_vm0, %v967_v40  ;;  %6410 = vmatprep.subr.mxu0 %v10989_v5 }
 0x229   : > { %6714 = vmatmul.mubr.msk.f32.gmra.mxu1 %vm404_vm0, %v969_v39  ;;  %6411 = vmatpush3.msra.mxu0 %v10990_v36 }
 0x22a   : > { %6412 = vmatprep.subr.mxu0 %v10991_v15 }
 0x22b   : > { %6413 = vmatpush3.msra.mxu0 %v10992_v30 }
 0x22c   : > { %6414 = vmatprep.subr.mxu0 %v10993_v61 }
 0x22d   : > { %6415 = vmatpush3.msra.mxu0 %v10994_v13 }
 0x22e   : > { %6416 = vmatprep.subr.mxu0 %v10995_v53 }
 0x22f   : > { %6417 = vmatpush3.msra.mxu0 %v10996_v56 }
 0x230   : > { %6418 = vmatprep.subr.mxu0 %v10997_v59 }
 0x231   : > { %6419 = vmatpush3.msra.mxu0 %v10998_v21 }
 0x24d   : > { %v8102_v17 = vpop.trf.xlu0 }
 0x24e   : > { %10999 = vst [vmem:[#allocation23_spill] sm:$0xff] %v8102_v17 }
 0x251   : > { %v8106_v33 = vpop.trf.xlu0 }
 0x252   : > { %11001 = vst [vmem:[#allocation21_spill] sm:$0xff] %v8106_v33 }
 0x255   : > { %v8110_v39 = vpop.trf.xlu0 }
 0x256   : > { %11002 = vst [vmem:[#allocation25_spill] sm:$0xff] %v8110_v39 }
 0x259   : > { %v8114_v55 = vpop.trf.xlu0 }
 0x25a   : > { %v8088_v44 = vpop.trf.xlu1  ;;  %11004 = vst [vmem:[#allocation24_spill] sm:$0xff] %v8114_v55 }
 0x25b   : > { %6720 = vmatprep.mubr.msk.f32.mxu1 %vm404_vm0, %v8088_v44 }
 0x25d   : > { %v8118_v36 = vpop.trf.xlu0 }
 0x25e   : > { %v8092_v38 = vpop.trf.xlu1  ;;  %11006 = vst [vmem:[#allocation22_spill] sm:$0xff] %v8118_v36 }
 0x261   : > { %v8122_v13 = vpop.trf.xlu0 }
 0x262   : > { %v8094_v37 = vpop.trf.xlu1  ;;  %11008 = vst [vmem:[#allocation20_spill] sm:$0xff] %v8122_v13 }
 0x265   : > { %v8130_v56 = vpop.trf.xlu0 }
 0x266   : > { %v8096_v43 = vpop.trf.xlu1  ;;  %11010 = vst [vmem:[#allocation17_spill] sm:$0xff] %v8130_v56 }
 0x269   : > { %v8142_v21 = vpop.trf.xlu0 }
 0x26a   : > { %v8098_v42 = vpop.trf.xlu1  ;;  %11012 = vst [vmem:[#allocation15_spill] sm:$0xff] %v8142_v21 }
 0x26e   : > { %v8100_v35 = vpop.trf.xlu1 }
 0x272   : > { %v8104_v41 = vpop.trf.xlu1 }
 0x273   : > { %11000 = vst [vmem:[#allocation26_spill] sm:$0xff] %v8104_v41 }
 0x276   : > { %v8108_v10 = vpop.trf.xlu1 }
 0x27a   : > { %v8112_v50 = vpop.trf.xlu1 }
 0x27b   : > { %11003 = vst [vmem:[#allocation19_spill] sm:$0xff] %v8112_v50 }
 0x27e   : > { %v8116_v5 = vpop.trf.xlu1 }
 0x27f   : > { %11005 = vst [vmem:[#allocation18_spill] sm:$0xff] %v8116_v5 }
 0x282   : > { %v8120_v30 = vpop.trf.xlu1 }
 0x283   : > { %11007 = vst [vmem:[#allocation16_spill] sm:$0xff] %v8120_v30 }
 0x286   : > { %v8128_v53 = vpop.trf.xlu1 }
 0x287   : > { %11009 = vst [vmem:[#allocation14_spill] sm:$0xff] %v8128_v53 }
 0x28a   : > { %v8136_v59 = vpop.trf.xlu1 }
 0x28b   : > { %11011 = vst [vmem:[#allocation13_spill] sm:$0xff] %v8136_v59 }
 0x2d0   : > { %v6348_v46 = vpop.f32.mrf.mxu0 }
 0x2d2   : > { %v6349_v40 = vpop.f32.mrf.mxu0 }
 0x2d3   : > { %v6350_v7 = vadd.f32 %v6349_v40, %v6348_v46  ;;  %v8148_v46 = vpop.trf.xlu1  ;;  %v8150_v40 = vpop.trf.xlu0 }
 0x2d4   : > { %11013 = vst [vmem:[#allocation11_spill] sm:$0xff] %v8148_v46  ;;  %11014 = vst [vmem:[#allocation12_spill] sm:$0xff] %v8150_v40 }
 0x2d5   : > { %v6351_v32 = vpop.f32.mrf.mxu0 }
 0x2d7   : > { %v6352_v19 = vpop.f32.mrf.mxu0 }
 0x2d8   : > { %v6353_v34 = vadd.f32 %v6352_v19, %v6351_v32  ;;  %v8156_v32 = vpop.trf.xlu1  ;;  %v8162_v19 = vpop.trf.xlu0 }
 0x2d9   : > { %11015 = vst [vmem:[#allocation9_spill] sm:$0xff] %v8156_v32  ;;  %11016 = vst [vmem:[#allocation10_spill] sm:$0xff] %v8162_v19 }
 0x2da   : > { %7088 = vrcp.f32 %v6353_v34 }
 0x2db   : > { %7090 = vrcp.f32 %v6350_v7 }
 0x2dc   : > { %v8168_v7 = vpop.trf.xlu1  ;;  %v8170_v34 = vpop.trf.xlu0 }
 0x2dd   : > { %11017 = vst [vmem:[#allocation8_spill] sm:$0xff] %v8168_v7  ;;  %11018 = vst [vmem:[#allocation7_spill] sm:$0xff] %v8170_v34 }
 0x2e7   : > { %v7089_v15 = vpop.eup %7088 }
 0x2e8   : > { %6716 = vmatprep.subr.mxu1 %v7089_v15  ;;  %v7091_v61 = vpop.eup %7090 }
 0x2e9   : > { %6717 = vmatpush3.msra.mxu1 %v7089_v15  ;;  %v8180_v15 = vpop.trf.xlu0 }
 0x2ea   : > { %6718 = vmatprep.subr.mxu1 %v7091_v61  ;;  %11019 = vst [vmem:[#allocation6_spill] sm:$0xff] %v8180_v15 }
 0x2eb   : > { %6719 = vmatpush3.msra.mxu1 %v7091_v61 }
 0x2ec   : > { %6721 = vmatmul.mubr.msk.f32.vlgmr.msra.gmra.mxu1 %vm404_vm0, %v8092_v38 }
 0x2ed   : > { %6723 = vmatprep.mubr.msk.f32.mxu1 %vm404_vm0, %v8094_v37  ;;  %v8186_v61 = vpop.trf.xlu0 }
 0x2ee   : > { %11020 = vst [vmem:[#allocation5_spill] sm:$0xff] %v8186_v61 }
 0x2f0   : > { %6724 = vmatmul.mubr.msk.f32.gmra.mxu1 %vm404_vm0, %v8096_v43 }
 0x2f1   : > { %6726 = vmatprep.mubr.msk.f32.mxu1 %vm404_vm0, %v8098_v42 }
 0x2f4   : > { %6727 = vmatmul.mubr.msk.f32.gmra.mxu1 %vm404_vm0, %v8100_v35 }
 0x2f5   : > { %6729 = vmatprep.mubr.msk.f32.mxu1 %vm404_vm0, %v8104_v41 }
 0x2f8   : > { %6730 = vmatmul.mubr.msk.f32.gmra.mxu1 %vm404_vm0, %v8108_v10 }
 0x2f9   : > { %6732 = vmatprep.mubr.msk.f32.mxu1 %vm404_vm0, %v8112_v50 }
 0x2fc   : > { %6733 = vmatmul.mubr.msk.f32.gmra.mxu1 %vm404_vm0, %v8116_v5 }
 0x2fd   : > { %6735 = vmatprep.mubr.msk.f32.mxu1 %vm404_vm0, %v8120_v30 }
 0x300   : > { %6736 = vmatmul.mubr.msk.f32.gmra.mxu1 %vm404_vm0, %v8128_v53 }
 0x301   : > { %6738 = vmatprep.mubr.msk.f32.mxu1 %vm404_vm0, %v8136_v59 }
 0x304   : > { %6739 = vmatmul.mubr.msk.f32.gmra.mxu1 %vm404_vm0, %v8148_v46 }
 0x305   : > { %6741 = vmatprep.mubr.msk.f32.mxu1 %vm404_vm0, %v8156_v32 }
 0x308   : > { %6742 = vmatmul.mubr.msk.f32.gmra.mxu1 %vm404_vm0, %v8168_v7 }
 0x309   : > { %6744 = vmatprep.mubr.msk.f32.mxu1 %vm404_vm0, %v8102_v17 }
 0x30c   : > { %6745 = vmatmul.mubr.msk.f32.gmra.mxu1 %vm404_vm0, %v8106_v33 }
 0x30d   : > { %6747 = vmatprep.mubr.msk.f32.mxu1 %vm404_vm0, %v8110_v39  ;;  %v8196_v39 = vpop.trf.xlu0 }
 0x30e   : > { %11021 = vst [vmem:[#allocation4_spill] sm:$0xff] %v8196_v39 }
 0x310   : > { %6748 = vmatmul.mubr.msk.f32.gmra.mxu1 %vm404_vm0, %v8114_v55 }
 0x311   : > { %6750 = vmatprep.mubr.msk.f32.mxu1 %vm404_vm0, %v8118_v36  ;;  %v8202_v36 = vpop.trf.xlu0 }
 0x312   : > { %11022 = vst [vmem:[#allocation28_spill] sm:$0xff] %v8202_v36 }
 0x314   : > { %6751 = vmatmul.mubr.msk.f32.gmra.mxu1 %vm404_vm0, %v8122_v13 }
 0x315   : > { %6753 = vmatprep.mubr.msk.f32.mxu1 %vm404_vm0, %v8130_v56 }
 0x318   : > { %6754 = vmatmul.mubr.msk.f32.gmra.mxu1 %vm404_vm0, %v8142_v21 }
 0x319   : > { %6756 = vmatprep.mubr.msk.f32.mxu1 %vm404_vm0, %v8150_v40  ;;  %v8210_v40 = vpop.trf.xlu0 }
 0x31a   : > { %11023 = vst [vmem:[#allocation29_spill] sm:$0xff] %v8210_v40 }
 0x31c   : > { %6757 = vmatmul.mubr.msk.f32.gmra.mxu1 %vm404_vm0, %v8162_v19 }
 0x31d   : > { %6759 = vmatprep.mubr.msk.f32.mxu1 %vm404_vm0, %v8170_v34  ;;  %v8216_v34 = vpop.f32.mrf.mxu1 }
 0x31e   : > { %11024 = vst [vmem:[#allocation30_spill] sm:$0xff] %v8216_v34 }
 0x31f   : > { %v8218_v19 = vpop.f32.mrf.mxu1 }
 0x320   : > { %6760 = vmatmul.mubr.msk.f32.gmra.mxu1 %vm404_vm0, %v8180_v15  ;;  %11025 = vst [vmem:[#allocation31_spill] sm:$0xff] %v8218_v19 }
 0x321   : > { %6762 = vmatprep.mubr.msk.f32.mxu1 %vm404_vm0, %v8186_v61  ;;  %v8220_v21 = vpop.f32.mrf.mxu1 }
 0x322   : > { %11026 = vst [vmem:[#allocation32_spill] sm:$0xff] %v8220_v21 }
 0x323   : > { %v8222_v15 = vpop.f32.mrf.mxu1 }
 0x324   : > { %6763 = vmatmul.mubr.msk.f32.gmra.mxu1 %vm404_vm0, %v8196_v39  ;;  %11027 = vst [vmem:[#allocation33_spill] sm:$0xff] %v8222_v15 }
 0x325   : > { %6765 = vmatprep.mubr.msk.f32.mxu1 %vm404_vm0, %v8202_v36  ;;  %v8224_v61 = vpop.f32.mrf.mxu1 }
 0x326   : > { %11028 = vst [vmem:[#allocation34_spill] sm:$0xff] %v8224_v61 }
 0x327   : > { %v8226_v56 = vpop.f32.mrf.mxu1 }
 0x328   : > { %6766 = vmatmul.mubr.msk.f32.gmra.mxu1 %vm404_vm0, %v8210_v40  ;;  %11029 = vst [vmem:[#allocation35_spill] sm:$0xff] %v8226_v56 }
 0x329   : > { %v8228_v39 = vpop.f32.mrf.mxu1 }
 0x32a   : > { %11030 = vst [vmem:[#allocation36_spill] sm:$0xff] %v8228_v39 }
 0x32b   : > { %v8230_v13 = vpop.f32.mrf.mxu1 }
 0x32c   : > { %11031 = vst [vmem:[#allocation37_spill] sm:$0xff] %v8230_v13 }
 0x32d   : > { %v8232_v36 = vpop.f32.mrf.mxu1 }
 0x32e   : > { %11032 = vst [vmem:[#allocation38_spill] sm:$0xff] %v8232_v36 }
 0x32f   : > { %v8234_v55 = vpop.f32.mrf.mxu1 }
 0x330   : > { %11033 = vst [vmem:[#allocation39_spill] sm:$0xff] %v8234_v55 }
 0x331   : > { %v8236_v40 = vpop.f32.mrf.mxu1 }
 0x332   : > { %11034 = vst [vmem:[#allocation40_spill] sm:$0xff] %v8236_v40 }
 0x333   : > { %v8238_v34 = vpop.f32.mrf.mxu1 }
 0x334   : > { %11035 = vst [vmem:[#allocation41_spill] sm:$0xff] %v8238_v34 }
 0x335   : > { %v8240_v19 = vpop.f32.mrf.mxu1 }
 0x336   : > { %11036 = vst [vmem:[#allocation42_spill] sm:$0xff] %v8240_v19 }
 0x337   : > { %v8242_v21 = vpop.f32.mrf.mxu1 }
 0x338   : > { %11037 = vst [vmem:[#allocation43_spill] sm:$0xff] %v8242_v21 }
 0x339   : > { %v8244_v15 = vpop.f32.mrf.mxu1 }
 0x33a   : > { %11038 = vst [vmem:[#allocation44_spill] sm:$0xff] %v8244_v15 }
 0x33b   : > { %v8246_v61 = vpop.f32.mrf.mxu1 }
 0x33c   : > { %11039 = vst [vmem:[#allocation45_spill] sm:$0xff] %v8246_v61 }
 0x33d   : > { %v8248_v56 = vpop.f32.mrf.mxu1 }
 0x33e   : > { %11040 = vst [vmem:[#allocation46_spill] sm:$0xff] %v8248_v56 }
 0x33f   : > { %v8250_v39 = vpop.f32.mrf.mxu1 }
 0x340   : > { %11041 = vst [vmem:[#allocation47_spill] sm:$0xff] %v8250_v39 }
 0x341   : > { %v8252_v13 = vpop.f32.mrf.mxu1 }
 0x342   : > { %11042 = vst [vmem:[#allocation48_spill] sm:$0xff] %v8252_v13 }
 0x343   : > { %v8254_v36 = vpop.f32.mrf.mxu1 }
 0x344   : > { %11043 = vst [vmem:[#allocation49_spill] sm:$0xff] %v8254_v36 }
 0x345   : > { %v8256_v55 = vpop.f32.mrf.mxu1 }
 0x346   : > { %11044 = vst [vmem:[#allocation50_spill] sm:$0xff] %v8256_v55 }
 0x347   : > { %v8258_v40 = vpop.f32.mrf.mxu1 }
 0x348   : > { %11045 = vst [vmem:[#allocation51_spill] sm:$0xff] %v8258_v40 }
 0x349   : > { %v8260_v34 = vpop.f32.mrf.mxu1 }
 0x34a   : > { %11046 = vst [vmem:[#allocation52_spill] sm:$0xff] %v8260_v34 }
 0x34b   : > { %v8262_v19 = vpop.f32.mrf.mxu1 }
 0x34c   : > { %11047 = vst [vmem:[#allocation53_spill] sm:$0xff] %v8262_v19 }
 0x34d   : > { %v8264_v21 = vpop.f32.mrf.mxu1 }
 0x34e   : > { %11048 = vst [vmem:[#allocation54_spill] sm:$0xff] %v8264_v21 }
 0x34f   : > { %v8266_v15 = vpop.f32.mrf.mxu1 }
 0x350   : > { %11049 = vst [vmem:[#allocation55_spill] sm:$0xff] %v8266_v15 }
 0x351   : > { %v8268_v61 = vpop.f32.mrf.mxu1 }
 0x352   : > { %11050 = vst [vmem:[#allocation56_spill] sm:$0xff] %v8268_v61 }
 0x353   : > { %v8270_v56 = vpop.f32.mrf.mxu1 }
 0x354   : > { %11051 = vst [vmem:[#allocation57_spill] sm:$0xff] %v8270_v56 }
 0x355   : > { %v8272_v39 = vpop.f32.mrf.mxu1 }
 0x356   : > { %11052 = vst [vmem:[#allocation58_spill] sm:$0xff] %v8272_v39 }
 0x357   : > { %v8274_v13 = vpop.f32.mrf.mxu1 }
 0x358   : > { %11053 = vst [vmem:[#allocation59_spill] sm:$0xff] %v8274_v13 }
 0x359   : > { %v8276_v36 = vpop.f32.mrf.mxu1 }
 0x35a   : > { %11054 = vst [vmem:[#allocation60_spill] sm:$0xff] %v8276_v36 }
 0x35b   : > { %v8278_v55 = vpop.f32.mrf.mxu1 }
 0x35c   : > { %11055 = vst [vmem:[#allocation61_spill] sm:$0xff] %v8278_v55 }
 0x3ac   : > { %v6722_v40 = vpop.f32.mrf.mxu1 }
 0x3ad   : > { %v1938_v15 = vmul.f32 %v8032_v48, %v6722_v40 }
 0x3ae   : > { %v1778_v34 = vpop.f32.mrf.mxu1 }
 0x3af   : > { %v1937_v19 = vmul.f32 %v8039_v58, %v1778_v34 }
 0x3b0   : > { %v6725_v33 = vpop.f32.mrf.mxu1 }
 0x3b1   : > { %1969 = vxpose.xlu0.b32.start [1/16] (narrow) %v1937_v19, 8  ;;  %v1940_v36 = vmul.f32 %v8018_v47, %v6725_v33 }
 0x3b2   : > { %v1788_v21 = vpop.f32.mrf.mxu1 }
 0x3b3   : > { %v1939_v39 = vmul.f32 %v8025_v6, %v1788_v21 }
 0x3b4   : > { %v6728_v61 = vpop.f32.mrf.mxu1 }
 0x3b5   : > { %1970 = vxpose.xlu0.b32.cont [2/16] (narrow) %v1938_v15, 8  ;;  %v1942_v48 = vmul.f32 %v8004_v52, %v6728_v61 }
 0x3b6   : > { %v1798_v56 = vpop.f32.mrf.mxu1 }
 0x3b7   : > { %v1941_v58 = vmul.f32 %v8011_v31, %v1798_v56 }
 0x3b8   : > { %v6731_v17 = vpop.f32.mrf.mxu1 }
 0x3b9   : > { %1971 = vxpose.xlu0.b32.cont [3/16] (narrow) %v1939_v39, 8  ;;  %v1944_v47 = vmul.f32 %v7990_v60, %v6731_v17 }
 0x3ba   : > { %v1808_v13 = vpop.f32.mrf.mxu1 }
 0x3bb   : > { %v1943_v6 = vmul.f32 %v7997_v16, %v1808_v13 }
 0x3bc   : > { %v6734_v55 = vpop.f32.mrf.mxu1 }
 0x3bd   : > { %1972 = vxpose.xlu0.b32.cont [4/16] (narrow) %v1940_v36, 8  ;;  %v1946_v52 = vmul.f32 %v7971_v63, %v6734_v55 }
 0x3be   : > { %v1818_v7 = vpop.f32.mrf.mxu1 }
 0x3bf   : > { %v1945_v31 = vmul.f32 %v7983_v26, %v1818_v7 }
 0x3c0   : > { %v6737_v34 = vpop.f32.mrf.mxu1 }
 0x3c1   : > { %1973 = vxpose.xlu0.b32.cont [5/16] (narrow) %v1941_v58, 8  ;;  %v1948_v26 = vmul.f32 %v7947_v8, %v6737_v34 }
 0x3c2   : > { %v1828_v19 = vpop.f32.mrf.mxu1 }
 0x3c3   : > { %v1947_v13 = vmul.f32 %v7959_v3, %v1828_v19 }
 0x3c4   : > { %v6740_v40 = vpop.f32.mrf.mxu1 }
 0x3c5   : > { %1974 = vxpose.xlu0.b32.cont [6/16] (narrow) %v1942_v48, 8  ;;  %v1950_v3 = vmul.f32 %v7921_v12, %v6740_v40 }
 0x3c6   : > { %v1838_v15 = vpop.f32.mrf.mxu1 }
 0x3c7   : > { %v1949_v63 = vmul.f32 %v7933_v54, %v1838_v15 }
 0x3c8   : > { %v6743_v21 = vpop.f32.mrf.mxu1 }
 0x3c9   : > { %1975 = vxpose.xlu0.b32.cont [7/16] (narrow) %v1943_v6, 8  ;;  %v1952_v54 = vmul.f32 %v7887_v25, %v6743_v21 }
 0x3ca   : > { %v1848_v39 = vpop.f32.mrf.mxu1 }
 0x3cb   : > { %v1951_v8 = vmul.f32 %v7909_v1, %v1848_v39 }
 0x3cc   : > { %v6746_v33 = vpop.f32.mrf.mxu1 }
 0x3cd   : > { %1976 = vxpose.xlu0.b32.cont [8/16] (narrow) %v1944_v47, 8  ;;  %v1954_v61 = vmul.f32 %v8028_v20, %v6746_v33 }
 0x3ce   : > { %v1858_v36 = vpop.f32.mrf.mxu1 }
 0x3cf   : > { %v1953_v56 = vmul.f32 %v8036_v29, %v1858_v36 }
 0x3d0   : > { %v6749_v58 = vpop.f32.mrf.mxu1 }
 0x3d1   : > { %1977 = vxpose.xlu0.b32.cont [9/16] (narrow) %v1945_v31, 8  ;;  %2001 = vxpose.xlu1.b32.start [1/16] (narrow) %v1953_v56, 8  ;;  %v1956_v29 = vmul.f32 %v8014_v27, %v6749_v58  ;;  %v11056_v31 = vld [vmem:[#allocation2_spill] sm:$0xff] }
 0x3d2   : > { %v1868_v16 = vpop.f32.mrf.mxu1 }
 0x3d3   : > { %v1955_v60 = vmul.f32 %v8022_v45, %v1868_v16 }
 0x3d4   : > { %v6752_v17 = vpop.f32.mrf.mxu1 }
 0x3d5   : > { %1978 = vxpose.xlu0.b32.cont [10/16] (narrow) %v1946_v52, 8  ;;  %2002 = vxpose.xlu1.b32.cont [2/16] (narrow) %v1954_v61, 8  ;;  %v1958_v45 = vmul.f32 %v8000_v9, %v6752_v17  ;;  %v11057_v17 = vld [vmem:[#allocation27_spill] sm:$0xff] }
 0x3d6   : > { %v1878_v7 = vpop.f32.mrf.mxu1 }
 0x3d7   : > { %v1957_v20 = vmul.f32 %v8008_v23, %v1878_v7 }
 0x3d8   : > { %v6755_v55 = vpop.f32.mrf.mxu1 }
 0x3d9   : > { %1979 = vxpose.xlu0.b32.cont [11/16] (narrow) %v1947_v13, 8  ;;  %2003 = vxpose.xlu1.b32.cont [3/16] (narrow) %v1955_v60, 8  ;;  %v1960_v23 = vmul.f32 %v7986_v57, %v6755_v55 }
 0x3da   : > { %v1888_v19 = vpop.f32.mrf.mxu1 }
 0x3db   : > { %v1959_v27 = vmul.f32 %v7994_v49, %v1888_v19 }
 0x3dc   : > { %v6758_v34 = vpop.f32.mrf.mxu1 }
 0x3dd   : > { %1980 = vxpose.xlu0.b32.cont [12/16] (narrow) %v1948_v26, 8  ;;  %2004 = vxpose.xlu1.b32.cont [4/16] (narrow) %v1956_v29, 8  ;;  %v1962_v40 = vmul.f32 %v7965_v51, %v6758_v34  ;;  %v11058_v29 = vld [vmem:[#allocation3_spill] sm:$0xff] }
 0x3de   : > { %v1898_v48 = vpop.f32.mrf.mxu1 }
 0x3df   : > { %v1961_v12 = vmul.f32 %v7977_v28, %v1898_v48 }
 0x3e0   : > { %v6761_v9 = vpop.f32.mrf.mxu1 }
 0x3e1   : > { %1981 = vxpose.xlu0.b32.cont [13/16] (narrow) %v1949_v63, 8  ;;  %2005 = vxpose.xlu1.b32.cont [5/16] (narrow) %v1957_v20, 8  ;;  %v1964_v6 = vmul.f32 %v7940_v11, %v6761_v9  ;;  %v8315_v11 = vld [vmem:[%s10842_s3 + $0x28] sm:$0xff]  ;;  %v2716_v63 = vld [vmem:[%s10840_s1 + $0x10] sm:$0xff] }
 0x3e2   : > { %v1908_v15 = vpop.f32.mrf.mxu1  ;;  %v8342_v20 = vld [vmem:[%s10841_s2 + $0x8] sm:$0xff] }
 0x3e3   : > { %v1963_v1 = vmul.f32 %v7953_v18, %v1908_v15 }
 0x3e4   : > { %v6764_v49 = vpop.f32.mrf.mxu1 }
 0x3e5   : > { %1982 = vxpose.xlu0.b32.cont [14/16] (narrow) %v1950_v3, 8  ;;  %2006 = vxpose.xlu1.b32.cont [6/16] (narrow) %v1958_v45, 8  ;;  %v1966_v28 = vmul.f32 %v7915_v24, %v6764_v49  ;;  %v7221_v24 = vld [vmem:[%s10842_s3] sm:$0xff] }
 0x3e6   : > { %v1918_v25 = vpop.f32.mrf.mxu1 }
 0x3e7   : > { %v1965_v57 = vmul.f32 %v7927_v14, %v1918_v25  ;;  %v7248_v14 = vmov 1966171168  }
 0x3e8   : > { %v6767_v21 = vpop.f32.mrf.mxu1  ;;  %v2038_v18 = vunpack.c.l.s4 %v7248_v14 }
 0x3e9   : > { %1983 = vxpose.xlu0.b32.cont [15/16] (narrow) %v1951_v8, 8  ;;  %2007 = vxpose.xlu1.b32.cont [7/16] (narrow) %v1959_v27, 8  ;;  %v1968_v47 = vmul.f32 %v7893_v2, %v6767_v21  ;;  %v2714_v2 = vld [vmem:[%s10840_s1] sm:$0xff]  ;;  %v2717_v8 = vld [vmem:[%s10840_s1 + $0x18] sm:$0xff] }
 0x3ea   : > { %v1928_v39 = vpop.f32.mrf.mxu1  ;;  %v2039_v33 = vunpack.c.0.s8 %v2038_v18 }
 0x3eb   : > { %v1967_v51 = vmul.f32 %v7903_v4, %v1928_v39  ;;  %v2715_v4 = vld [vmem:[%s10840_s1 + $0x8] sm:$0xff] }
 0x3ec   : > { %v8329_v56 = vsub.s32 %v2039_v33, %v11056_v31 }
 0x3ed   : > { %1984 = vxpose.xlu0.b32.end [16/16] (narrow) %v1952_v54, 8  ;;  %2008 = vxpose.xlu1.b32.cont [8/16] (narrow) %v1960_v23, 8 }
 0x3f1   : > { %2009 = vxpose.xlu1.b32.cont [9/16] (narrow) %v1961_v12, 8 }
 0x3f5   : > { %2010 = vxpose.xlu1.b32.cont [10/16] (narrow) %v1962_v40, 8 }
 0x3f9   : > { %2011 = vxpose.xlu1.b32.cont [11/16] (narrow) %v1963_v1, 8 }
 0x3fd   : > { %2012 = vxpose.xlu1.b32.cont [12/16] (narrow) %v1964_v6, 8 }
 0x401   : > { %2013 = vxpose.xlu1.b32.cont [13/16] (narrow) %v1965_v57, 8 }
 0x405   : > { %2014 = vxpose.xlu1.b32.cont [14/16] (narrow) %v1966_v28, 8 }
 0x409   : > { %2015 = vxpose.xlu1.b32.cont [15/16] (narrow) %v1967_v51, 8 }
 0x40d   : > { %2016 = vxpose.xlu1.b32.end [16/16] (narrow) %v1968_v47, 8 }
 0x416   : > { %2294 = vrot.lane.b32.xlu0 %v8315_v11, %s7246_s27 }
 0x41a   : > { %2503 = vrot.lane.b32.xlu0 %v7221_v24, %s7247_s30 }
 0x42b   : > { %2292 = vrot.lane.b32.xlu1 %v7221_v24, %s7246_s27 }
 0x42d   : > { %v1985_v36 = vpop.trf.xlu0 }
 0x42f   : > { %2505 = vrot.lane.b32.xlu1 %v8315_v11, %s7247_s30 }
 0x438   : > { %2718 = vxpose.xlu0.b32.start [1/2] (short) (narrow) %v2714_v2, 8 }
 0x43c   : > { %2719 = vxpose.xlu0.b32.end [2/2] (short) (narrow) %v2715_v4, 8 }
 0x44d   : > { %v2017_v58 = vpop.trf.xlu1 }
 0x44e   : > { %v2035_v52 = vcombine.low %v1985_v36, %v2017_v58  ;;  %v2036_v1 = vcombine.high %v1985_v36, %v2017_v58 }
 0x450   : > { %v2043_v61 = vrot.slane %v2035_v52, %v8329_v56  ;;  %v2050_v57 = vrot.slane %v2036_v1, %v8329_v56 }
 0x452   : > { %v2051_v16 = vcombine.high %v2043_v61, %v2043_v61  ;;  %v2059_v13 = vrot.slane %v2043_v61, %v8329_v56  ;;  %v2066_v47 = vrot.slane %v2050_v57, %v8329_v56  ;;  %v2052_v4 = vcombine.high %v2050_v57, %v2050_v57 }
 0x454   : > { %v2073_v60 = vrot.slane %v2051_v16, %v8329_v56  ;;  %v2086_v26 = vrot.slane %v2059_v13, %v11057_v17  ;;  %v2090_v7 = vrot.slane %v2059_v13, %v11058_v29  ;;  %v2081_v23 = vcombine.high %v2059_v13, %v2059_v13  ;;  %v7225_v13 = vld [vmem:[%s10841_s2 + $0x10] sm:$0xff] }
 0x455   : > { %v2122_v18 = vrot.slane %v2066_v47, %v11058_v29  ;;  %v2118_v36 = vrot.slane %v2066_v47, %v11057_v17  ;;  %v2080_v52 = vrot.slane %v2052_v4, %v8329_v56 }
 0x456   : > { %v2144_v55 = vmul.f32 %v8342_v20, %v2090_v7  ;;  %v2143_v3 = vmul.f32 %v2086_v26, %v7863_v0  ;;  %v2146_v45 = vmul.f32 %v2090_v7, %v7855_v22  ;;  %v2098_v19 = vrot.slane %v2073_v60, %v11058_v29 }
 0x457   : > { %v2145_v27 = vmul.f32 %v2086_v26, %v7871_v62  ;;  %v2094_v34 = vrot.slane %v2073_v60, %v11057_v17  ;;  %v2106_v9 = vrot.slane %v2081_v23, %v11058_v29  ;;  %v2102_v15 = vrot.slane %v2081_v23, %v11057_v17 }
 0x458   : > { %2750 = vxpose.xlu1.b32.start [1/2] (short) (narrow) %v2716_v63, 8  ;;  %2231 = vmatprep.mubr.f32.mxu0 %v2144_v55  ;;  %v2148_v54 = vmul.f32 %v8342_v20, %v2098_v19  ;;  %v2150_v12 = vmul.f32 %v2098_v19, %v7855_v22  ;;  %v2082_v6 = vcombine.high %v2073_v60, %v2073_v60 }
 0x459   : > { %2232 = vmatmul.mubr.f32.vlgmr.msra.gmra.mxu0 %v2143_v3  ;;  %v2147_v48 = vmul.f32 %v2094_v34, %v7863_v0  ;;  %v2149_v40 = vmul.f32 %v2094_v34, %v7871_v62  ;;  %v2152_v49 = vmul.f32 %v8342_v20, %v2106_v9  ;;  %v2151_v25 = vmul.f32 %v2102_v15, %v7863_v0 }
 0x45a   : > { %2236 = vmatprep.mubr.f32.mxu0 %v2146_v45  ;;  %v2154_v21 = vmul.f32 %v2106_v9, %v7855_v22  ;;  %v2114_v28 = vrot.slane %v2082_v6, %v11058_v29  ;;  %v2153_v39 = vmul.f32 %v2102_v15, %v7871_v62  ;;  %v2110_v51 = vrot.slane %v2082_v6, %v11057_v17 }
 0x45b   : > { %v2160_v58 = vmul.f32 %v8342_v20, %v2122_v18  ;;  %v2130_v16 = vrot.slane %v2080_v52, %v11058_v29  ;;  %v2161_v60 = vmul.f32 %v7225_v13, %v2118_v36  ;;  %v2126_v26 = vrot.slane %v2080_v52, %v11057_v17  ;;  %v11063_v52 = vld [vmem:[#allocation24_spill] sm:$0xff] }
 0x45c   : > { %2751 = vxpose.xlu1.b32.end [2/2] (short) (narrow) %v2717_v8, 8  ;;  %v2155_v2 = vmul.f32 %v2110_v51, %v7863_v0  ;;  %v2158_v14 = vmul.f32 %v2114_v28, %v7855_v22  ;;  %v2157_v33 = vmul.f32 %v2110_v51, %v7871_v62  ;;  %v7223_v22 = vld [vmem:[%s10841_s2] sm:$0xff]  ;;  %v7224_v62 = vld [vmem:[%s10841_s2 + $0x18] sm:$0xff] }
 0x45d   : > { %2237 = vmatmul.mubr.f32.gmra.mxu0 %v2145_v27  ;;  %v2159_v0 = vmul.f32 %v7223_v22, %v2118_v36  ;;  %v2162_v61 = vmul.f32 %v7224_v62, %v2122_v18  ;;  %v2164_v7 = vmul.f32 %v8342_v20, %v2130_v16  ;;  %v2163_v63 = vmul.f32 %v7223_v22, %v2126_v26 }
 0x45e   : > { %2241 = vmatprep.mubr.f32.mxu0 %v2148_v54  ;;  %v2165_v55 = vmul.f32 %v7225_v13, %v2126_v26 }
 0x461   : > { %2242 = vmatmul.mubr.f32.gmra.mxu0 %v2147_v48 }
 0x462   : > { %2246 = vmatprep.mubr.f32.mxu0 %v2150_v12  ;;  %v11059_v12 = vld [vmem:[#allocation8_spill] sm:$0xff] }
 0x465   : > { %2787 = vrot.lane.b32.xlu0 %v7221_v24, %s7249_s19  ;;  %2247 = vmatmul.mubr.f32.gmra.mxu0 %v2149_v40  ;;  %v2156_v24 = vmul.f32 %v8342_v20, %v2114_v28  ;;  %v11060_v40 = vld [vmem:[#allocation23_spill] sm:$0xff] }
 0x466   : > { %2251 = vmatprep.mubr.f32.mxu0 %v2152_v49 }
 0x469   : > { %3428 = vrot.lane.b32.xlu0 %v8088_v44, %s7250_s20  ;;  %2252 = vmatmul.mubr.f32.gmra.mxu0 %v2151_v25  ;;  %v11061_v25 = vld [vmem:[#allocation21_spill] sm:$0xff] }
 0x46a   : > { %2256 = vmatprep.mubr.f32.mxu0 %v2154_v21 }
 0x46d   : > { %3526 = vrot.lane.b32.xlu0 %v8092_v38, %s7251_s24  ;;  %2257 = vmatmul.mubr.f32.gmra.mxu0 %v2153_v39  ;;  %v11062_v39 = vld [vmem:[#allocation25_spill] sm:$0xff] }
 0x46e   : > { %2261 = vmatprep.mubr.f32.mxu0 %v2156_v24 }
 0x471   : > { %3622 = vrot.lane.b32.xlu0 %v8092_v38, %s7252_s25  ;;  %2262 = vmatmul.mubr.f32.gmra.mxu0 %v2155_v2 }
 0x472   : > { %2266 = vmatprep.mubr.f32.mxu0 %v2158_v14 }
 0x475   : > { %3432 = vrot.lane.b32.xlu0 %v8094_v37, %s7250_s20  ;;  %2267 = vmatmul.mubr.f32.gmra.mxu0 %v2157_v33 }
 0x476   : > { %2271 = vmatprep.mubr.f32.mxu0 %v2160_v58 }
 0x479   : > { %3812 = vrot.lane.b32.xlu0 %v8088_v44, %s7253_s8  ;;  %2272 = vmatmul.mubr.f32.gmra.mxu0 %v2159_v0 }
 0x47a   : > { %2789 = vrot.lane.b32.xlu1 %v8315_v11, %s7249_s19  ;;  %2276 = vmatprep.mubr.f32.mxu0 %v2162_v61  ;;  %v2166_v11 = vmul.f32 %v7224_v62, %v2130_v16  ;;  %s7255_s19 = smov 42  }
 0x47d   : > { %3528 = vrot.lane.b32.xlu0 %v8094_v37, %s7251_s24  ;;  %2277 = vmatmul.mubr.f32.gmra.mxu0 %v2161_v60 }
 0x47e   : > { %3430 = vrot.lane.b32.xlu1 %v8092_v38, %s7250_s20  ;;  %2281 = vmatprep.mubr.f32.mxu0 %v2164_v7  ;;  %v11065_v7 = vld [vmem:[#allocation22_spill] sm:$0xff] }
 0x481   : > { %3530 = vrot.lane.b32.xlu0 %v8096_v43, %s7251_s24  ;;  %2282 = vmatmul.mubr.f32.gmra.mxu0 %v2163_v63 }
 0x482   : > { %3524 = vrot.lane.b32.xlu1 %v8088_v44, %s7251_s24  ;;  %2286 = vmatprep.mubr.f32.mxu0 %v2166_v11 }
 0x485   : > { %3626 = vrot.lane.b32.xlu0 %v8096_v43, %s7252_s25  ;;  %2287 = vmatmul.mubr.f32.gmra.mxu0 %v2165_v55 }
 0x486   : > { %3620 = vrot.lane.b32.xlu1 %v8088_v44, %s7252_s25 }
 0x488   : > { %v2295_v20 = vpop.permute.xlu0 %2294 }
 0x489   : > { %3436 = vrot.lane.b32.xlu0 %v8098_v42, %s7250_s20  ;;  %6768 = vmatprep.subr.mxu0 %v2295_v20 }
 0x48a   : > { %3716 = vrot.lane.b32.xlu1 %v8088_v44, %s7254_s11  ;;  %6769 = vmatpush3.msra.mxu0 %v2295_v20 }
 0x48b   : > { %6963 = vmatprep.subr.mxu1 %v2295_v20 }
 0x48c   : > { %6965 = vmatpush3.msra.mxu1 %v2295_v20  ;;  %v8503_v19 = vpop.permute.xlu0 %2503 }
 0x48d   : > { %3816 = vrot.lane.b32.xlu0 %v8094_v37, %s7253_s8 }
 0x48e   : > { %3718 = vrot.lane.b32.xlu1 %v8092_v38, %s7254_s11 }
 0x491   : > { %3532 = vrot.lane.b32.xlu0 %v8098_v42, %s7251_s24 }
 0x492   : > { %3434 = vrot.lane.b32.xlu1 %v8096_v43, %s7250_s20 }
 0x495   : > { %3534 = vrot.lane.b32.xlu0 %v8100_v35, %s7251_s24 }
 0x496   : > { %3814 = vrot.lane.b32.xlu1 %v8092_v38, %s7253_s8 }
 0x499   : > { %3630 = vrot.lane.b32.xlu0 %v8100_v35, %s7252_s25 }
 0x49a   : > { %3624 = vrot.lane.b32.xlu1 %v8094_v37, %s7252_s25 }
 0x49d   : > { %3440 = vrot.lane.b32.xlu0 %v8104_v41, %s7250_s20  ;;  %v2293_v3 = vpop.permute.xlu1 %2292 }
 0x49e   : > { %3720 = vrot.lane.b32.xlu1 %v8094_v37, %s7254_s11  ;;  %6770 = vmatprep.subr.mxu0 %v2293_v3 }
 0x49f   : > { %6771 = vmatpush3.msra.mxu0 %v2293_v3  ;;  %6964 = vmatprep.subr.mxu1 %v2293_v3 }
 0x4a0   : > { %6966 = vmatpush3.msra.mxu1 %v2293_v3 }
 0x4a1   : > { %3820 = vrot.lane.b32.xlu0 %v8098_v42, %s7253_s8  ;;  %v8438_v45 = vpop.permute.xlu1 %2505 }
 0x4a2   : > { %3722 = vrot.lane.b32.xlu1 %v8096_v43, %s7254_s11  ;;  %6790 = vmatprep.subr.mxu0 %v8438_v45 }
 0x4a5   : > { %3536 = vrot.lane.b32.xlu0 %v8104_v41, %s7251_s24 }
 0x4a6   : > { %3438 = vrot.lane.b32.xlu1 %v8100_v35, %s7250_s20 }
 0x4a9   : > { %3538 = vrot.lane.b32.xlu0 %v8108_v10, %s7251_s24 }
 0x4aa   : > { %3818 = vrot.lane.b32.xlu1 %v8096_v43, %s7253_s8 }
 0x4ad   : > { %3634 = vrot.lane.b32.xlu0 %v8108_v10, %s7252_s25 }
 0x4ae   : > { %3628 = vrot.lane.b32.xlu1 %v8098_v42, %s7252_s25 }
 0x4b1   : > { %3444 = vrot.lane.b32.xlu0 %v8112_v50, %s7250_s20 }
 0x4b2   : > { %3724 = vrot.lane.b32.xlu1 %v8098_v42, %s7254_s11 }
 0x4b4   : > { %v8509_v8 = vpop.trf.xlu0 }
 0x4b5   : > { %3824 = vrot.lane.b32.xlu0 %v8104_v41, %s7253_s8 }
 0x4b6   : > { %3726 = vrot.lane.b32.xlu1 %v8100_v35, %s7254_s11 }
 0x4b9   : > { %3540 = vrot.lane.b32.xlu0 %v8112_v50, %s7251_s24 }
 0x4ba   : > { %3442 = vrot.lane.b32.xlu1 %v8108_v10, %s7250_s20 }
 0x4bd   : > { %3542 = vrot.lane.b32.xlu0 %v8116_v5, %s7251_s24 }
 0x4be   : > { %3822 = vrot.lane.b32.xlu1 %v8100_v35, %s7253_s8 }
 0x4c1   : > { %3638 = vrot.lane.b32.xlu0 %v8116_v5, %s7252_s25 }
 0x4c2   : > { %3632 = vrot.lane.b32.xlu1 %v8104_v41, %s7252_s25 }
 0x4c5   : > { %3448 = vrot.lane.b32.xlu0 %v8120_v30, %s7250_s20 }
 0x4c6   : > { %3728 = vrot.lane.b32.xlu1 %v8104_v41, %s7254_s11 }
 0x4c9   : > { %3828 = vrot.lane.b32.xlu0 %v8112_v50, %s7253_s8 }
 0x4ca   : > { %3730 = vrot.lane.b32.xlu1 %v8108_v10, %s7254_s11 }
 0x4cd   : > { %3544 = vrot.lane.b32.xlu0 %v8120_v30, %s7251_s24 }
 0x4ce   : > { %3446 = vrot.lane.b32.xlu1 %v8116_v5, %s7250_s20 }
 0x4d1   : > { %3546 = vrot.lane.b32.xlu0 %v8128_v53, %s7251_s24 }
 0x4d2   : > { %3826 = vrot.lane.b32.xlu1 %v8108_v10, %s7253_s8 }
 0x4d4   : > { %v8515_v27 = vpop.trf.xlu1 }
 0x4d5   : > { %3642 = vrot.lane.b32.xlu0 %v8128_v53, %s7252_s25 }
 0x4d6   : > { %3636 = vrot.lane.b32.xlu1 %v8112_v50, %s7252_s25 }
 0x4d7   : > { %v8521_v34 = vpop.permute.xlu0 %2787 }
 0x4d9   : > { %3452 = vrot.lane.b32.xlu0 %v8136_v59, %s7250_s20 }
 0x4da   : > { %3732 = vrot.lane.b32.xlu1 %v8112_v50, %s7254_s11 }
 0x4db   : > { %v8530_v23 = vpop.permute.xlu0 %3428 }
 0x4dd   : > { %3832 = vrot.lane.b32.xlu0 %v8120_v30, %s7253_s8 }
 0x4de   : > { %3734 = vrot.lane.b32.xlu1 %v8116_v5, %s7254_s11 }
 0x4df   : > { %v8540_v48 = vpop.permute.xlu0 %3526 }
 0x4e1   : > { %3548 = vrot.lane.b32.xlu0 %v8136_v59, %s7251_s24 }
 0x4e2   : > { %3450 = vrot.lane.b32.xlu1 %v8128_v53, %s7250_s20 }
 0x4e3   : > { %v8546_v9 = vpop.permute.xlu0 %3622 }
 0x4e5   : > { %3550 = vrot.lane.b32.xlu0 %v8148_v46, %s7251_s24 }
 0x4e6   : > { %3830 = vrot.lane.b32.xlu1 %v8116_v5, %s7253_s8 }
 0x4e7   : > { %v8556_v15 = vpop.permute.xlu0 %3432 }
 0x4e9   : > { %3646 = vrot.lane.b32.xlu0 %v8148_v46, %s7252_s25 }
 0x4ea   : > { %3640 = vrot.lane.b32.xlu1 %v8120_v30, %s7252_s25 }
 0x4eb   : > { %v8564_v49 = vpop.permute.xlu0 %3812 }
 0x4ec   : > { %v8523_v54 = vpop.permute.xlu1 %2789 }
 0x4ed   : > { %3456 = vrot.lane.b32.xlu0 %v8156_v32, %s7250_s20  ;;  %6812 = vmatprep.subr.mxu1 %v8523_v54 }
 0x4ee   : > { %3736 = vrot.lane.b32.xlu1 %v8120_v30, %s7254_s11 }
 0x4ef   : > { %v8576_v57 = vpop.permute.xlu0 %3528 }
 0x4f0   : > { %v8560_v1 = vpop.permute.xlu1 %3430 }
 0x4f1   : > { %3836 = vrot.lane.b32.xlu0 %v8136_v59, %s7253_s8 }
 0x4f2   : > { %3738 = vrot.lane.b32.xlu1 %v8128_v53, %s7254_s11 }
 0x4f3   : > { %v8584_v28 = vpop.permute.xlu0 %3530 }
 0x4f4   : > { %v8570_v6 = vpop.permute.xlu1 %3524 }
 0x4f5   : > { %3552 = vrot.lane.b32.xlu0 %v8156_v32, %s7251_s24 }
 0x4f6   : > { %3454 = vrot.lane.b32.xlu1 %v8148_v46, %s7250_s20 }
 0x4f7   : > { %v8596_v24 = vpop.permute.xlu0 %3626 }
 0x4f8   : > { %v8580_v21 = vpop.permute.xlu1 %3620 }
 0x4f9   : > { %3554 = vrot.lane.b32.xlu0 %v11059_v12, %s7251_s24 }
 0x4fa   : > { %3834 = vrot.lane.b32.xlu1 %v8128_v53, %s7253_s8 }
 0x4fb   : > { %v8605_v58 = vpop.permute.xlu0 %3436 }
 0x4fc   : > { %v8590_v51 = vpop.permute.xlu1 %3716 }
 0x4fd   : > { %3650 = vrot.lane.b32.xlu0 %v11059_v12, %s7252_s25 }
 0x4fe   : > { %3644 = vrot.lane.b32.xlu1 %v8136_v59, %s7252_s25 }
 0x4ff   : > { %v8622_v13 = vpop.permute.xlu0 %3816 }
 0x500   : > { %v8600_v18 = vpop.permute.xlu1 %3718  ;;  %11064 = vst [vmem:[#allocation2_spill] sm:$0xff] %v8622_v13 }
 0x501   : > { %3460 = vrot.lane.b32.xlu0 %v11060_v40, %s7250_s20 }
 0x502   : > { %3740 = vrot.lane.b32.xlu1 %v8136_v59, %s7254_s11 }
 0x503   : > { %v8631_v3 = vpop.permute.xlu0 %3532 }
 0x504   : > { %v8613_v62 = vpop.permute.xlu1 %3434 }
 0x505   : > { %3840 = vrot.lane.b32.xlu0 %v8156_v32, %s7253_s8 }
 0x506   : > { %3742 = vrot.lane.b32.xlu1 %v8148_v46, %s7254_s11 }
 0x508   : > { %v8626_v11 = vpop.permute.xlu1 %3814 }
 0x509   : > { %3556 = vrot.lane.b32.xlu0 %v11060_v40, %s7251_s24 }
 0x50a   : > { %3458 = vrot.lane.b32.xlu1 %v11059_v12, %s7250_s20 }
 0x50d   : > { %3558 = vrot.lane.b32.xlu0 %v11061_v25, %s7251_s24 }
 0x50e   : > { %3838 = vrot.lane.b32.xlu1 %v8148_v46, %s7253_s8 }
 0x511   : > { %3654 = vrot.lane.b32.xlu0 %v11061_v25, %s7252_s25 }
 0x512   : > { %3648 = vrot.lane.b32.xlu1 %v8156_v32, %s7252_s25 }
 0x515   : > { %3464 = vrot.lane.b32.xlu0 %v11062_v39, %s7250_s20 }
 0x516   : > { %3744 = vrot.lane.b32.xlu1 %v8156_v32, %s7254_s11 }
 0x519   : > { %3844 = vrot.lane.b32.xlu0 %v11060_v40, %s7253_s8  ;;  %v6420_v47 = vpop.f32.mrf.mxu0 }
 0x51a   : > { %3746 = vrot.lane.b32.xlu1 %v11059_v12, %s7254_s11 }
 0x51b   : > { %v6421_v2 = vpop.f32.mrf.mxu0 }
 0x51c   : > { %v6422_v4 = vadd.f32 %v6421_v2, %v6420_v47  ;;  %v8638_v47 = vpop.permute.xlu1 %3624 }
 0x51d   : > { %3560 = vrot.lane.b32.xlu0 %v11062_v39, %s7251_s24  ;;  %v6423_v14 = vpop.f32.mrf.mxu0 }
 0x51e   : > { %3462 = vrot.lane.b32.xlu1 %v11061_v25, %s7250_s20  ;;  %6772 = vmatprep.mubr.msk.f32.mxu0 %vm404_vm0, %v6422_v4 }
 0x51f   : > { %v6424_v33 = vpop.f32.mrf.mxu0 }
 0x520   : > { %v6425_v36 = vadd.f32 %v6424_v33, %v6423_v14  ;;  %v8645_v14 = vpop.permute.xlu0 %3534 }
 0x521   : > { %3562 = vrot.lane.b32.xlu0 %v11063_v52, %s7251_s24  ;;  %v6426_v22 = vpop.f32.mrf.mxu0 }
 0x522   : > { %3842 = vrot.lane.b32.xlu1 %v11059_v12, %s7253_s8  ;;  %6773 = vmatmul.mubr.msk.f32.vlgmr.msra.gmra.mxu0 %vm404_vm0, %v6425_v36 }
 0x523   : > { %v6427_v0 = vpop.f32.mrf.mxu0  ;;  %6791 = vmatpush3.msra.mxu0 %v8438_v45 }
 0x524   : > { %v6428_v61 = vadd.f32 %v6427_v0, %v6426_v22  ;;  %6792 = vmatprep.subr.mxu0 %v8503_v19  ;;  %v11066_v22 = vld [vmem:[#allocation20_spill] sm:$0xff] }
 0x525   : > { %3658 = vrot.lane.b32.xlu0 %v11063_v52, %s7252_s25  ;;  %v6429_v16 = vpop.f32.mrf.mxu0  ;;  %6793 = vmatpush3.msra.mxu0 %v8503_v19 }
 0x526   : > { %3652 = vrot.lane.b32.xlu1 %v11060_v40, %s7252_s25  ;;  %6775 = vmatprep.mubr.msk.f32.mxu0 %vm404_vm0, %v6428_v61  ;;  %v8649_v61 = vpop.permute.xlu1 %3720 }
 0x527   : > { %v6430_v60 = vpop.f32.mrf.mxu0 }
 0x528   : > { %v6431_v26 = vadd.f32 %v6430_v60, %v6429_v16 }
 0x529   : > { %3468 = vrot.lane.b32.xlu0 %v11065_v7, %s7250_s20  ;;  %v6432_v63 = vpop.f32.mrf.mxu0 }
 0x52a   : > { %3748 = vrot.lane.b32.xlu1 %v11060_v40, %s7254_s11  ;;  %6776 = vmatmul.mubr.msk.f32.gmra.mxu0 %vm404_vm0, %v6431_v26  ;;  %v8654_v26 = vpop.permute.xlu0 %3630  ;;  %v11082_v40 = vld [vmem:[#allocation7_spill] sm:$0xff] }
 0x52b   : > { %v6433_v55 = vpop.f32.mrf.mxu0  ;;  %11067 = vst [vmem:[#allocation62_spill] sm:$0xff] %v8654_v26 }
 0x52c   : > { %v6434_v20 = vadd.f32 %v6433_v55, %v6432_v63 }
 0x52d   : > { %3848 = vrot.lane.b32.xlu0 %v11062_v39, %s7253_s8  ;;  %v6435_v45 = vpop.f32.mrf.mxu0 }
 0x52e   : > { %3750 = vrot.lane.b32.xlu1 %v11061_v25, %s7254_s11  ;;  %6778 = vmatprep.mubr.msk.f32.mxu0 %vm404_vm0, %v6434_v20  ;;  %v8662_v20 = vpop.permute.xlu1 %3722 }
 0x52f   : > { %v6436_v19 = vpop.f32.mrf.mxu0 }
 0x530   : > { %v6437_v2 = vadd.f32 %v6436_v19, %v6435_v45  ;;  %v11068_v19 = vld [vmem:[#allocation17_spill] sm:$0xff] }
 0x531   : > { %3564 = vrot.lane.b32.xlu0 %v11065_v7, %s7251_s24  ;;  %v6438_v4 = vpop.f32.mrf.mxu0 }
 0x532   : > { %3466 = vrot.lane.b32.xlu1 %v11063_v52, %s7250_s20  ;;  %6779 = vmatmul.mubr.msk.f32.gmra.mxu0 %vm404_vm0, %v6437_v2 }
 0x533   : > { %v6439_v33 = vpop.f32.mrf.mxu0 }
 0x534   : > { %v6440_v36 = vadd.f32 %v6439_v33, %v6438_v4  ;;  %v8671_v4 = vpop.permute.xlu0 %3440 }
 0x535   : > { %3566 = vrot.lane.b32.xlu0 %v11066_v22, %s7251_s24  ;;  %v6441_v0 = vpop.f32.mrf.mxu0  ;;  %11069 = vst [vmem:[#allocation63_spill] sm:$0xff] %v8671_v4 }
 0x536   : > { %3846 = vrot.lane.b32.xlu1 %v11061_v25, %s7253_s8  ;;  %6781 = vmatprep.mubr.msk.f32.mxu1 %vm404_vm0, %v6440_v36 }
 0x537   : > { %v6442_v16 = vpop.f32.mrf.mxu0 }
 0x538   : > { %v6443_v60 = vadd.f32 %v6442_v16, %v6441_v0  ;;  %v8675_v0 = vpop.permute.xlu1 %3438 }
 0x539   : > { %3662 = vrot.lane.b32.xlu0 %v11066_v22, %s7252_s25  ;;  %v6444_v63 = vpop.f32.mrf.mxu0 }
 0x53a   : > { %3656 = vrot.lane.b32.xlu1 %v11062_v39, %s7252_s25  ;;  %6782 = vmatmul.mubr.msk.f32.vlgmr.msra.gmra.mxu1 %vm404_vm0, %v6443_v60  ;;  %v8680_v60 = vpop.permute.xlu0 %3820 }
 0x53b   : > { %v6445_v55 = vpop.f32.mrf.mxu0  ;;  %6813 = vmatpush3.msra.mxu1 %v8523_v54  ;;  %11070 = vst [vmem:[#allocation64_spill] sm:$0xff] %v8680_v60 }
 0x53c   : > { %v6446_v45 = vadd.f32 %v6445_v55, %v6444_v63  ;;  %6814 = vmatprep.subr.mxu1 %v8521_v34 }
 0x53d   : > { %3472 = vrot.lane.b32.xlu0 %v11068_v19, %s7250_s20  ;;  %v6447_v2 = vpop.f32.mrf.mxu0  ;;  %6815 = vmatpush3.msra.mxu1 %v8521_v34 }
 0x53e   : > { %3752 = vrot.lane.b32.xlu1 %v11062_v39, %s7254_s11  ;;  %6784 = vmatprep.mubr.msk.f32.mxu1 %vm404_vm0, %v6446_v45  ;;  %v8687_v45 = vpop.permute.xlu1 %3818 }
 0x53f   : > { %v6448_v33 = vpop.f32.mrf.mxu0  ;;  %11071 = vst [vmem:[#allocation65_spill] sm:$0xff] %v8687_v45 }
 0x540   : > { %v6449_v54 = vadd.f32 %v6448_v33, %v6447_v2  ;;  %v11072_v33 = vld [vmem:[#allocation15_spill] sm:$0xff] }
 0x541   : > { %3852 = vrot.lane.b32.xlu0 %v11065_v7, %s7253_s8  ;;  %v6450_v36 = vpop.f32.mrf.mxu0 }
 0x542   : > { %3754 = vrot.lane.b32.xlu1 %v11063_v52, %s7254_s11  ;;  %6785 = vmatmul.mubr.msk.f32.gmra.mxu1 %vm404_vm0, %v6449_v54  ;;  %v8694_v54 = vpop.permute.xlu0 %3536 }
 0x543   : > { %v6451_v34 = vpop.f32.mrf.mxu0  ;;  %11073 = vst [vmem:[#allocation66_spill] sm:$0xff] %v8694_v54 }
 0x544   : > { %v6452_v16 = vadd.f32 %v6451_v34, %v6450_v36  ;;  %v8698_v36 = vpop.permute.xlu1 %3628 }
 0x545   : > { %3568 = vrot.lane.b32.xlu0 %v11068_v19, %s7251_s24  ;;  %v6453_v63 = vpop.f32.mrf.mxu0 }
 0x546   : > { %3470 = vrot.lane.b32.xlu1 %v11066_v22, %s7250_s20  ;;  %6787 = vmatprep.mubr.msk.f32.mxu1 %vm404_vm0, %v6452_v16  ;;  %v8702_v34 = vpop.permute.xlu0 %3538  ;;  %v11075_v16 = vld [vmem:[#allocation12_spill] sm:$0xff] }
 0x547   : > { %v6454_v55 = vpop.f32.mrf.mxu0  ;;  %11074 = vst [vmem:[#allocation67_spill] sm:$0xff] %v8702_v34 }
 0x548   : > { %v6455_v2 = vadd.f32 %v6454_v55, %v6453_v63  ;;  %v8708_v63 = vpop.permute.xlu1 %3724 }
 0x549   : > { %3570 = vrot.lane.b32.xlu0 %v11072_v33, %s7251_s24  ;;  %11076 = vst [vmem:[#allocation68_spill] sm:$0xff] %v8708_v63 }
 0x54a   : > { %6788 = vmatmul.mubr.msk.f32.gmra.mxu1 %vm404_vm0, %v6455_v2  ;;  %3850 = vrot.lane.b32.xlu1 %v11063_v52, %s7253_s8  ;;  %v8714_v55 = vpop.permute.xlu0 %3634 }
 0x54b   : > { %11077 = vst [vmem:[#allocation69_spill] sm:$0xff] %v8714_v55 }
 0x54c   : > { %v8718_v2 = vpop.permute.xlu1 %3726 }
 0x54d   : > { %3666 = vrot.lane.b32.xlu0 %v11072_v33, %s7252_s25  ;;  %11078 = vst [vmem:[#allocation70_spill] sm:$0xff] %v8718_v2 }
 0x54e   : > { %3660 = vrot.lane.b32.xlu1 %v11065_v7, %s7252_s25  ;;  %v8722_v52 = vpop.permute.xlu0 %3444 }
 0x54f   : > { %11079 = vst [vmem:[#allocation71_spill] sm:$0xff] %v8722_v52 }
 0x550   : > { %v8728_v39 = vpop.permute.xlu1 %3442 }
 0x551   : > { %3476 = vrot.lane.b32.xlu0 %v11075_v16, %s7250_s20 }
 0x552   : > { %3756 = vrot.lane.b32.xlu1 %v11065_v7, %s7254_s11  ;;  %v11080_v7 = vld [vmem:[#allocation10_spill] sm:$0xff]  ;;  %v8734_v25 = vpop.permute.xlu0 %3824 }
 0x553   : > { %11081 = vst [vmem:[#allocation72_spill] sm:$0xff] %v8734_v25 }
 0x554   : > { %v8738_v12 = vpop.permute.xlu1 %3822 }
 0x555   : > { %3856 = vrot.lane.b32.xlu0 %v11068_v19, %s7253_s8  ;;  %11083 = vst [vmem:[#allocation73_spill] sm:$0xff] %v8738_v12 }
 0x556   : > { %3758 = vrot.lane.b32.xlu1 %v11066_v22, %s7254_s11  ;;  %v8742_v32 = vpop.permute.xlu0 %3540 }
 0x557   : > { %11084 = vst [vmem:[#allocation74_spill] sm:$0xff] %v8742_v32 }
 0x559   : > { %3572 = vrot.lane.b32.xlu0 %v11075_v16, %s7251_s24 }
 0x55a   : > { %3474 = vrot.lane.b32.xlu1 %v11072_v33, %s7250_s20  ;;  %v8754_v46 = vpop.permute.xlu0 %3542 }
 0x55b   : > { %11086 = vst [vmem:[#allocation76_spill] sm:$0xff] %v8754_v46  ;;  %v11091_v46 = vld [vmem:[#allocation5_spill] sm:$0xff] }
 0x55d   : > { %3574 = vrot.lane.b32.xlu0 %v11080_v7, %s7251_s24 }
 0x55e   : > { %3854 = vrot.lane.b32.xlu1 %v11066_v22, %s7253_s8  ;;  %v8748_v22 = vpop.permute.xlu1 %3632  ;;  %v8762_v53 = vpop.permute.xlu0 %3638 }
 0x55f   : > { %11085 = vst [vmem:[#allocation75_spill] sm:$0xff] %v8748_v22  ;;  %11089 = vst [vmem:[#allocation78_spill] sm:$0xff] %v8762_v53 }
 0x561   : > { %3670 = vrot.lane.b32.xlu0 %v11080_v7, %s7252_s25 }
 0x562   : > { %3664 = vrot.lane.b32.xlu1 %v11068_v19, %s7252_s25  ;;  %v8758_v59 = vpop.permute.xlu1 %3728  ;;  %v8774_v55 = vpop.permute.xlu0 %3448 }
 0x563   : > { %11088 = vst [vmem:[#allocation77_spill] sm:$0xff] %v8758_v59  ;;  %11092 = vst [vmem:[#allocation80_spill] sm:$0xff] %v8774_v55 }
 0x565   : > { %3480 = vrot.lane.b32.xlu0 %v11082_v40, %s7250_s20 }
 0x566   : > { %3760 = vrot.lane.b32.xlu1 %v11068_v19, %s7254_s11  ;;  %v11087_v19 = vld [vmem:[#allocation6_spill] sm:$0xff]  ;;  %v8768_v25 = vpop.permute.xlu1 %3730  ;;  %v8782_v53 = vpop.permute.xlu0 %3828 }
 0x567   : > { %11090 = vst [vmem:[#allocation79_spill] sm:$0xff] %v8768_v25  ;;  %11094 = vst [vmem:[#allocation82_spill] sm:$0xff] %v8782_v53 }
 0x569   : > { %3860 = vrot.lane.b32.xlu0 %v11075_v16, %s7253_s8 }
 0x56a   : > { %3762 = vrot.lane.b32.xlu1 %v11072_v33, %s7254_s11  ;;  %v8794_v30 = vpop.permute.xlu0 %3544 }
 0x56b   : > { %11097 = vst [vmem:[#allocation84_spill] sm:$0xff] %v8794_v30 }
 0x56d   : > { %3576 = vrot.lane.b32.xlu0 %v11082_v40, %s7251_s24 }
 0x56e   : > { %3478 = vrot.lane.b32.xlu1 %v11080_v7, %s7250_s20  ;;  %v8802_v55 = vpop.permute.xlu0 %3546 }
 0x56f   : > { %11099 = vst [vmem:[#allocation86_spill] sm:$0xff] %v8802_v55 }
 0x571   : > { %3578 = vrot.lane.b32.xlu0 %v11087_v19, %s7251_s24 }
 0x572   : > { %3858 = vrot.lane.b32.xlu1 %v11072_v33, %s7253_s8  ;;  %v8778_v33 = vpop.permute.xlu1 %3446 }
 0x573   : > { %11093 = vst [vmem:[#allocation81_spill] sm:$0xff] %v8778_v33 }
 0x575   : > { %3674 = vrot.lane.b32.xlu0 %v11087_v19, %s7252_s25 }
 0x576   : > { %3668 = vrot.lane.b32.xlu1 %v11075_v16, %s7252_s25  ;;  %v8788_v25 = vpop.permute.xlu1 %3826 }
 0x577   : > { %11095 = vst [vmem:[#allocation83_spill] sm:$0xff] %v8788_v25  ;;  %v11100_v25 = vld [vmem:[#allocation28_spill] sm:$0xff] }
 0x579   : > { %3484 = vrot.lane.b32.xlu0 %v11091_v46, %s7250_s20 }
 0x57a   : > { %3764 = vrot.lane.b32.xlu1 %v11075_v16, %s7254_s11  ;;  %v11096_v16 = vld [vmem:[#allocation4_spill] sm:$0xff]  ;;  %v8798_v53 = vpop.permute.xlu1 %3636 }
 0x57b   : > { %11098 = vst [vmem:[#allocation85_spill] sm:$0xff] %v8798_v53 }
 0x57d   : > { %3864 = vrot.lane.b32.xlu0 %v11082_v40, %s7253_s8 }
 0x57e   : > { %3766 = vrot.lane.b32.xlu1 %v11080_v7, %s7254_s11  ;;  %v8808_v12 = vpop.permute.xlu1 %3732 }
 0x57f   : > { %11101 = vst [vmem:[#allocation87_spill] sm:$0xff] %v8808_v12 }
 0x581   : > { %3580 = vrot.lane.b32.xlu0 %v11091_v46, %s7251_s24 }
 0x582   : > { %3482 = vrot.lane.b32.xlu1 %v11087_v19, %s7250_s20  ;;  %v8818_v55 = vpop.permute.xlu1 %3734 }
 0x583   : > { %11103 = vst [vmem:[#allocation89_spill] sm:$0xff] %v8818_v55 }
 0x585   : > { %3582 = vrot.lane.b32.xlu0 %v11096_v16, %s7251_s24 }
 0x586   : > { %3862 = vrot.lane.b32.xlu1 %v11080_v7, %s7253_s8  ;;  %v8814_v7 = vpop.permute.xlu0 %3642  ;;  %v8828_v12 = vpop.permute.xlu1 %3450 }
 0x587   : > { %11102 = vst [vmem:[#allocation88_spill] sm:$0xff] %v8814_v7  ;;  %11106 = vst [vmem:[#allocation91_spill] sm:$0xff] %v8828_v12 }
 0x589   : > { %3678 = vrot.lane.b32.xlu0 %v11096_v16, %s7252_s25 }
 0x58a   : > { %3672 = vrot.lane.b32.xlu1 %v11082_v40, %s7252_s25  ;;  %v8822_v30 = vpop.permute.xlu0 %3452 }
 0x58b   : > { %11104 = vst [vmem:[#allocation90_spill] sm:$0xff] %v8822_v30  ;;  %v8838_v30 = vpop.permute.xlu1 %3830 }
 0x58c   : > { %11108 = vst [vmem:[#allocation93_spill] sm:$0xff] %v8838_v30 }
 0x58d   : > { %3488 = vrot.lane.b32.xlu0 %v11100_v25, %s7250_s20 }
 0x58e   : > { %3768 = vrot.lane.b32.xlu1 %v11082_v40, %s7254_s11  ;;  %v11105_v40 = vld [vmem:[#allocation29_spill] sm:$0xff]  ;;  %v8834_v7 = vpop.permute.xlu0 %3832 }
 0x58f   : > { %11107 = vst [vmem:[#allocation92_spill] sm:$0xff] %v8834_v7 }
 0x591   : > { %3868 = vrot.lane.b32.xlu0 %v11091_v46, %s7253_s8 }
 0x592   : > { %3770 = vrot.lane.b32.xlu1 %v11087_v19, %s7254_s11  ;;  %v8842_v55 = vpop.permute.xlu0 %3548 }
 0x593   : > { %11109 = vst [vmem:[#allocation94_spill] sm:$0xff] %v8842_v55 }
 0x595   : > { %3584 = vrot.lane.b32.xlu0 %v11100_v25, %s7251_s24 }
 0x596   : > { %3486 = vrot.lane.b32.xlu1 %v11096_v16, %s7250_s20  ;;  %v8938_v41 = vpop.permute.xlu0 %3550 }
 0x599   : > { %3586 = vrot.lane.b32.xlu0 %v11105_v40, %s7251_s24  ;;  %s7267_s24 = smov 26  }
 0x59a   : > { %3866 = vrot.lane.b32.xlu1 %v11087_v19, %s7253_s8  ;;  %v8848_v19 = vpop.permute.xlu1 %3640 }
 0x59b   : > { %11110 = vst [vmem:[#allocation95_spill] sm:$0xff] %v8848_v19 }
 0x59d   : > { %3682 = vrot.lane.b32.xlu0 %v11105_v40, %s7252_s25 }
 0x59e   : > { %3676 = vrot.lane.b32.xlu1 %v11091_v46, %s7252_s25  ;;  %v8852_v7 = vpop.permute.xlu1 %3736 }
 0x59f   : > { %11111 = vst [vmem:[#allocation96_spill] sm:$0xff] %v8852_v7  ;;  %v2477_v7 = vsub.s32 6, %v11056_v31 }
 0x5a1   : > { %3778 = vrot.lane.b32.xlu0 %v11105_v40, %s7254_s11 }
 0x5a2   : > { %3772 = vrot.lane.b32.xlu1 %v11091_v46, %s7254_s11  ;;  %v8858_v46 = vpop.permute.xlu1 %3738 }
 0x5a3   : > { %11112 = vst [vmem:[#allocation97_spill] sm:$0xff] %v8858_v46 }
 0x5a5   : > { %3874 = vrot.lane.b32.xlu0 %v11105_v40, %s7253_s8 }
 0x5a6   : > { %3774 = vrot.lane.b32.xlu1 %v11096_v16, %s7254_s11  ;;  %v8862_v55 = vpop.permute.xlu1 %3454 }
 0x5a7   : > { %11113 = vst [vmem:[#allocation98_spill] sm:$0xff] %v8862_v55 }
 0x5aa   : > { %3490 = vrot.lane.b32.xlu1 %v11105_v40, %s7250_s20  ;;  %v2461_v40 = vsub.s32 5, %v11056_v31 }
 0x5ae   : > { %3870 = vrot.lane.b32.xlu1 %v11096_v16, %s7253_s8  ;;  %v8871_v16 = vld [vmem:[%s10843_s4] sm:$0xff] }
 0x5af   : > { %v2462_v30 = vrot.slane %v8871_v16, %v2461_v40  ;;  %v2478_v46 = vrot.slane %v8871_v16, %v2477_v7 }
 0x5b2   : > { %3680 = vrot.lane.b32.xlu1 %v11100_v25, %s7252_s25 }
 0x5b6   : > { %3776 = vrot.lane.b32.xlu1 %v11100_v25, %s7254_s11  ;;  %s7262_s11 = smov 113  }
 0x5ba   : > { %3872 = vrot.lane.b32.xlu1 %v11100_v25, %s7253_s8  ;;  %s7258_s8 = smov 1  }
 0x5e2   : > { %v6774_v19 = vpop.f32.mrf.mxu0 }
 0x5e3   : > { %v2464_v12 = vmul.f32 %v6774_v19, %v2462_v30 }
 0x5e4   : > { %v2400_v53 = vpop.f32.mrf.mxu0 }
 0x5e5   : > { %v2463_v55 = vmul.f32 %v2462_v30, %v2400_v53  ;;  %v2480_v32 = vadd.f32 %v2478_v46, %v2464_v12 }
 0x5e7   : > { %v2479_v5 = vadd.f32 %v2478_v46, %v2463_v55  ;;  %v2492_v33 = vmax.f32 %v2480_v32, 0.0 }
 0x5e9   : > { %v2491_v25 = vmax.f32 %v2479_v5, 0.0 }
 0x5ea   : > { %v6777_v2 = vpop.f32.mrf.mxu0 }
 0x5eb   : > { %v2466_v60 = vmul.f32 %v6777_v2, %v2462_v30  ;;  %6794 = vmatprep.mubr.msk.f32.mxu0 %vm404_vm0, %v2491_v25 }
 0x5ec   : > { %v2410_v59 = vpop.f32.mrf.mxu0  ;;  %6795 = vmatmul.mubr.msk.f32.vlgmr.msra.gmra.mxu0 %vm404_vm0, %v2492_v33 }
 0x5ed   : > { %v2465_v50 = vmul.f32 %v2462_v30, %v2410_v59  ;;  %v2482_v52 = vadd.f32 %v2478_v46, %v2466_v60 }
 0x5ef   : > { %v2481_v40 = vadd.f32 %v2478_v46, %v2465_v50  ;;  %v2494_v7 = vmax.f32 %v2482_v52, 0.0 }
 0x5f1   : > { %v2493_v22 = vmax.f32 %v2481_v40, 0.0 }
 0x5f2   : > { %v6780_v34 = vpop.f32.mrf.mxu0 }
 0x5f3   : > { %v2468_v19 = vmul.f32 %v6780_v34, %v2462_v30  ;;  %6797 = vmatprep.mubr.msk.f32.mxu0 %vm404_vm0, %v2493_v22 }
 0x5f4   : > { %v2420_v53 = vpop.f32.mrf.mxu0  ;;  %6798 = vmatmul.mubr.msk.f32.gmra.mxu0 %vm404_vm0, %v2494_v7 }
 0x5f5   : > { %v2467_v5 = vmul.f32 %v2462_v30, %v2420_v53  ;;  %v2484_v32 = vadd.f32 %v2478_v46, %v2468_v19  ;;  %v1269_v19 = vsub.s32 3, %v11056_v31 }
 0x5f7   : > { %v2483_v12 = vadd.f32 %v2478_v46, %v2467_v5  ;;  %v2496_v25 = vmax.f32 %v2484_v32, 0.0 }
 0x5f9   : > { %v2495_v55 = vmax.f32 %v2483_v12, 0.0  ;;  %v8885_v12 = vrot.slane %v8871_v16, %v1269_v19 }
 0x5fa   : > { %v6783_v2 = vpop.f32.mrf.mxu1 }
 0x5fb   : > { %v2470_v26 = vmul.f32 %v6783_v2, %v2462_v30  ;;  %6800 = vmatprep.mubr.msk.f32.mxu0 %vm404_vm0, %v2495_v55 }
 0x5fc   : > { %v2430_v59 = vpop.f32.mrf.mxu1  ;;  %6801 = vmatmul.mubr.msk.f32.gmra.mxu0 %vm404_vm0, %v2496_v25 }
 0x5fd   : > { %v2469_v50 = vmul.f32 %v2462_v30, %v2430_v59  ;;  %v2486_v52 = vadd.f32 %v2478_v46, %v2470_v26  ;;  %v1305_v26 = vsub.s32 4, %v11056_v31  ;;  %v11114_v59 = vld [vmem:[#allocation31_spill] sm:$0xff] }
 0x5fe   : > { %11115 = vst [vmem:[#allocation31_spill] sm:$0xff] %v8938_v41 }
 0x5ff   : > { %v2485_v60 = vadd.f32 %v2478_v46, %v2469_v50  ;;  %v2498_v22 = vmax.f32 %v2486_v52, 0.0  ;;  %v1271_v50 = vmul.f32 %v8885_v12, %v11114_v59 }
 0x601   : > { %v2497_v33 = vmax.f32 %v2485_v60, 0.0 }
 0x602   : > { %v6786_v34 = vpop.f32.mrf.mxu1 }
 0x603   : > { %v2472_v40 = vmul.f32 %v6786_v34, %v2462_v30  ;;  %6803 = vmatprep.mubr.msk.f32.mxu0 %vm404_vm0, %v2497_v33  ;;  %v8893_v33 = vrot.slane %v8871_v16, %v1305_v26 }
 0x604   : > { %v2440_v7 = vpop.f32.mrf.mxu1  ;;  %6804 = vmatmul.mubr.msk.f32.gmra.mxu0 %vm404_vm0, %v2498_v22 }
 0x605   : > { %v2471_v53 = vmul.f32 %v2462_v30, %v2440_v7  ;;  %v2488_v5 = vadd.f32 %v2478_v46, %v2472_v40  ;;  %v1307_v40 = vadd.f32 %v8893_v33, %v1271_v50 }
 0x607   : > { %v2487_v32 = vadd.f32 %v2478_v46, %v2471_v53  ;;  %v2500_v25 = vmax.f32 %v2488_v5, 0.0  ;;  %v1339_v5 = vmax.f32 %v1307_v40, 0.0 }
 0x609   : > { %v2499_v55 = vmax.f32 %v2487_v32, 0.0  ;;  %v2783_v32 = vrot.slane %v8515_v27, 2 }
 0x60a   : > { %v6789_v2 = vpop.f32.mrf.mxu1 }
 0x60b   : > { %v2474_v52 = vmul.f32 %v6789_v2, %v2462_v30  ;;  %6806 = vmatprep.mubr.msk.f32.mxu0 %vm404_vm0, %v2499_v55  ;;  %v2786_v26 = vsel %vm2785_vm2, %v8509_v8, %v2783_v32  ;;  %v263_v8 = vld [vmem:[%s10843_s4 + $0x8] sm:$0x7] }
 0x60c   : > { %v2450_v60 = vpop.f32.mrf.mxu1  ;;  %6807 = vmatmul.mubr.msk.f32.gmra.mxu0 %vm404_vm0, %v2500_v25  ;;  %6816 = vmatprep.mubr.msk.f32.mxu1 %vm404_vm0, %v2786_v26 }
 0x60d   : > { %v2473_v22 = vmul.f32 %v2462_v30, %v2450_v60  ;;  %v2490_v34 = vadd.f32 %v2478_v46, %v2474_v52  ;;  %6817 = vmatmul.mubr.msk.f32.vlgmr.msra.gmra.mxu1 %vm404_vm0, %v2783_v32  ;;  %v2672_v60 = vsub.s32 7, %v11056_v31 }
 0x60f   : > { %v2489_v7 = vadd.f32 %v2478_v46, %v2473_v22  ;;  %v2502_v53 = vmax.f32 %v2490_v34, 0.0  ;;  %v8914_v34 = vrot.slane %v8871_v16, %v2672_v60 }
 0x611   : > { %v2501_v19 = vmax.f32 %v2489_v7, 0.0  ;;  %v8917_v7 = vrot.slane %v263_v8, %v11057_v17 }
 0x613   : > { %6809 = vmatprep.mubr.msk.f32.mxu0 %vm404_vm0, %v2501_v19 }
 0x614   : > { %6810 = vmatmul.mubr.msk.f32.gmra.mxu0 %vm404_vm0, %v2502_v53 }
 0x615   : > { %6843 = vmatprep.mubr.msk.f32.mxu0 %vm404_vm0, %v1339_v5 }
 0x6ac   : > { %v8903_v30 = vpop.f32.mrf.mxu0 }
 0x6ae   : > { %v8905_v46 = vpop.f32.mrf.mxu0 }
 0x6b4   : > { %v6799_v55 = vpop.f32.mrf.mxu0 }
 0x6b6   : > { %v8907_v25 = vpop.f32.mrf.mxu0 }
 0x6bc   : > { %v6802_v2 = vpop.f32.mrf.mxu0 }
 0x6be   : > { %v2631_v59 = vpop.f32.mrf.mxu0 }
 0x6c4   : > { %v6805_v50 = vpop.f32.mrf.mxu0 }
 0x6c6   : > { %v2641_v52 = vpop.f32.mrf.mxu0 }
 0x6cc   : > { %v6808_v27 = vpop.f32.mrf.mxu0 }
 0x6cd   : > { %v2683_v5 = vmul.f32 %v6808_v27, %v8914_v34  ;;  %v2891_v27 = vstv %s6109_s17 }
 0x6ce   : > { %v2651_v22 = vpop.f32.mrf.mxu0 }
 0x6cf   : > { %v2699_v16 = vadd.f32 %v8917_v7, %v2683_v5  ;;  %v2682_v60 = vmul.f32 %v8914_v34, %v2651_v22 }
 0x6d4   : > { %v6811_v40 = vpop.f32.mrf.mxu0 }
 0x6d5   : > { %v2685_v19 = vmul.f32 %v6811_v40, %v8914_v34  ;;  %v2890_v40 = vadd.s32 8, %v11056_v31 }
 0x6d6   : > { %v2661_v53 = vpop.f32.mrf.mxu0 }
 0x6d7   : > { %v2701_v32 = vadd.f32 %v8917_v7, %v2685_v19  ;;  %v2684_v26 = vmul.f32 %v8914_v34, %v2661_v53  ;;  %v2681_v19 = vmul.f32 %v6805_v50, %v8914_v34  ;;  %v2711_v53 = vmax.f32 %v2699_v16, 0.0  ;;  %v8941_v16 = vpop.permute.xlu1 %3834 }
 0x6d8   : > { %v2893_v22 = vadd.s32 %v2891_v27, %v2890_v40  ;;  %11116 = vst [vmem:[#allocation99_spill] sm:$0xff] %v8941_v16  ;;  %v2678_v16 = vmul.f32 %v8914_v34, %v2631_v59  ;;  %v11118_v59 = vsub.s32 2, %v11056_v31 }
 0x6d9   : > { %v2713_v54 = vmax.f32 %v2701_v32, 0.0  ;;  %v2700_v13 = vadd.f32 %v8917_v7, %v2684_v26  ;;  %v2698_v32 = vadd.f32 %v8917_v7, %v2682_v60  ;;  %v2892_v26 = vadd.s32 %v2891_v27, %v11056_v31 }
 0x6da   : > { %v2902_v50 = vsub.s32 0, %v2893_v22  ;;  %vm2901_vm4 = vcmp.lt.s32.totalorder %v2893_v22, 0 }
 0x6db   : > { %v2712_v63 = vmax.f32 %v2700_v13, 0.0  ;;  %6819 = vmatprep.subr.msk.mxu0 %vm404_vm0, %v2713_v54  ;;  %v2697_v13 = vadd.f32 %v8917_v7, %v2681_v19  ;;  %v2710_v5 = vmax.f32 %v2698_v32, 0.0  ;;  %v2895_v45 = vsub.s32 0, %v2892_v26  ;;  %v8948_v19 = vpop.permute.xlu0 %3646  ;;  %v8950_v32 = vpop.permute.xlu1 %3644 }
 0x6dc   : > { %6820 = vmatpush3.xpose.msk.msra.mxu0 %vm404_vm0, %v2713_v54  ;;  %v2680_v54 = vmul.f32 %v8914_v34, %v2641_v52  ;;  %v6111_v52 = vmin.u32 %v2902_v50, %v2893_v22  ;;  %11117 = vst [vmem:[#allocation100_spill] sm:$0xff] %v8948_v19  ;;  %vm2894_vm3 = vcmp.lt.s32.totalorder %v2892_v26, 0 }
 0x6dd   : > { %6821 = vmatprep.subr.msk.mxu0 %vm404_vm0, %v2712_v63  ;;  %v2709_v60 = vmax.f32 %v2697_v13, 0.0  ;;  %v6110_v27 = vmin.u32 %v2895_v45, %v2892_v26  ;;  %v2876_v45 = vrot.slane %v263_v8, %v11058_v29  ;;  %v2677_v13 = vmul.f32 %v6799_v55, %v8914_v34 }
 0x6de   : > { %v2696_v40 = vadd.f32 %v8917_v7, %v2680_v54 }
 0x6df   : > { %v2898_v4 = vand.u32 1, %v6110_v27  ;;  %v8959_v19 = vpop.permute.xlu0 %3456  ;;  %v6818_v27 = vpop.f32.mrf.mxu1 }
 0x6e0   : > { %6822 = vmatpush3.xpose.msk.msra.mxu0 %vm404_vm0, %v2712_v63  ;;  %v2679_v63 = vmul.f32 %v6802_v2, %v8914_v34  ;;  %v2708_v41 = vmax.f32 %v2696_v40, 0.0  ;;  %v2905_v2 = vand.u32 1, %v6111_v52  ;;  %v2878_v55 = vmul.f32 %v6818_v27, %v2876_v45 }
 0x6e1   : > { %6823 = vmatprep.subr.msk.mxu0 %vm404_vm0, %v2711_v53  ;;  %v2899_v50 = vsub.s32 0, %v2898_v4  ;;  %v2693_v52 = vadd.f32 %v8917_v7, %v2677_v13  ;;  %v2864_v29 = vpop.f32.mrf.mxu1 }
 0x6e2   : > { %v2906_v40 = vsub.s32 0, %v2905_v2 }
 0x6e3   : > { %v8974_v22 = vpop.permute.xlu0 %3836 }
 0x6e4   : > { %6824 = vmatpush3.xpose.msk.msra.mxu0 %vm404_vm0, %v2711_v53  ;;  %v2695_v53 = vadd.f32 %v8917_v7, %v2679_v63  ;;  %v2882_v63 = vrot.slane %v263_v8, %v11118_v59  ;;  %v2877_v8 = vmul.f32 %v2876_v45, %v2864_v29  ;;  %v2907_v26 = vsel %vm2901_vm4, %v2906_v40, %v2905_v2  ;;  %v11129_v45 = vld [vmem:[#allocation33_spill] sm:$0xff] }
 0x6e5   : > { %6825 = vmatprep.subr.msk.mxu0 %vm404_vm0, %v2710_v5  ;;  %v2675_v59 = vmul.f32 %v8903_v30, %v8914_v34  ;;  %11120 = vst [vmem:[#allocation102_spill] sm:$0xff] %v8974_v22  ;;  %vm2909_vm7 = vcmp.ne.s32.totalorder %v2907_v26, 0  ;;  %vm2911_vm8 = vcmp.lt.s32.totalorder %v2907_v26, 0  ;;  %v2915_v2 = vadd.s32 2, %v2907_v26 }
 0x6e6   : > { %v2707_v54 = vmax.f32 %v2695_v53, 0.0  ;;  %v2884_v31 = vadd.f32 %v2882_v63, %v2878_v55  ;;  %v2883_v13 = vadd.f32 %v2882_v63, %v2877_v8  ;;  %vm8990_vm10 = vmand %vm2911_vm8, %vm2909_vm7 }
 0x6e7   : > { %v8997_v8 = vpop.permute.xlu0 %3552 }
 0x6e8   : > { %6826 = vmatpush3.xpose.msk.msra.mxu0 %vm404_vm0, %v2710_v5  ;;  %v2694_v5 = vadd.f32 %v8917_v7, %v2678_v16  ;;  %v2676_v16 = vmul.f32 %v8914_v34, %v8907_v25  ;;  %v2886_v27 = vmax.f32 %v2884_v31, 0.0  ;;  %v2885_v30 = vmax.f32 %v2883_v13, 0.0  ;;  %11126 = vst [vmem:[#allocation104_spill] sm:$0xff] %v8997_v8  ;;  %v11137_v8 = vld [vmem:[#allocation35_spill] sm:$0xff] }
 0x6e9   : > { %6827 = vmatprep.subr.msk.mxu0 %vm404_vm0, %v2709_v60 }
 0x6ea   : > { %v2706_v53 = vmax.f32 %v2694_v5, 0.0  ;;  %v2705_v5 = vmax.f32 %v2693_v52, 0.0  ;;  %v2977_v29 = vrot.slane %v2886_v27, %v8329_v56  ;;  %v2921_v40 = vcombine.high %v2885_v30, %v2885_v30  ;;  %v11128_v52 = vld [vmem:[#allocation30_spill] sm:$0xff] }
 0x6eb   : > { %v2928_v55 = vrot.slane %v2885_v30, %v8329_v56 }
 0x6ec   : > { %6828 = vmatpush3.xpose.msk.msra.mxu0 %vm404_vm0, %v2709_v60  ;;  %v8964_v60 = vpop.permute.xlu1 %3740  ;;  %v8987_v63 = vrot.slane %v2977_v29, %v8329_v56  ;;  %v2935_v13 = vrot.slane %v2921_v40, %v8329_v56 }
 0x6ed   : > { %6829 = vmatprep.subr.msk.mxu0 %vm404_vm0, %v2708_v41  ;;  %11119 = vst [vmem:[#allocation101_spill] sm:$0xff] %v8964_v60 }
 0x6ee   : > { %v9015_v40 = vrot.slane %v2935_v13, %v8329_v56 }
 0x6f0   : > { %6830 = vmatpush3.xpose.msk.msra.mxu0 %vm404_vm0, %v2708_v41  ;;  %v2900_v41 = vsel %vm2894_vm3, %v2899_v50, %v2898_v4  ;;  %v8976_v25 = vpop.permute.xlu1 %3742  ;;  %v2692_v4 = vadd.f32 %v8917_v7, %v2676_v16  ;;  %v2978_v50 = vcombine.high %v2977_v29, %v2977_v29  ;;  %v2691_v16 = vadd.f32 %v8917_v7, %v2675_v59 }
 0x6f1   : > { %6831 = vmatprep.subr.msk.mxu0 %vm404_vm0, %v2707_v54  ;;  %vm2908_vm5 = vcmp.ne.s32.totalorder %v2900_v41, 0  ;;  %vm2910_vm6 = vcmp.lt.s32.totalorder %v2900_v41, 0  ;;  %11121 = vst [vmem:[#allocation103_spill] sm:$0xff] %v8976_v25  ;;  %v2936_v29 = vcombine.high %v2928_v55, %v2928_v55  ;;  %v2917_v59 = vsel %vm8990_vm10, %v2915_v2, %v2907_v26 }
 0x6f2   : > { %vm8982_vm9 = vmand %vm2910_vm6, %vm2908_vm5  ;;  %v2704_v31 = vmax.f32 %v2692_v4, 0.0  ;;  %v2992_v27 = vrot.slane %v2978_v50, %v8329_v56  ;;  %v2937_v4 = vcombine.high %v2935_v13, %v2935_v13  ;;  %v2703_v25 = vmax.f32 %v2691_v16, 0.0 }
 0x6f3   : > { %v1272_v26 = vmul.f32 %v11128_v52, %v8885_v12  ;;  %v9029_v13 = vrot.slane %v2928_v55, %v8329_v56  ;;  %vm9031_vm11 = vcmp.eq.s32.totalorder %v2917_v59, 0  ;;  %vm4168_vm6 = vcmask 785408  }
 0x6f4   : > { %6832 = vmatpush3.xpose.msk.msra.mxu0 %vm404_vm0, %v2707_v54  ;;  %v2914_v54 = vadd.s32 2, %v2900_v41  ;;  %v9002_v30 = vpop.permute.xlu1 %3458  ;;  %v2994_v50 = vcombine.high %v2992_v27, %v2992_v27 }
 0x6f5   : > { %6833 = vmatprep.subr.msk.mxu0 %vm404_vm0, %v2706_v53  ;;  %11127 = vst [vmem:[#allocation105_spill] sm:$0xff] %v9002_v30  ;;  %v1275_v30 = vmul.f32 %v8885_v12, %v11137_v8 }
 0x6f6   : > { %v3052_v2 = vrot.slane %v2994_v50, %v11057_v17 }
 0x6f8   : > { %6834 = vmatpush3.xpose.msk.msra.mxu0 %vm404_vm0, %v2706_v53  ;;  %v2674_v53 = vmul.f32 %v8914_v34, %v8905_v46  ;;  %v2916_v46 = vsel %vm8982_vm9, %v2914_v54, %v2900_v41  ;;  %v2993_v34 = vcombine.high %v8987_v63, %v8987_v63  ;;  %v9022_v41 = vrot.slane %v2937_v4, %v8329_v56  ;;  %v9048_v55 = vpop.permute.xlu1 %3838 }
 0x6f9   : > { %6835 = vmatprep.subr.msk.mxu0 %vm404_vm0, %v2705_v5  ;;  %v1273_v54 = vmul.f32 %v8885_v12, %v11129_v45  ;;  %vm9035_vm12 = vcmp.eq.s32.totalorder %v2916_v46, 0  ;;  %11135 = vst [vmem:[#allocation33_spill] sm:$0xff] %v9048_v55  ;;  %v1308_v46 = vadd.f32 %v8893_v33, %v1272_v26  ;;  %v11136_v45 = vld [vmem:[#allocation32_spill] sm:$0xff]  ;;  %v3044_v26 = vrot.slane %v2992_v27, %v11057_v17 }
 0x6fa   : > { %v2690_v22 = vadd.f32 %v8917_v7, %v2674_v53  ;;  %v9039_v53 = vpop.permute.xlu0 %3554  ;;  %v3048_v4 = vrot.slane %v2993_v34, %v11057_v17  ;;  %v1311_v27 = vadd.f32 %v8893_v33, %v1275_v30  ;;  %v11141_v30 = vld [vmem:[#allocation36_spill] sm:$0xff] }
 0x6fb   : > { %11134 = vst [vmem:[#allocation30_spill] sm:$0xff] %v9039_v53  ;;  %v1274_v53 = vmul.f32 %v11136_v45, %v8885_v12  ;;  %v1309_v34 = vadd.f32 %v8893_v33, %v1273_v54 }
 0x6fc   : > { %6836 = vmatpush3.xpose.msk.msra.mxu0 %vm404_vm0, %v2705_v5  ;;  %v9012_v5 = vrot.slane %v2936_v29, %v8329_v56  ;;  %v3018_v29 = vrot.slane %v9015_v40, %v11057_v17  ;;  %v2702_v59 = vmax.f32 %v2690_v22, 0.0  ;;  %v9077_v60 = vpop.permute.xlu1 %3648 }
 0x6fd   : > { %6837 = vmatprep.subr.msk.mxu0 %vm404_vm0, %v2704_v31  ;;  %v1341_v45 = vmax.f32 %v1309_v34, 0.0 }
 0x6fe   : > { %v2967_v56 = vcombine.high %v9012_v5, %v9012_v5  ;;  %v3068_v22 = vsel %vm9031_vm11, %v3018_v29, %v3048_v4  ;;  %v9068_v54 = vpop.permute.xlu0 %3650  ;;  %v3067_v8 = vsel %vm9035_vm12, %v3018_v29, %v3048_v4  ;;  %v1278_v4 = vmul.f32 %v11141_v30, %v8885_v12  ;;  %v11144_v30 = vld [vmem:[#allocation41_spill] sm:$0xff] }
 0x6ff   : > { %11138 = vst [vmem:[#allocation32_spill] sm:$0xff] %v9068_v54 }
 0x700   : > { %6838 = vmatpush3.xpose.msk.msra.mxu0 %vm404_vm0, %v2704_v31  ;;  %v3022_v31 = vrot.slane %v9022_v41, %v11057_v17 }
 0x701   : > { %6839 = vmatprep.subr.msk.mxu0 %vm404_vm0, %v2703_v25 }
 0x702   : > { %v3070_v50 = vsel %vm9031_vm11, %v3022_v31, %v3052_v2  ;;  %v3069_v52 = vsel %vm9035_vm12, %v3022_v31, %v3052_v2  ;;  %v2966_v2 = vcombine.high %v9029_v13, %v9029_v13  ;;  %v1340_v31 = vmax.f32 %v1308_v46, 0.0  ;;  %v11140_v46 = vld [vmem:[#allocation37_spill] sm:$0xff] }
 0x703   : > { %6891 = vmatprep.subr.mxu1 %v3070_v50  ;;  %v1277_v54 = vmul.f32 %v8885_v12, %v11140_v46  ;;  %v9096_v46 = vpop.permute.xlu0 %3460 }
 0x704   : > { %6840 = vmatpush3.xpose.msk.msra.mxu0 %vm404_vm0, %v2703_v25  ;;  %6892 = vmatpush3.msra.mxu1 %v3070_v50  ;;  %v3014_v25 = vrot.slane %v2967_v56, %v11057_v17  ;;  %v1310_v50 = vadd.f32 %v8893_v33, %v1274_v53  ;;  %v11139_v56 = vld [vmem:[#allocation34_spill] sm:$0xff]  ;;  %v3010_v29 = vrot.slane %v2966_v2, %v11057_v17 }
 0x705   : > { %6841 = vmatprep.subr.msk.mxu0 %vm404_vm0, %v2702_v59  ;;  %6893 = vmatprep.subr.mxu1 %v3069_v52  ;;  %v1276_v55 = vmul.f32 %v11139_v56, %v8885_v12  ;;  %v3040_v53 = vrot.slane %v8987_v63, %v11057_v17  ;;  %v11142_v56 = vld [vmem:[#allocation39_spill] sm:$0xff]  ;;  %v1343_v63 = vmax.f32 %v1311_v27, 0.0 }
 0x706   : > { %6894 = vmatpush3.msra.mxu1 %v3069_v52  ;;  %v3065_v52 = vsel %vm9035_vm12, %v3014_v25, %v3044_v26  ;;  %v1342_v34 = vmax.f32 %v1310_v50, 0.0  ;;  %v1279_v2 = vmul.f32 %v8885_v12, %v11142_v56  ;;  %v11143_v50 = vld [vmem:[#allocation38_spill] sm:$0xff]  ;;  %v2969_v56 = vcombine.high %v9015_v40, %v9015_v40 }
 0x707   : > { %6895 = vmatprep.subr.mxu1 %v3068_v22  ;;  %v1280_v27 = vmul.f32 %v11143_v50, %v8885_v12  ;;  %v3002_v40 = vrot.slane %v9029_v13, %v11057_v17 }
 0x708   : > { %6842 = vmatpush3.xpose.msk.msra.mxu0 %vm404_vm0, %v2702_v59  ;;  %6896 = vmatpush3.msra.mxu1 %v3068_v22  ;;  %v3066_v59 = vsel %vm9031_vm11, %v3014_v25, %v3044_v26  ;;  %v1312_v22 = vadd.f32 %v8893_v33, %v1276_v55  ;;  %v1314_v55 = vadd.f32 %v8893_v33, %v1278_v4 }
 0x709   : > { %6897 = vmatprep.subr.mxu1 %v3067_v8  ;;  %v3063_v25 = vsel %vm9035_vm12, %v3010_v29, %v3040_v53  ;;  %v2970_v26 = vcombine.high %v9022_v41, %v9022_v41  ;;  %v3032_v50 = vrot.slane %v2969_v56, %v11057_v17 }
 0x70a   : > { %6898 = vmatpush3.msra.mxu1 %v3067_v8  ;;  %v9100_v8 = vpop.permute.xlu1 %3744  ;;  %v1346_v41 = vmax.f32 %v1314_v55, 0.0 }
 0x70b   : > { %6844 = vmatmul.mubr.msk.f32.vlgmr.msra.gmra.mxu0 %vm404_vm0, %v1340_v31  ;;  %6899 = vmatprep.subr.mxu1 %v3066_v59  ;;  %v1313_v31 = vadd.f32 %v8893_v33, %v1277_v54  ;;  %v1344_v54 = vmax.f32 %v1312_v22, 0.0  ;;  %v3059_v7 = vsel %vm9035_vm12, %v3002_v40, %v3032_v50 }
 0x70c   : > { %6846 = vmatprep.mubr.msk.f32.mxu0 %vm404_vm0, %v1341_v45  ;;  %6900 = vmatpush3.msra.mxu1 %v3066_v59  ;;  %v3064_v45 = vsel %vm9031_vm11, %v3010_v29, %v3040_v53  ;;  %v1315_v59 = vadd.f32 %v8893_v33, %v1279_v2  ;;  %v3036_v29 = vrot.slane %v2970_v26, %v11057_v17  ;;  %v9118_v53 = vpop.permute.xlu0 %3840  ;;  %v11146_v26 = vld [vmem:[#allocation43_spill] sm:$0xff] }
 0x70d   : > { %6901 = vmatprep.subr.mxu1 %v3065_v52  ;;  %v1345_v4 = vmax.f32 %v1313_v31, 0.0  ;;  %v1316_v2 = vadd.f32 %v8893_v33, %v1280_v27  ;;  %v3060_v27 = vsel %vm9031_vm11, %v3002_v40, %v3032_v50 }
 0x70e   : > { %6902 = vmatpush3.msra.mxu1 %v3065_v52  ;;  %v3006_v52 = vrot.slane %v9012_v5, %v11057_v17  ;;  %v1347_v5 = vmax.f32 %v1315_v59, 0.0  ;;  %v9129_v55 = vpop.permute.xlu1 %3746  ;;  %v11161_v17 = vld [vmem:[#allocation57_spill] sm:$0xff] }
 0x70f   : > { %6847 = vmatmul.mubr.msk.f32.gmra.mxu0 %vm404_vm0, %v1342_v34  ;;  %v1281_v34 = vmul.f32 %v8885_v12, %v11144_v30  ;;  %6903 = vmatprep.subr.mxu1 %v3064_v45  ;;  %v1348_v59 = vmax.f32 %v1316_v2, 0.0 }
 0x710   : > { %6849 = vmatprep.mubr.msk.f32.mxu0 %vm404_vm0, %v1343_v63  ;;  %6904 = vmatpush3.msra.mxu1 %v3064_v45  ;;  %v3062_v22 = vsel %vm9031_vm11, %v3006_v52, %v3036_v29  ;;  %v11145_v63 = vld [vmem:[#allocation40_spill] sm:$0xff] }
 0x711   : > { %6905 = vmatprep.subr.mxu1 %v3063_v25  ;;  %v1282_v31 = vmul.f32 %v11145_v63, %v8885_v12  ;;  %v1317_v45 = vadd.f32 %v8893_v33, %v1281_v34  ;;  %v11147_v34 = vld [vmem:[#allocation42_spill] sm:$0xff]  ;;  %v11149_v63 = vld [vmem:[#allocation44_spill] sm:$0xff] }
 0x712   : > { %6906 = vmatpush3.msra.mxu1 %v3063_v25  ;;  %v1283_v25 = vmul.f32 %v8885_v12, %v11146_v26  ;;  %v9152_v56 = vpop.permute.xlu1 %3462 }
 0x713   : > { %6850 = vmatmul.mubr.msk.f32.gmra.mxu0 %vm404_vm0, %v1344_v54  ;;  %6907 = vmatprep.subr.mxu1 %v3062_v22  ;;  %v3061_v54 = vsel %vm9035_vm12, %v3006_v52, %v3036_v29  ;;  %v1318_v30 = vadd.f32 %v8893_v33, %v1282_v31  ;;  %v1349_v52 = vmax.f32 %v1317_v45, 0.0  ;;  %v11148_v29 = vld [vmem:[#allocation45_spill] sm:$0xff]  ;;  %v1286_v31 = vmul.f32 %v11149_v63, %v8885_v12 }
 0x714   : > { %6852 = vmatprep.mubr.msk.f32.mxu0 %vm404_vm0, %v1345_v4  ;;  %6908 = vmatpush3.msra.mxu1 %v3062_v22  ;;  %v1284_v4 = vmul.f32 %v11147_v34, %v8885_v12  ;;  %v1319_v13 = vadd.f32 %v8893_v33, %v1283_v25  ;;  %v9148_v22 = vpop.permute.xlu0 %3556  ;;  %v11150_v25 = vld [vmem:[#allocation47_spill] sm:$0xff] }
 0x715   : > { %6909 = vmatprep.subr.mxu1 %v3061_v54  ;;  %v1350_v2 = vmax.f32 %v1318_v30, 0.0  ;;  %v1287_v16 = vmul.f32 %v8885_v12, %v11150_v25  ;;  %v1322_v50 = vadd.f32 %v8893_v33, %v1286_v31  ;;  %v11154_v31 = vld [vmem:[#allocation51_spill] sm:$0xff] }
 0x716   : > { %6910 = vmatpush3.msra.mxu1 %v3061_v54  ;;  %v1351_v45 = vmax.f32 %v1319_v13, 0.0  ;;  %v9169_v30 = vpop.permute.xlu1 %3842 }
 0x717   : > { %6853 = vmatmul.mubr.msk.f32.gmra.mxu0 %vm404_vm0, %v1346_v41  ;;  %6911 = vmatprep.subr.mxu1 %v3060_v27  ;;  %v1285_v41 = vmul.f32 %v8885_v12, %v11148_v29  ;;  %v1354_v29 = vmax.f32 %v1322_v50, 0.0  ;;  %v11156_v50 = vld [vmem:[#allocation50_spill] sm:$0xff] }
 0x718   : > { %6855 = vmatprep.mubr.msk.f32.mxu0 %vm404_vm0, %v1347_v5  ;;  %6912 = vmatpush3.msra.mxu1 %v3060_v27  ;;  %v1320_v5 = vadd.f32 %v8893_v33, %v1284_v4  ;;  %v9163_v54 = vpop.permute.xlu0 %3558  ;;  %v11151_v27 = vld [vmem:[#allocation46_spill] sm:$0xff]  ;;  %v1323_v4 = vadd.f32 %v8893_v33, %v1287_v16 }
 0x719   : > { %6913 = vmatprep.subr.mxu1 %v3059_v7  ;;  %v1321_v26 = vadd.f32 %v8893_v33, %v1285_v41 }
 0x71a   : > { %6914 = vmatpush3.msra.mxu1 %v3059_v7  ;;  %v1352_v40 = vmax.f32 %v1320_v5, 0.0  ;;  %v11153_v7 = vld [vmem:[#allocation48_spill] sm:$0xff]  ;;  %v1355_v5 = vmax.f32 %v1323_v4, 0.0  ;;  %v9184_v25 = vpop.permute.xlu1 %3652  ;;  %v11157_v4 = vld [vmem:[#allocation53_spill] sm:$0xff] }
 0x71b   : > { %6856 = vmatmul.mubr.msk.f32.gmra.mxu0 %vm404_vm0, %v1348_v59  ;;  %v1288_v59 = vmul.f32 %v11151_v27, %v8885_v12  ;;  %v1353_v34 = vmax.f32 %v1321_v26, 0.0  ;;  %v1292_v27 = vmul.f32 %v11156_v50, %v8885_v12 }
 0x71c   : > { %6858 = vmatprep.mubr.msk.f32.mxu0 %vm404_vm0, %v1349_v52  ;;  %v11152_v52 = vld [vmem:[#allocation49_spill] sm:$0xff]  ;;  %v9182_v26 = vpop.permute.xlu0 %3654 }
 0x71d   : > { %v1289_v13 = vmul.f32 %v8885_v12, %v11152_v52  ;;  %v1324_v41 = vadd.f32 %v8893_v33, %v1288_v59  ;;  %11155 = vst [vmem:[#allocation35_spill] sm:$0xff] %v9182_v26  ;;  %v1293_v52 = vmul.f32 %v8885_v12, %v11157_v4 }
 0x71f   : > { %6859 = vmatmul.mubr.msk.f32.gmra.mxu0 %vm404_vm0, %v1350_v2  ;;  %v1290_v2 = vmul.f32 %v11153_v7, %v8885_v12  ;;  %v1325_v63 = vadd.f32 %v8893_v33, %v1289_v13  ;;  %v1356_v16 = vmax.f32 %v1324_v41, 0.0  ;;  %v1328_v41 = vadd.f32 %v8893_v33, %v1292_v27  ;;  %v11158_v7 = vld [vmem:[#allocation52_spill] sm:$0xff]  ;;  %v11160_v27 = vld [vmem:[#allocation54_spill] sm:$0xff] }
 0x720   : > { %6861 = vmatprep.mubr.msk.f32.mxu0 %vm404_vm0, %v1351_v45  ;;  %v1291_v45 = vmul.f32 %v8885_v12, %v11154_v31  ;;  %v9195_v13 = vpop.permute.xlu0 %3464  ;;  %v1329_v31 = vadd.f32 %v8893_v33, %v1293_v52 }
 0x721   : > { %v1357_v59 = vmax.f32 %v1325_v63, 0.0 }
 0x722   : > { %v1361_v4 = vmax.f32 %v1329_v31, 0.0 }
 0x723   : > { %6862 = vmatmul.mubr.msk.f32.gmra.mxu0 %vm404_vm0, %v1352_v40  ;;  %v1326_v40 = vadd.f32 %v8893_v33, %v1290_v2  ;;  %v1294_v2 = vmul.f32 %v11158_v7, %v8885_v12 }
 0x724   : > { %6864 = vmatprep.mubr.msk.f32.mxu0 %vm404_vm0, %v1353_v34  ;;  %v1327_v34 = vadd.f32 %v8893_v33, %v1291_v45  ;;  %v11159_v45 = vld [vmem:[#allocation55_spill] sm:$0xff]  ;;  %v9214_v52 = vpop.permute.xlu0 %3844 }
 0x725   : > { %v1295_v50 = vmul.f32 %v8885_v12, %v11159_v45  ;;  %11162 = vst [vmem:[#allocation34_spill] sm:$0xff] %v9214_v52 }
 0x726   : > { %v1359_v63 = vmax.f32 %v1327_v34, 0.0  ;;  %v1297_v34 = vmul.f32 %v8885_v12, %v11161_v17 }
 0x727   : > { %6865 = vmatmul.mubr.msk.f32.gmra.mxu0 %vm404_vm0, %v1354_v29  ;;  %v1358_v29 = vmax.f32 %v1326_v40, 0.0  ;;  %v1330_v40 = vadd.f32 %v8893_v33, %v1294_v2  ;;  %v1331_v7 = vadd.f32 %v8893_v33, %v1295_v50  ;;  %v11164_v2 = vld [vmem:[#allocation56_spill] sm:$0xff]  ;;  %v11165_v50 = vld [vmem:[#allocation59_spill] sm:$0xff] }
 0x728   : > { %6867 = vmatprep.mubr.msk.f32.mxu0 %vm404_vm0, %v1355_v5  ;;  %v9201_v5 = vpop.permute.xlu1 %3748  ;;  %v1333_v45 = vadd.f32 %v8893_v33, %v1297_v34  ;;  %v1299_v17 = vmul.f32 %v8885_v12, %v11165_v50 }
 0x729   : > { %v1363_v31 = vmax.f32 %v1331_v7, 0.0 }
 0x72a   : > { %v1365_v7 = vmax.f32 %v1333_v45, 0.0  ;;  %v1335_v34 = vadd.f32 %v8893_v33, %v1299_v17 }
 0x72b   : > { %6868 = vmatmul.mubr.msk.f32.gmra.mxu0 %vm404_vm0, %v1356_v16  ;;  %v1360_v16 = vmax.f32 %v1328_v41, 0.0 }
 0x72c   : > { %6870 = vmatprep.mubr.msk.f32.mxu0 %vm404_vm0, %v1357_v59  ;;  %v1296_v59 = vmul.f32 %v11160_v27, %v8885_v12  ;;  %v9216_v26 = vpop.permute.xlu1 %3750  ;;  %v9227_v27 = vpop.permute.xlu0 %3560  ;;  %v1367_v52 = vmax.f32 %v1335_v34, 0.0 }
 0x72d   : > { %11163 = vst [vmem:[#allocation37_spill] sm:$0xff] %v9216_v26 }
 0x72e   : > { %v1332_v41 = vadd.f32 %v8893_v33, %v1296_v59  ;;  %v11166_v59 = vld [vmem:[#allocation58_spill] sm:$0xff] }
 0x72f   : > { %6871 = vmatmul.mubr.msk.f32.gmra.mxu0 %vm404_vm0, %v1358_v29  ;;  %v1362_v29 = vmax.f32 %v1330_v40, 0.0 }
 0x730   : > { %6873 = vmatprep.mubr.msk.f32.mxu0 %vm404_vm0, %v1359_v63  ;;  %v1298_v63 = vmul.f32 %v11164_v2, %v8885_v12  ;;  %v9233_v26 = vpop.permute.xlu1 %3466  ;;  %v11168_v2 = vld [vmem:[#allocation61_spill] sm:$0xff] }
 0x731   : > { %11167 = vst [vmem:[#allocation36_spill] sm:$0xff] %v9233_v26  ;;  %v1301_v50 = vmul.f32 %v8885_v12, %v11168_v2  ;;  %v9244_v26 = vpop.permute.xlu0 %3562 }
 0x732   : > { %v1334_v40 = vadd.f32 %v8893_v33, %v1298_v63  ;;  %v11169_v63 = vld [vmem:[#allocation60_spill] sm:$0xff] }
 0x733   : > { %6874 = vmatmul.mubr.msk.f32.gmra.mxu0 %vm404_vm0, %v1360_v16  ;;  %v1364_v16 = vmax.f32 %v1332_v41, 0.0 }
 0x734   : > { %6876 = vmatprep.mubr.msk.f32.mxu0 %vm404_vm0, %v1361_v4  ;;  %v1300_v4 = vmul.f32 %v11166_v59, %v8885_v12  ;;  %v1337_v59 = vadd.f32 %v8893_v33, %v1301_v50  ;;  %v9246_v45 = vpop.permute.xlu1 %3846 }
 0x736   : > { %v1336_v41 = vadd.f32 %v8893_v33, %v1300_v4  ;;  %v9252_v4 = vpop.permute.xlu0 %3658 }
 0x737   : > { %6877 = vmatmul.mubr.msk.f32.gmra.mxu0 %vm404_vm0, %v1362_v29  ;;  %v1366_v29 = vmax.f32 %v1334_v40, 0.0  ;;  %v1369_v40 = vmax.f32 %v1337_v59, 0.0  ;;  %11170 = vst [vmem:[#allocation39_spill] sm:$0xff] %v9252_v4 }
 0x738   : > { %6879 = vmatprep.mubr.msk.f32.mxu0 %vm404_vm0, %v1363_v31  ;;  %v1302_v31 = vmul.f32 %v11169_v63, %v8885_v12  ;;  %v1368_v17 = vmax.f32 %v1336_v41, 0.0 }
 0x73a   : > { %v9258_v34 = vpop.permute.xlu0 %3468 }
 0x73b   : > { %6880 = vmatmul.mubr.msk.f32.gmra.mxu0 %vm404_vm0, %v1364_v16  ;;  %v1338_v16 = vadd.f32 %v8893_v33, %v1302_v31 }
 0x73c   : > { %6882 = vmatprep.mubr.msk.f32.mxu0 %vm404_vm0, %v1365_v7  ;;  %v9255_v7 = vpop.permute.xlu1 %3656 }
 0x73d   : > { %v1370_v12 = vmax.f32 %v1338_v16, 0.0 }
 0x73f   : > { %6883 = vmatmul.mubr.msk.f32.gmra.mxu0 %vm404_vm0, %v1366_v29 }
 0x740   : > { %6885 = vmatprep.mubr.msk.f32.mxu0 %vm404_vm0, %v1367_v52  ;;  %v9260_v2 = vpop.permute.xlu1 %3752  ;;  %v9262_v52 = vpop.permute.xlu0 %3848 }
 0x741   : > { %11171 = vst [vmem:[#allocation38_spill] sm:$0xff] %v9262_v52 }
 0x743   : > { %6886 = vmatmul.mubr.msk.f32.gmra.mxu0 %vm404_vm0, %v1368_v17 }
 0x744   : > { %6888 = vmatprep.mubr.msk.f32.mxu0 %vm404_vm0, %v1369_v40  ;;  %v9264_v50 = vpop.permute.xlu1 %3754  ;;  %v9266_v33 = vpop.permute.xlu0 %3564 }
 0x745   : > { %11172 = vst [vmem:[#allocation41_spill] sm:$0xff] %v9264_v50 }
 0x747   : > { %6889 = vmatmul.mubr.msk.f32.gmra.mxu0 %vm404_vm0, %v1370_v12 }
 0x748   : > { %v9268_v29 = vpop.permute.xlu1 %3470  ;;  %v9270_v41 = vpop.permute.xlu0 %3566 }
 0x749   : > { %11173 = vst [vmem:[#allocation40_spill] sm:$0xff] %v9270_v41 }
 0x74c   : > { %v9272_v63 = vpop.permute.xlu1 %3850  ;;  %v9274_v31 = vpop.permute.xlu0 %3662 }
 0x74d   : > { %11174 = vst [vmem:[#allocation43_spill] sm:$0xff] %v9272_v63  ;;  %11175 = vst [vmem:[#allocation42_spill] sm:$0xff] %v9274_v31 }
 0x750   : > { %v9276_v59 = vpop.permute.xlu1 %3660  ;;  %v9278_v17 = vpop.permute.xlu0 %3472 }
 0x751   : > { %11176 = vst [vmem:[#allocation45_spill] sm:$0xff] %v9276_v59  ;;  %11177 = vst [vmem:[#allocation44_spill] sm:$0xff] %v9278_v17 }
 0x754   : > { %v9280_v16 = vpop.permute.xlu1 %3756  ;;  %v9282_v40 = vpop.permute.xlu0 %3852 }
 0x755   : > { %11178 = vst [vmem:[#allocation47_spill] sm:$0xff] %v9280_v16  ;;  %11179 = vst [vmem:[#allocation46_spill] sm:$0xff] %v9282_v40 }
 0x758   : > { %v9284_v12 = vpop.permute.xlu1 %3758  ;;  %v9286_v50 = vpop.permute.xlu0 %3568 }
 0x759   : > { %11180 = vst [vmem:[#allocation49_spill] sm:$0xff] %v9284_v12  ;;  %11181 = vst [vmem:[#allocation48_spill] sm:$0xff] %v9286_v50 }
 0x75c   : > { %v9288_v52 = vpop.permute.xlu1 %3474  ;;  %v9290_v4 = vpop.permute.xlu0 %3570 }
 0x75d   : > { %11182 = vst [vmem:[#allocation51_spill] sm:$0xff] %v9288_v52  ;;  %11183 = vst [vmem:[#allocation50_spill] sm:$0xff] %v9290_v4 }
 0x760   : > { %v9292_v41 = vpop.permute.xlu1 %3854  ;;  %v9294_v63 = vpop.permute.xlu0 %3666 }
 0x761   : > { %11184 = vst [vmem:[#allocation53_spill] sm:$0xff] %v9292_v41  ;;  %11185 = vst [vmem:[#allocation52_spill] sm:$0xff] %v9294_v63 }
 0x764   : > { %v9296_v31 = vpop.permute.xlu1 %3664  ;;  %v9298_v59 = vpop.permute.xlu0 %3476 }
 0x765   : > { %11186 = vst [vmem:[#allocation55_spill] sm:$0xff] %v9296_v31  ;;  %11187 = vst [vmem:[#allocation54_spill] sm:$0xff] %v9298_v59 }
 0x768   : > { %v9300_v17 = vpop.permute.xlu1 %3760  ;;  %v9302_v16 = vpop.permute.xlu0 %3856 }
 0x769   : > { %11188 = vst [vmem:[#allocation57_spill] sm:$0xff] %v9300_v17  ;;  %11189 = vst [vmem:[#allocation56_spill] sm:$0xff] %v9302_v16 }
 0x76c   : > { %v9304_v40 = vpop.permute.xlu1 %3762  ;;  %v9306_v12 = vpop.permute.xlu0 %3572 }
 0x76d   : > { %11190 = vst [vmem:[#allocation59_spill] sm:$0xff] %v9304_v40  ;;  %11191 = vst [vmem:[#allocation58_spill] sm:$0xff] %v9306_v12 }
 0x770   : > { %v9308_v50 = vpop.permute.xlu1 %3478  ;;  %v9310_v52 = vpop.permute.xlu0 %3574 }
 0x771   : > { %11192 = vst [vmem:[#allocation61_spill] sm:$0xff] %v9308_v50  ;;  %11193 = vst [vmem:[#allocation60_spill] sm:$0xff] %v9310_v52 }
 0x774   : > { %v9312_v4 = vpop.permute.xlu1 %3858  ;;  %v9314_v41 = vpop.permute.xlu0 %3670 }
 0x775   : > { %11194 = vst [vmem:[#allocation106_spill] sm:$0xff] %v9312_v4  ;;  %11195 = vst [vmem:[#allocation107_spill] sm:$0xff] %v9314_v41 }
 0x778   : > { %v9316_v63 = vpop.permute.xlu1 %3668  ;;  %v9318_v31 = vpop.permute.xlu0 %3480 }
 0x77c   : > { %v9320_v59 = vpop.permute.xlu1 %3764  ;;  %v9322_v17 = vpop.permute.xlu0 %3860 }
 0x77d   : > { %11196 = vst [vmem:[#allocation108_spill] sm:$0xff] %v9320_v59  ;;  %11197 = vst [vmem:[#allocation109_spill] sm:$0xff] %v9322_v17  ;;  %v3909_v59 = vsel %vm404_vm0, %v8092_v38, %v8560_v1  ;;  %v3908_v17 = vsel %vm404_vm0, %v8088_v44, %v8530_v23  ;;  %v3910_v38 = vsel %vm404_vm0, %v8094_v37, %v8556_v15 }
 0x77e   : > { %v3943_v1 = vsel %vm3940_vm13, %v3910_v38, %v8576_v57  ;;  %v3912_v57 = vsel %vm404_vm0, %v8098_v42, %v8605_v58  ;;  %v11208_v38 = vld [vmem:[#allocation67_spill] sm:$0xff] }
 0x77f   : > { %v3976_v15 = vsel %vm3973_vm15, %v3943_v1, %v8638_v47  ;;  %v11209_v1 = vld [vmem:[#allocation75_spill] sm:$0xff] }
 0x780   : > { %v9324_v16 = vpop.permute.xlu1 %3766  ;;  %v9326_v40 = vpop.permute.xlu0 %3576 }
 0x781   : > { %11198 = vst [vmem:[#allocation110_spill] sm:$0xff] %v9324_v16  ;;  %v3911_v16 = vsel %vm404_vm0, %v8096_v43, %v8613_v62 }
 0x784   : > { %v9328_v12 = vpop.permute.xlu1 %3482  ;;  %v9330_v50 = vpop.permute.xlu0 %3578 }
 0x788   : > { %v9332_v52 = vpop.permute.xlu1 %3862  ;;  %v9334_v4 = vpop.permute.xlu0 %3674 }
 0x789   : > { %11199 = vst [vmem:[#allocation111_spill] sm:$0xff] %v9332_v52  ;;  %v3942_v52 = vsel %vm3940_vm13, %v3909_v59, %v8540_v48  ;;  %v3944_v48 = vsel %vm3940_vm13, %v3911_v16, %v8584_v28 }
 0x78a   : > { %v3975_v37 = vsel %vm3973_vm15, %v3942_v52, %v8546_v9  ;;  %v3945_v9 = vsel %vm3940_vm13, %v3912_v57, %v8631_v3  ;;  %v3977_v47 = vsel %vm3973_vm15, %v3944_v48, %v8596_v24  ;;  %v3915_v3 = vsel %vm404_vm0, %v8108_v10, %v8728_v39  ;;  %v11204_v52 = vld [vmem:[#allocation68_spill] sm:$0xff]  ;;  %v11207_v10 = vld [vmem:[#allocation62_spill] sm:$0xff]  ;;  %v11210_v48 = vld [vmem:[#allocation71_spill] sm:$0xff] }
 0x78b   : > { %v4008_v28 = vsel %vm4006_vm14, %v3975_v37, %v8600_v18  ;;  %v4010_v42 = vsel %vm4006_vm14, %v3977_v47, %v8662_v20  ;;  %v3978_v58 = vsel %vm3973_vm15, %v3945_v9, %v8698_v36  ;;  %v11206_v36 = vld [vmem:[#allocation66_spill] sm:$0xff]  ;;  %v11211_v37 = vld [vmem:[#allocation19_spill] sm:$0xff] }
 0x78c   : > { %v9336_v41 = vpop.permute.xlu1 %3672  ;;  %v9356_v23 = vpop.permute.xlu0 %3484  ;;  %v4041_v62 = vsel %vm4039_vm1, %v4008_v28, %v8626_v11  ;;  %v11201_v11 = vld [vmem:[#allocation63_spill] sm:$0xff]  ;;  %v4011_v20 = vsel %vm4006_vm14, %v3978_v58, %v11204_v52  ;;  %v11214_v47 = vld [vmem:[#allocation70_spill] sm:$0xff] }
 0x78d   : > { %11200 = vst [vmem:[#allocation112_spill] sm:$0xff] %v9336_v41  ;;  %v3941_v41 = vsel %vm3940_vm13, %v3908_v17, %v8570_v6  ;;  %vm4073_vm3 = vcmp.gt.f32.partialorder %v4041_v62, 0.5  ;;  %v11216_v58 = vld [vmem:[#allocation18_spill] sm:$0xff] }
 0x78e   : > { %v3974_v44 = vsel %vm3973_vm15, %v3941_v41, %v8580_v21  ;;  %v3913_v21 = vsel %vm404_vm0, %v8100_v35, %v8675_v0  ;;  %v11203_v0 = vld [vmem:[#allocation65_spill] sm:$0xff] }
 0x78f   : > { %v4007_v43 = vsel %vm4006_vm14, %v3974_v44, %v8590_v51  ;;  %v4009_v51 = vsel %vm4006_vm14, %v3976_v15, %v8649_v61  ;;  %v3946_v18 = vsel %vm3940_vm13, %v3913_v21, %v8645_v14  ;;  %v11202_v61 = vld [vmem:[#allocation26_spill] sm:$0xff]  ;;  %v3948_v44 = vsel %vm3940_vm13, %v3915_v3, %v11208_v38  ;;  %v11212_v21 = vld [vmem:[#allocation77_spill] sm:$0xff]  ;;  %v11222_v38 = vld [vmem:[#allocation79_spill] sm:$0xff] }
 0x790   : > { %v9364_v6 = vpop.permute.xlu1 %3768  ;;  %v4040_v35 = vsel %vm4039_vm1, %v4007_v43, %v8564_v49  ;;  %v3914_v24 = vsel %vm404_vm0, %v11202_v61, %v11201_v11  ;;  %v4043_v49 = vsel %vm4039_vm1, %v4010_v42, %v11203_v0  ;;  %v9404_v41 = vpop.permute.xlu0 %3864  ;;  %v11205_v14 = vld [vmem:[#allocation2_spill] sm:$0xff]  ;;  %v3979_v39 = vsel %vm3973_vm15, %v3946_v18, %v11207_v10  ;;  %v11215_v18 = vld [vmem:[#allocation81_spill] sm:$0xff] }
 0x791   : > { %v4042_v59 = vsel %vm4039_vm1, %v4009_v51, %v11205_v14  ;;  %v3947_v17 = vsel %vm3940_vm13, %v3914_v24, %v11206_v36  ;;  %vm4072_vm2 = vcmp.gt.f32.partialorder %v4040_v35, 0.5  ;;  %vm4075_vm4 = vcmp.gt.f32.partialorder %v4043_v49, 0.5  ;;  %v11213_v51 = vld [vmem:[#allocation64_spill] sm:$0xff]  ;;  %v11217_v61 = vld [vmem:[#allocation74_spill] sm:$0xff]  ;;  %v11218_v0 = vld [vmem:[#allocation73_spill] sm:$0xff] }
 0x792   : > { %v3980_v43 = vsel %vm3973_vm15, %v3947_v17, %v11209_v1  ;;  %v3916_v15 = vsel %vm404_vm0, %v11211_v37, %v11210_v48  ;;  %vm4074_vm5 = vcmp.gt.f32.partialorder %v4042_v59, 0.5  ;;  %v9425_v9 = vsel %vm4039_vm1, %v4011_v20, %v11213_v51  ;;  %v11219_v14 = vld [vmem:[#allocation80_spill] sm:$0xff]  ;;  %v11221_v17 = vld [vmem:[#allocation69_spill] sm:$0xff] }
 0x793   : > { %v4013_v57 = vsel %vm4006_vm14, %v3980_v43, %v11212_v21  ;;  %v4012_v42 = vsel %vm4006_vm14, %v3979_v39, %v11214_v47  ;;  %v3917_v3 = vsel %vm404_vm0, %v11216_v58, %v11215_v18  ;;  %v3949_v24 = vsel %vm3940_vm13, %v3916_v15, %v11217_v61  ;;  %v11220_v36 = vld [vmem:[#allocation16_spill] sm:$0xff]  ;;  %v11225_v47 = vld [vmem:[#allocation83_spill] sm:$0xff]  ;;  %v11236_v49 = vld [vmem:[#allocation93_spill] sm:$0xff] }
 0x794   : > { %v9410_v16 = vpop.permute.xlu1 %3770  ;;  %v4045_v52 = vsel %vm4039_vm1, %v4012_v42, %v11218_v0  ;;  %v3918_v20 = vsel %vm404_vm0, %v11220_v36, %v11219_v14  ;;  %v3981_v10 = vsel %vm3973_vm15, %v3948_v44, %v11221_v17  ;;  %v9443_v43 = vpop.permute.xlu0 %3580  ;;  %v11223_v15 = vld [vmem:[#allocation72_spill] sm:$0xff]  ;;  %v11226_v42 = vld [vmem:[#allocation85_spill] sm:$0xff]  ;;  %v11229_v14 = vld [vmem:[#allocation14_spill] sm:$0xff]  ;;  %vm4076_vm8 = vcmp.gt.f32.partialorder %v9425_v9, 0.5 }
 0x795   : > { %v4014_v1 = vsel %vm4006_vm14, %v3981_v10, %v11222_v38  ;;  %v9450_v21 = vsel %vm4039_vm1, %v4013_v57, %v11223_v15  ;;  %v3982_v18 = vsel %vm3973_vm15, %v3949_v24, %v11226_v42  ;;  %v11228_v57 = vld [vmem:[#allocation91_spill] sm:$0xff]  ;;  %vm4077_vm7 = vcmp.gt.f32.partialorder %v4045_v52, 0.5  ;;  %v11230_v24 = vld [vmem:[#allocation84_spill] sm:$0xff]  ;;  %v11233_v42 = vld [vmem:[#allocation86_spill] sm:$0xff] }
 0x796   : > { %v4047_v44 = vsel %vm4039_vm1, %v4014_v1, %v11225_v47  ;;  %v3919_v36 = vsel %vm404_vm0, %v11229_v14, %v11228_v57  ;;  %v3951_v10 = vsel %vm3940_vm13, %v3918_v20, %v11230_v24  ;;  %v11231_v1 = vld [vmem:[#allocation78_spill] sm:$0xff]  ;;  %vm4078_vm10 = vcmp.gt.f32.partialorder %v9450_v21, 0.5  ;;  %v11237_v14 = vld [vmem:[#allocation96_spill] sm:$0xff]  ;;  %v11247_v52 = vld [vmem:[#allocation31_spill] sm:$0xff] }
 0x797   : > { %vm4079_vm9 = vcmp.gt.f32.partialorder %v4047_v44, 0.5  ;;  %v3952_v20 = vsel %vm3940_vm13, %v3919_v36, %v11233_v42  ;;  %v11256_v44 = vld [vmem:[#allocation30_spill] sm:$0xff]  ;;  %v11259_v21 = vld [vmem:[#allocation21_spill] sm:$0xff] }
 0x798   : > { %v9458_v58 = vpop.permute.xlu1 %3486  ;;  %v9495_v24 = vpop.permute.xlu0 %3582 }
 0x79c   : > { %v9506_v42 = vpop.permute.xlu1 %3866 }
 0x7cb   : > { %v6845_v28 = vpop.f32.mrf.mxu0 }
 0x7cc   : > { %v4105_v11 = vmul.f32 0.25, %v6845_v28  ;;  %v11224_v28 = vld [vmem:[#allocation76_spill] sm:$0xff] }
 0x7cd   : > { %v3269_v39 = vpop.f32.mrf.mxu0  ;;  %v3950_v51 = vsel %vm3940_vm13, %v3917_v3, %v11224_v28  ;;  %v11232_v28 = vld [vmem:[#allocation89_spill] sm:$0xff] }
 0x7ce   : > { %v9446_v48 = vsel %vm4073_vm3, %v4105_v11, -1e+30  ;;  %v4104_v37 = vmul.f32 0.25, %v3269_v39  ;;  %v11227_v11 = vld [vmem:[#allocation87_spill] sm:$0xff]  ;;  %v3983_v15 = vsel %vm3973_vm15, %v3950_v51, %v11231_v1 }
 0x7cf   : > { %v6848_v61 = vpop.f32.mrf.mxu0  ;;  %v4172_v62 = vsel %vm4168_vm6, %v9446_v48, -inf  ;;  %v4015_v0 = vsel %vm4006_vm14, %v3982_v18, %v11227_v11  ;;  %v4016_v47 = vsel %vm4006_vm14, %v3983_v15, %v11232_v28  ;;  %v11234_v18 = vld [vmem:[#allocation95_spill] sm:$0xff]  ;;  %v11235_v11 = vld [vmem:[#allocation82_spill] sm:$0xff] }
 0x7d0   : > { %v9468_v3 = vsel %vm4072_vm2, %v4104_v37, -1e+30  ;;  %v4107_v17 = vmul.f32 0.25, %v6848_v61  ;;  %4173 = vmax.xlane.f32.xlu0 %v4172_v62  ;;  %v3984_v61 = vsel %vm3973_vm15, %v3951_v10, %v11234_v18  ;;  %v9489_v51 = vsel %vm4039_vm1, %v4015_v0, %v11235_v11  ;;  %v11238_v10 = vld [vmem:[#allocation90_spill] sm:$0xff]  ;;  %v11241_v28 = vld [vmem:[#allocation11_spill] sm:$0xff] }
 0x7d1   : > { %v3279_v39 = vpop.f32.mrf.mxu0  ;;  %v4169_v38 = vsel %vm4168_vm6, %v9468_v3, -inf  ;;  %v4049_v57 = vsel %vm4039_vm1, %v4016_v47, %v11236_v49  ;;  %v11240_v15 = vld [vmem:[#allocation98_spill] sm:$0xff]  ;;  %vm4080_vm12 = vcmp.gt.f32.partialorder %v9489_v51, 0.5  ;;  %v11262_v51 = vld [vmem:[#allocation25_spill] sm:$0xff] }
 0x7d2   : > { %v9478_v35 = vsel %vm4075_vm4, %v4107_v17, -1e+30  ;;  %v4106_v37 = vmul.f32 0.25, %v3279_v39  ;;  %4170 = vmax.xlane.f32.xlu1 %v4169_v38  ;;  %v4017_v17 = vsel %vm4006_vm14, %v3984_v61, %v11237_v14  ;;  %v11239_v38 = vld [vmem:[#allocation13_spill] sm:$0xff]  ;;  %v3921_v0 = vsel %vm404_vm0, %v11241_v28, %v11240_v15 }
 0x7d3   : > { %v6851_v62 = vpop.f32.mrf.mxu0  ;;  %v3920_v1 = vsel %vm404_vm0, %v11239_v38, %v11238_v10  ;;  %v4178_v59 = vsel %vm4168_vm6, %v9478_v35, -inf  ;;  %vm4081_vm11 = vcmp.gt.f32.partialorder %v4049_v57, 0.5  ;;  %v11245_v10 = vld [vmem:[#allocation9_spill] sm:$0xff] }
 0x7d4   : > { %v9498_v36 = vsel %vm4074_vm5, %v4106_v37, -1e+30  ;;  %v4109_v39 = vmul.f32 0.25, %v6851_v62  ;;  %v11242_v37 = vld [vmem:[#allocation94_spill] sm:$0xff]  ;;  %v11243_v62 = vld [vmem:[#allocation88_spill] sm:$0xff]  ;;  %v3922_v38 = vsel %vm404_vm0, %v11245_v10, %v8959_v19 }
 0x7d5   : > { %v3289_v47 = vpop.f32.mrf.mxu0  ;;  %v4175_v18 = vsel %vm4168_vm6, %v9498_v36, -inf  ;;  %v3953_v61 = vsel %vm3940_vm13, %v3920_v1, %v11242_v37  ;;  %v3985_v11 = vsel %vm3973_vm15, %v3952_v20, %v11243_v62  ;;  %v11246_v1 = vld [vmem:[#allocation92_spill] sm:$0xff]  ;;  %v11249_v37 = vld [vmem:[#allocation97_spill] sm:$0xff] }
 0x7d6   : > { %v9517_v49 = vsel %vm4077_vm7, %v4109_v39, -1e+30  ;;  %v4108_v14 = vmul.f32 0.25, %v3289_v47  ;;  %4176 = vmax.xlane.f32.xlu0 %v4175_v18  ;;  %4179 = vmax.xlane.f32.xlu1 %v4178_v59  ;;  %v3986_v15 = vsel %vm3973_vm15, %v3953_v61, %v8950_v32  ;;  %v9527_v20 = vsel %vm4039_vm1, %v4017_v17, %v11246_v1  ;;  %v11248_v47 = vld [vmem:[#allocation101_spill] sm:$0xff]  ;;  %v11251_v62 = vld [vmem:[#allocation8_spill] sm:$0xff] }
 0x7d7   : > { %11244 = vst [vmem:[#allocation63_spill] sm:$0xff] %v9517_v49  ;;  %v6854_v28 = vpop.f32.mrf.mxu0  ;;  %v3954_v39 = vsel %vm3940_vm13, %v3921_v0, %v11247_v52  ;;  %v4019_v18 = vsel %vm4006_vm14, %v3986_v15, %v11248_v47  ;;  %v4018_v32 = vsel %vm4006_vm14, %v3985_v11, %v11249_v37  ;;  %v11250_v61 = vld [vmem:[#allocation105_spill] sm:$0xff]  ;;  %v4184_v0 = vsel %vm4168_vm6, %v9517_v49, -inf  ;;  %v11252_v15 = vld [vmem:[#allocation104_spill] sm:$0xff]  ;;  %v9550_v52 = vpop.permute.xlu0 %3678 }
 0x7d8   : > { %v9535_v59 = vsel %vm4076_vm8, %v4108_v14, -1e+30  ;;  %v4111_v19 = vmul.f32 0.25, %v6854_v28  ;;  %v3923_v10 = vsel %vm404_vm0, %v11251_v62, %v11250_v61  ;;  %v3955_v9 = vsel %vm3940_vm13, %v3922_v38, %v11252_v15  ;;  %v11253_v14 = vld [vmem:[#allocation99_spill] sm:$0xff]  ;;  %v11254_v37 = vld [vmem:[#allocation100_spill] sm:$0xff]  ;;  %v9559_v49 = vpop.permute.xlu1 %3676 }
 0x7d9   : > { %v3299_v17 = vpop.f32.mrf.mxu0  ;;  %v4181_v1 = vsel %vm4168_vm6, %v9535_v59, -inf  ;;  %v4051_v28 = vsel %vm4039_vm1, %v4018_v32, %v11253_v14  ;;  %v3987_v61 = vsel %vm3973_vm15, %v3954_v39, %v11254_v37  ;;  %v3988_v62 = vsel %vm3973_vm15, %v3955_v9, %v9077_v60  ;;  %v11255_v32 = vld [vmem:[#allocation102_spill] sm:$0xff]  ;;  %v11258_v14 = vld [vmem:[#allocation103_spill] sm:$0xff] }
 0x7da   : > { %v9553_v11 = vsel %vm4079_vm9, %v4111_v19, -1e+30  ;;  %v4110_v47 = vmul.f32 0.25, %v3299_v17  ;;  %4182 = vmax.xlane.f32.xlu0 %v4181_v1  ;;  %4185 = vmax.xlane.f32.xlu1 %v4184_v0  ;;  %vm4082_vm2 = vcmp.gt.f32.partialorder %v9527_v20, 0.5  ;;  %v9564_v15 = vsel %vm4039_vm1, %v4019_v18, %v11255_v32  ;;  %v11257_v1 = vld [vmem:[#allocation23_spill] sm:$0xff] }
 0x7db   : > { %v6857_v38 = vpop.f32.mrf.mxu0  ;;  %v3956_v19 = vsel %vm3940_vm13, %v3923_v10, %v11256_v44  ;;  %v4021_v17 = vsel %vm4006_vm14, %v3988_v62, %v9100_v8  ;;  %vm4083_vm3 = vcmp.gt.f32.partialorder %v4051_v28, 0.5  ;;  %v3924_v0 = vsel %vm404_vm0, %v11257_v1, %v9096_v46  ;;  %v11261_v44 = vld [vmem:[#allocation32_spill] sm:$0xff] }
 0x7dc   : > { %v9572_v39 = vsel %vm4078_vm10, %v4110_v47, -1e+30  ;;  %v4113_v60 = vmul.f32 0.25, %v6857_v38  ;;  %v4190_v10 = vsel %vm4168_vm6, %v9553_v11, -inf  ;;  %v4020_v8 = vsel %vm4006_vm14, %v3987_v61, %v11258_v14  ;;  %v11260_v38 = vld [vmem:[#allocation33_spill] sm:$0xff] }
 0x7dd   : > { %v3309_v9 = vpop.f32.mrf.mxu0  ;;  %v4187_v18 = vsel %vm4168_vm6, %v9572_v39, -inf  ;;  %v3925_v47 = vsel %vm404_vm0, %v11259_v21, %v9152_v56  ;;  %v3957_v46 = vsel %vm3940_vm13, %v3924_v0, %v9148_v22  ;;  %v4053_v32 = vsel %vm4039_vm1, %v4020_v8, %v11260_v38  ;;  %v9604_v22 = vpop.permute.xlu0 %3488  ;;  %v11263_v21 = vld [vmem:[#allocation36_spill] sm:$0xff] }
 0x7de   : > { %v9587_v37 = vsel %vm4081_vm11, %v4113_v60, -1e+30  ;;  %v4112_v62 = vmul.f32 0.25, %v3309_v9  ;;  %4188 = vmax.xlane.f32.xlu0 %v4187_v18  ;;  %4191 = vmax.xlane.f32.xlu1 %v4190_v10  ;;  %v3989_v1 = vsel %vm3973_vm15, %v3956_v19, %v11261_v44  ;;  %vm4084_vm4 = vcmp.gt.f32.partialorder %v9564_v15, 0.5  ;;  %v11266_v44 = vld [vmem:[#allocation34_spill] sm:$0xff] }
 0x7df   : > { %v6860_v61 = vpop.f32.mrf.mxu0  ;;  %v9598_v56 = vsel %vm4039_vm1, %v4021_v17, %v9118_v53  ;;  %v4022_v57 = vsel %vm4006_vm14, %v3989_v1, %v9129_v55  ;;  %v3990_v60 = vsel %vm3973_vm15, %v3957_v46, %v9184_v25  ;;  %v3958_v9 = vsel %vm3940_vm13, %v3925_v47, %v9163_v54  ;;  %v9614_v17 = vpop.permute.xlu1 %3772  ;;  %v11264_v47 = vld [vmem:[#allocation24_spill] sm:$0xff] }
 0x7e0   : > { %v9608_v0 = vsel %vm4080_vm12, %v4112_v62, -1e+30  ;;  %v4115_v19 = vmul.f32 0.25, %v6860_v61  ;;  %v4023_v53 = vsel %vm4006_vm14, %v3990_v60, %v9201_v5  ;;  %v4196_v25 = vsel %vm4168_vm6, %v9587_v37, -inf }
 0x7e1   : > { %v3319_v18 = vpop.f32.mrf.mxu0  ;;  %v4193_v55 = vsel %vm4168_vm6, %v9608_v0, -inf  ;;  %v3926_v10 = vsel %vm404_vm0, %v11262_v51, %v9195_v13  ;;  %v4055_v14 = vsel %vm4039_vm1, %v4022_v57, %v9169_v30  ;;  %vm4085_vm5 = vcmp.gt.f32.partialorder %v4053_v32, 0.5  ;;  %v11265_v13 = vld [vmem:[#allocation35_spill] sm:$0xff] }
 0x7e2   : > { %v9626_v54 = vsel %vm4083_vm3, %v4115_v19, -1e+30  ;;  %v4114_v5 = vmul.f32 0.25, %v3319_v18  ;;  %4194 = vmax.xlane.f32.xlu0 %v4193_v55  ;;  %4197 = vmax.xlane.f32.xlu1 %v4196_v25  ;;  %v3959_v8 = vsel %vm3940_vm13, %v3926_v10, %v9227_v27  ;;  %v3927_v62 = vsel %vm404_vm0, %v11264_v47, %v11263_v21  ;;  %v11267_v27 = vld [vmem:[#allocation22_spill] sm:$0xff]  ;;  %v11270_v47 = vld [vmem:[#allocation39_spill] sm:$0xff] }
 0x7e3   : > { %v6863_v46 = vpop.f32.mrf.mxu0  ;;  %vm4086_vm7 = vcmp.gt.f32.partialorder %v9598_v56, 0.5  ;;  %v3991_v30 = vsel %vm3973_vm15, %v3958_v9, %v11265_v13  ;;  %v9642_v1 = vsel %vm4039_vm1, %v4023_v53, %v11266_v44  ;;  %vm4087_vm8 = vcmp.gt.f32.partialorder %v4055_v14, 0.5  ;;  %v9655_v53 = vpop.permute.xlu0 %3868  ;;  %v11283_v56 = vld [vmem:[#allocation50_spill] sm:$0xff] }
 0x7e4   : > { %v9638_v28 = vsel %vm4082_vm2, %v4114_v5, -1e+30  ;;  %v4117_v38 = vmul.f32 0.25, %v6863_v46  ;;  %v3928_v61 = vsel %vm404_vm0, %v11267_v27, %v9258_v34  ;;  %v4202_v19 = vsel %vm4168_vm6, %v9626_v54, -inf  ;;  %v11268_v34 = vld [vmem:[#allocation37_spill] sm:$0xff]  ;;  %v9666_v10 = vpop.permute.xlu1 %3774  ;;  %v11269_v5 = vld [vmem:[#allocation20_spill] sm:$0xff] }
 0x7e5   : > { %v3329_v57 = vpop.f32.mrf.mxu0  ;;  %v4199_v60 = vsel %vm4168_vm6, %v9638_v28, -inf  ;;  %v3960_v20 = vsel %vm3940_vm13, %v3927_v62, %v9244_v26  ;;  %v3992_v9 = vsel %vm3973_vm15, %v3959_v8, %v9255_v7  ;;  %v4024_v25 = vsel %vm4006_vm14, %v3991_v30, %v11268_v34  ;;  %v11271_v62 = vld [vmem:[#allocation45_spill] sm:$0xff]  ;;  %v11273_v27 = vld [vmem:[#allocation38_spill] sm:$0xff] }
 0x7e6   : > { %v9658_v18 = vsel %vm4085_vm5, %v4117_v38, -1e+30  ;;  %v4116_v55 = vmul.f32 0.25, %v3329_v57  ;;  %4200 = vmax.xlane.f32.xlu0 %v4199_v60  ;;  %4203 = vmax.xlane.f32.xlu1 %v4202_v19  ;;  %v3961_v51 = vsel %vm3940_vm13, %v3928_v61, %v9266_v33  ;;  %v4025_v26 = vsel %vm4006_vm14, %v3992_v9, %v9260_v2  ;;  %v11272_v38 = vld [vmem:[#allocation47_spill] sm:$0xff]  ;;  %v11274_v57 = vld [vmem:[#allocation41_spill] sm:$0xff]  ;;  %v11275_v19 = vld [vmem:[#allocation40_spill] sm:$0xff] }
 0x7e7   : > { %v6866_v7 = vpop.f32.mrf.mxu0  ;;  %vm4088_vm9 = vcmp.gt.f32.partialorder %v9642_v1, 0.5  ;;  %v4057_v32 = vsel %vm4039_vm1, %v4024_v25, %v9246_v45  ;;  %v3929_v8 = vsel %vm404_vm0, %v11269_v5, %v9268_v29  ;;  %v3993_v2 = vsel %vm3973_vm15, %v3960_v20, %v11270_v47  ;;  %v11276_v9 = vld [vmem:[#allocation51_spill] sm:$0xff]  ;;  %v11278_v25 = vld [vmem:[#allocation44_spill] sm:$0xff] }
 0x7e8   : > { %v9676_v21 = vsel %vm4084_vm4, %v4116_v55, -1e+30  ;;  %v4119_v33 = vmul.f32 0.25, %v6866_v7  ;;  %v3994_v46 = vsel %vm3973_vm15, %v3961_v51, %v11271_v62  ;;  %v4208_v45 = vsel %vm4168_vm6, %v9658_v18, -inf  ;;  %v11277_v55 = vld [vmem:[#allocation15_spill] sm:$0xff]  ;;  %v11279_v51 = vld [vmem:[#allocation17_spill] sm:$0xff] }
 0x7e9   : > { %v3339_v13 = vpop.f32.mrf.mxu0  ;;  %v4205_v30 = vsel %vm4168_vm6, %v9676_v21, -inf  ;;  %v4027_v29 = vsel %vm4006_vm14, %v3994_v46, %v11272_v38  ;;  %v4058_v61 = vsel %vm4039_vm1, %v4025_v26, %v11273_v27  ;;  %vm4089_vm10 = vcmp.gt.f32.partialorder %v4057_v32, 0.5  ;;  %v11280_v5 = vld [vmem:[#allocation43_spill] sm:$0xff]  ;;  %v9705_v26 = vpop.permute.xlu0 %3584  ;;  %v11282_v38 = vld [vmem:[#allocation42_spill] sm:$0xff] }
 0x7ea   : > { %v9689_v15 = vsel %vm4087_vm8, %v4119_v33, -1e+30  ;;  %v4118_v44 = vmul.f32 0.25, %v3339_v13  ;;  %4206 = vmax.xlane.f32.xlu0 %v4205_v30  ;;  %4209 = vmax.xlane.f32.xlu1 %v4208_v45  ;;  %v4026_v60 = vsel %vm4006_vm14, %v3993_v2, %v11274_v57  ;;  %v3962_v20 = vsel %vm3940_vm13, %v3929_v8, %v11275_v19  ;;  %v9711_v8 = vpop.permute.xlu1 %3490  ;;  %v11281_v30 = vld [vmem:[#allocation46_spill] sm:$0xff]  ;;  %v11284_v19 = vld [vmem:[#allocation48_spill] sm:$0xff] }
 0x7eb   : > { %v3931_v34 = vsel %vm404_vm0, %v11277_v55, %v11276_v9  ;;  %v6869_v14 = vpop.f32.mrf.mxu0  ;;  %v3930_v7 = vsel %vm404_vm0, %v11279_v51, %v11278_v25  ;;  %v4059_v33 = vsel %vm4039_vm1, %v4026_v60, %v11280_v5  ;;  %v4214_v13 = vsel %vm4168_vm6, %v9689_v15, -inf  ;;  %v11285_v55 = vld [vmem:[#allocation54_spill] sm:$0xff]  ;;  %v11287_v25 = vld [vmem:[#allocation49_spill] sm:$0xff] }
 0x7ec   : > { %v9709_v47 = vsel %vm4086_vm7, %v4118_v44, -1e+30  ;;  %v4121_v2 = vmul.f32 0.25, %v6869_v14  ;;  %vm4090_vm11 = vcmp.gt.f32.partialorder %v4058_v61, 0.5  ;;  %v4060_v45 = vsel %vm4039_vm1, %v4027_v29, %v11281_v30  ;;  %v11286_v14 = vld [vmem:[#allocation12_spill] sm:$0xff]  ;;  %v11288_v5 = vld [vmem:[#allocation53_spill] sm:$0xff] }
 0x7ed   : > { %v3349_v62 = vpop.f32.mrf.mxu0  ;;  %v4211_v46 = vsel %vm4168_vm6, %v9709_v47, -inf  ;;  %v3995_v27 = vsel %vm3973_vm15, %v3962_v20, %v11282_v38  ;;  %v3964_v44 = vsel %vm3940_vm13, %v3931_v34, %v11283_v56  ;;  %v3963_v9 = vsel %vm3940_vm13, %v3930_v7, %v11284_v19  ;;  %v11292_v19 = vld [vmem:[#allocation55_spill] sm:$0xff] }
 0x7ee   : > { %v9724_v57 = vsel %vm4089_vm10, %v4121_v2, -1e+30  ;;  %v4120_v60 = vmul.f32 0.25, %v3349_v62  ;;  %4212 = vmax.xlane.f32.xlu0 %v4211_v46  ;;  %4215 = vmax.xlane.f32.xlu1 %v4214_v13  ;;  %vm4091_vm12 = vcmp.gt.f32.partialorder %v4059_v33, 0.5  ;;  %v3932_v29 = vsel %vm404_vm0, %v11286_v14, %v11285_v55  ;;  %v11289_v62 = vld [vmem:[#allocation52_spill] sm:$0xff]  ;;  %v11290_v46 = vld [vmem:[#allocation61_spill] sm:$0xff]  ;;  %v3587_v14 = vpop.permute.xlu0 %3586 }
 0x7ef   : > { %v4028_v20 = vsel %vm4006_vm14, %v3995_v27, %v11287_v25  ;;  %v6872_v51 = vpop.f32.mrf.mxu0  ;;  %vm4092_vm2 = vcmp.gt.f32.partialorder %v4060_v45, 0.5  ;;  %v3997_v7 = vsel %vm3973_vm15, %v3964_v44, %v11289_v62  ;;  %v11291_v13 = vld [vmem:[#allocation10_spill] sm:$0xff]  ;;  %v4220_v56 = vsel %vm4168_vm6, %v9724_v57, -inf  ;;  %v11306_v45 = vld [vmem:[#allocation112_spill] sm:$0xff] }
 0x7f0   : > { %v4061_v32 = vsel %vm4039_vm1, %v4028_v20, %v11288_v5  ;;  %v9737_v34 = vsel %vm4088_vm9, %v4120_v60, -1e+30  ;;  %v4123_v2 = vmul.f32 0.25, %v6872_v51  ;;  %v3933_v30 = vsel %vm404_vm0, %v11291_v13, %v11290_v46  ;;  %v11293_v60 = vld [vmem:[#allocation6_spill] sm:$0xff]  ;;  %v11295_v5 = vld [vmem:[#allocation57_spill] sm:$0xff]  ;;  %v11296_v46 = vld [vmem:[#allocation59_spill] sm:$0xff]  ;;  %v9762_v13 = vpop.permute.xlu1 %3870 }
 0x7f1   : > { %v3359_v38 = vpop.f32.mrf.mxu0  ;;  %v4217_v27 = vsel %vm4168_vm6, %v9737_v34, -inf  ;;  %v3996_v1 = vsel %vm3973_vm15, %v3963_v9, %v11292_v19  ;;  %v3935_v55 = vsel %vm404_vm0, %v11293_v60, %v9328_v12  ;;  %v11294_v20 = vld [vmem:[#allocation58_spill] sm:$0xff]  ;;  %vm4093_vm3 = vcmp.gt.f32.partialorder %v4061_v32, 0.5  ;;  %v11297_v19 = vld [vmem:[#allocation60_spill] sm:$0xff]  ;;  %v11299_v32 = vld [vmem:[#allocation7_spill] sm:$0xff] }
 0x7f2   : > { %v9754_v44 = vsel %vm4091_vm12, %v4123_v2, -1e+30  ;;  %v4122_v25 = vmul.f32 0.25, %v3359_v38  ;;  %4218 = vmax.xlane.f32.xlu0 %v4217_v27  ;;  %4221 = vmax.xlane.f32.xlu1 %v4220_v56  ;;  %v3965_v51 = vsel %vm3940_vm13, %v3932_v29, %v11294_v20  ;;  %v4029_v62 = vsel %vm4006_vm14, %v3996_v1, %v11295_v5  ;;  %v11298_v2 = vld [vmem:[#allocation106_spill] sm:$0xff]  ;;  %v11300_v5 = vld [vmem:[#allocation56_spill] sm:$0xff] }
 0x7f3   : > { %v4030_v9 = vsel %vm4006_vm14, %v3997_v7, %v11296_v46  ;;  %v6875_v12 = vpop.f32.mrf.mxu0  ;;  %v3966_v33 = vsel %vm3940_vm13, %v3933_v30, %v11297_v19  ;;  %v3934_v56 = vsel %vm404_vm0, %v11299_v32, %v9318_v31  ;;  %v3968_v7 = vsel %vm3940_vm13, %v3935_v55, %v9330_v50  ;;  %v11301_v55 = vld [vmem:[#allocation108_spill] sm:$0xff] }
 0x7f4   : > { %v4063_v38 = vsel %vm4039_vm1, %v4030_v9, %v11298_v2  ;;  %v9769_v27 = vsel %vm4090_vm11, %v4122_v25, -1e+30  ;;  %v4125_v29 = vmul.f32 0.25, %v6875_v12  ;;  %v4226_v30 = vsel %vm4168_vm6, %v9754_v44, -inf  ;;  %v11302_v9 = vld [vmem:[#allocation107_spill] sm:$0xff] }
 0x7f5   : > { %v3369_v1 = vpop.f32.mrf.mxu0  ;;  %v4223_v60 = vsel %vm4168_vm6, %v9769_v27, -inf  ;;  %v3998_v61 = vsel %vm3973_vm15, %v3965_v51, %v9316_v63  ;;  %v4062_v31 = vsel %vm4039_vm1, %v4029_v62, %v11300_v5  ;;  %v3967_v50 = vsel %vm3940_vm13, %v3934_v56, %v9326_v40  ;;  %v11303_v63 = vld [vmem:[#allocation110_spill] sm:$0xff]  ;;  %v11304_v40 = vld [vmem:[#allocation111_spill] sm:$0xff] }
 0x7f6   : > { %v9782_v25 = vsel %vm4093_vm3, %v4125_v29, -1e+30  ;;  %v4124_v20 = vmul.f32 0.25, %v3369_v1  ;;  %4224 = vmax.xlane.f32.xlu0 %v4223_v60  ;;  %4227 = vmax.xlane.f32.xlu1 %v4226_v30  ;;  %vm4095_vm4 = vcmp.gt.f32.partialorder %v4063_v38, 0.5  ;;  %v4031_v46 = vsel %vm4006_vm14, %v3998_v61, %v11301_v55  ;;  %v3683_v29 = vpop.permute.xlu0 %3682  ;;  %v11305_v1 = vld [vmem:[#allocation4_spill] sm:$0xff] }
 0x7f7   : > { %v3999_v12 = vsel %vm3973_vm15, %v3966_v33, %v11302_v9  ;;  %v6878_v19 = vpop.f32.mrf.mxu0  ;;  %v4001_v2 = vsel %vm3973_vm15, %v3968_v7, %v9334_v4  ;;  %v3937_v60 = vsel %vm404_vm0, %v11305_v1, %v9458_v58  ;;  %v9804_v33 = vpop.permute.xlu1 %3680  ;;  %v4232_v4 = vsel %vm4168_vm6, %v9782_v25, -inf }
 0x7f8   : > { %v4032_v51 = vsel %vm4006_vm14, %v3999_v12, %v11303_v63  ;;  %v9797_v62 = vsel %vm4092_vm2, %v4124_v20, -1e+30  ;;  %v4127_v32 = vmul.f32 0.25, %v6878_v19  ;;  %v4000_v7 = vsel %vm3973_vm15, %v3967_v50, %v11306_v45  ;;  %v11307_v20 = vld [vmem:[#allocation29_spill] sm:$0xff] }
 0x7f9   : > { %v4065_v56 = vsel %vm4039_vm1, %v4032_v51, %v11304_v40  ;;  %v3379_v30 = vpop.f32.mrf.mxu0  ;;  %v4229_v61 = vsel %vm4168_vm6, %v9797_v62, -inf  ;;  %v3939_v5 = vsel %vm404_vm0, %v11307_v20, %v9711_v8  ;;  %v4033_v9 = vsel %vm4006_vm14, %v4000_v7, %v9364_v6  ;;  %v11308_v63 = vld [vmem:[#allocation109_spill] sm:$0xff] }
 0x7fa   : > { %v9816_v55 = vsel %vm4095_vm4, %v4127_v32, -1e+30  ;;  %v4126_v58 = vmul.f32 0.25, %v3379_v30  ;;  %4230 = vmax.xlane.f32.xlu0 %v4229_v61  ;;  %4233 = vmax.xlane.f32.xlu1 %v4232_v4  ;;  %v4034_v12 = vsel %vm4006_vm14, %v4001_v2, %v9410_v16  ;;  %vm4094_vm5 = vcmp.gt.f32.partialorder %v4062_v31, 0.5  ;;  %v3779_v2 = vpop.permute.xlu0 %3778 }
 0x7fb   : > { %v6881_v19 = vpop.f32.mrf.mxu0  ;;  %v4064_v50 = vsel %vm4039_vm1, %v4031_v46, %v11308_v63  ;;  %v3970_v8 = vsel %vm3940_vm13, %v3937_v60, %v9495_v24  ;;  %v4067_v38 = vsel %vm4039_vm1, %v4034_v12, %v9506_v42  ;;  %vm4097_vm7 = vcmp.gt.f32.partialorder %v4065_v56, 0.5  ;;  %v11309_v46 = vld [vmem:[#allocation5_spill] sm:$0xff]  ;;  %v3777_v60 = vpop.permute.xlu1 %3776 }
 0x7fc   : > { %v9828_v51 = vsel %vm4094_vm5, %v4126_v58, -1e+30  ;;  %v4129_v32 = vmul.f32 0.25, %v6881_v19  ;;  %v3972_v6 = vsel %vm3940_vm13, %v3939_v5, %v3587_v14  ;;  %v4238_v31 = vsel %vm4168_vm6, %v9816_v55, -inf }
 0x7fd   : > { %v3389_v40 = vpop.f32.mrf.mxu0  ;;  %v4235_v16 = vsel %vm4168_vm6, %v9828_v51, -inf  ;;  %v3936_v24 = vsel %vm404_vm0, %v11309_v46, %v9356_v23  ;;  %vm4096_vm8 = vcmp.gt.f32.partialorder %v4064_v50, 0.5  ;;  %vm4099_vm9 = vcmp.gt.f32.partialorder %v4067_v38, 0.5 }
 0x7fe   : > { %v9838_v1 = vsel %vm4097_vm7, %v4129_v32, -1e+30  ;;  %v4128_v42 = vmul.f32 0.25, %v3389_v40  ;;  %4236 = vmax.xlane.f32.xlu0 %v4235_v16  ;;  %4239 = vmax.xlane.f32.xlu1 %v4238_v31  ;;  %v3969_v14 = vsel %vm3940_vm13, %v3936_v24, %v9443_v43  ;;  %v4003_v56 = vsel %vm3973_vm15, %v3970_v8, %v9550_v52  ;;  %v3875_v19 = vpop.permute.xlu0 %3874 }
 0x7ff   : > { %v6884_v30 = vpop.f32.mrf.mxu0  ;;  %v4066_v61 = vsel %vm4039_vm1, %v4033_v9, %v9404_v41  ;;  %v4002_v23 = vsel %vm3973_vm15, %v3969_v14, %v9559_v49  ;;  %v4005_v4 = vsel %vm3973_vm15, %v3972_v6, %v3683_v29  ;;  %v4036_v20 = vsel %vm4006_vm14, %v4003_v56, %v9666_v10  ;;  %v11310_v10 = vld [vmem:[#allocation28_spill] sm:$0xff]  ;;  %v3873_v38 = vpop.permute.xlu1 %3872 }
 0x800   : > { %v9849_v45 = vsel %vm4096_vm8, %v4128_v42, -1e+30  ;;  %v4131_v7 = vmul.f32 0.25, %v6884_v30  ;;  %v4035_v43 = vsel %vm4006_vm14, %v4002_v23, %v9614_v17  ;;  %v4244_v41 = vsel %vm4168_vm6, %v9838_v1, -inf }
 0x801   : > { %v3399_v52 = vpop.f32.mrf.mxu0  ;;  %v4241_v5 = vsel %vm4168_vm6, %v9849_v45, -inf  ;;  %v4069_v49 = vsel %vm4039_vm1, %v4036_v20, %v9762_v13  ;;  %vm4098_vm10 = vcmp.gt.f32.partialorder %v4066_v61, 0.5  ;;  %v4038_v9 = vsel %vm4006_vm14, %v4005_v4, %v3779_v2 }
 0x802   : > { %v9861_v29 = vsel %vm4099_vm9, %v4131_v7, -1e+30  ;;  %v4130_v58 = vmul.f32 0.25, %v3399_v52  ;;  %4242 = vmax.xlane.f32.xlu0 %v4241_v5  ;;  %4245 = vmax.xlane.f32.xlu1 %v4244_v41  ;;  %v3938_v12 = vsel %vm404_vm0, %v11310_v10, %v9604_v22  ;;  %v4068_v13 = vsel %vm4039_vm1, %v4035_v43, %v9655_v53 }
 0x803   : > { %v6887_v17 = vpop.f32.mrf.mxu0  ;;  %v3971_v8 = vsel %vm3940_vm13, %v3938_v12, %v9705_v26  ;;  %vm4101_vm11 = vcmp.gt.f32.partialorder %v4069_v49, 0.5  ;;  %v4250_v40 = vsel %vm4168_vm6, %v9861_v29, -inf  ;;  %v4071_v53 = vsel %vm4039_vm1, %v4038_v9, %v3875_v19 }
 0x804   : > { %v9867_v63 = vsel %vm4098_vm10, %v4130_v58, -1e+30  ;;  %v4133_v50 = vmul.f32 0.25, %v6887_v17  ;;  %v4004_v22 = vsel %vm3973_vm15, %v3971_v8, %v9804_v33  ;;  %vm4100_vm12 = vcmp.gt.f32.partialorder %v4068_v13, 0.5  ;;  %v11311_v13 = vld [vmem:[#allocation63_spill] sm:$0xff] }
 0x805   : > { %v3409_v32 = vpop.f32.mrf.mxu0  ;;  %v4247_v6 = vsel %vm4168_vm6, %v9867_v63, -inf  ;;  %v4037_v26 = vsel %vm4006_vm14, %v4004_v22, %v3777_v60  ;;  %vm4103_vm2 = vcmp.gt.f32.partialorder %v4071_v53, 0.5  ;;  %vm5239_vm15 = vcmask 7168  }
 0x806   : > { %v9879_v16 = vsel %vm4101_vm11, %v4133_v50, -1e+30  ;;  %v4132_v31 = vmul.f32 0.25, %v3409_v32  ;;  %4248 = vmax.xlane.f32.xlu0 %v4247_v6  ;;  %4251 = vmax.xlane.f32.xlu1 %v4250_v40  ;;  %v4070_v24 = vsel %vm4039_vm1, %v4037_v26, %v3873_v38  ;;  %vm5190_vm1 = vcmask 121856  }
 0x807   : > { %v6890_v46 = vpop.f32.mrf.mxu0  ;;  %v4256_v56 = vsel %vm4168_vm6, %v9879_v16, -inf  ;;  %vm4102_vm14 = vcmp.gt.f32.partialorder %v4070_v24, 0.5  ;;  %vm5109_vm3 = vcmask 138240   ;;  %vm5362_vm4 = vcmask 916480  }
 0x808   : > { %v9884_v2 = vsel %vm4100_vm12, %v4132_v31, -1e+30  ;;  %v4135_v42 = vmul.f32 0.25, %v6890_v46  ;;  %vm5321_vm5 = vcmask 924672   ;;  %vm5280_vm7 = vcmask 1039360  }
 0x809   : > { %v3419_v14 = vpop.f32.mrf.mxu0  ;;  %v4253_v33 = vsel %vm4168_vm6, %v9884_v2, -inf  ;;  %vm5395_vm8 = vcmask 908288   ;;  %vm5442_vm9 = vcmask 211968  }
 0x80a   : > { %v9890_v30 = vsel %vm4103_vm2, %v4135_v42, -1e+30  ;;  %v4134_v61 = vmul.f32 0.25, %v3419_v14  ;;  %4254 = vmax.xlane.f32.xlu0 %v4253_v33  ;;  %4257 = vmax.xlane.f32.xlu1 %v4256_v56 }
 0x80b   : > { %v4262_v23 = vsel %vm4168_vm6, %v9890_v30, -inf }
 0x80c   : > { %v9892_v60 = vsel %vm4102_vm14, %v4134_v61, -1e+30 }
 0x80d   : > { %v4259_v4 = vsel %vm4168_vm6, %v9892_v60, -inf }
 0x80e   : > { %4263 = vmax.xlane.f32.xlu1 %v4262_v23  ;;  %4260 = vmax.xlane.f32.xlu0 %v4259_v4 }
 0x859   : > { %v4174_v7 = vpop.xlane.xlu0 %4173 }
 0x85a   : > { %v4266_v43 = vsub.f32 %v9446_v48, %v4174_v7 }
 0x85b   : > { %v4171_v20 = vpop.xlane.xlu1 %4170 }
 0x85c   : > { %v4299_v52 = vmul.f32 1.442695, %v4266_v43  ;;  %v4265_v5 = vsub.f32 %v9468_v3, %v4171_v20 }
 0x85e   : > { %7092 = vpow2.f32 %v4299_v52  ;;  %v4297_v41 = vmul.f32 1.442695, %v4265_v5 }
 0x85f   : > { %v4177_v49 = vpop.xlane.xlu0 %4176  ;;  %v4180_v58 = vpop.xlane.xlu1 %4179 }
 0x860   : > { %7094 = vpow2.f32 %v4297_v41  ;;  %v4267_v17 = vsub.f32 %v9498_v36, %v4177_v49  ;;  %v4268_v9 = vsub.f32 %v9478_v35, %v4180_v58 }
 0x862   : > { %v4301_v10 = vmul.f32 1.442695, %v4267_v17  ;;  %v4303_v12 = vmul.f32 1.442695, %v4268_v9 }
 0x863   : > { %v4183_v19 = vpop.xlane.xlu0 %4182  ;;  %v4186_v50 = vpop.xlane.xlu1 %4185 }
 0x864   : > { %7096 = vpow2.f32 %v4301_v10  ;;  %v4269_v48 = vsub.f32 %v9535_v59, %v4183_v19  ;;  %v4270_v8 = vsub.f32 %v11311_v13, %v4186_v50 }
 0x865   : > { %7098 = vpow2.f32 %v4303_v12 }
 0x866   : > { %v4305_v3 = vmul.f32 1.442695, %v4269_v48  ;;  %v4307_v38 = vmul.f32 1.442695, %v4270_v8 }
 0x867   : > { %v4189_v32 = vpop.xlane.xlu0 %4188  ;;  %v4192_v6 = vpop.xlane.xlu1 %4191 }
 0x868   : > { %7100 = vpow2.f32 %v4305_v3  ;;  %v4271_v40 = vsub.f32 %v9572_v39, %v4189_v32  ;;  %v4272_v36 = vsub.f32 %v9553_v11, %v4192_v6 }
 0x869   : > { %7102 = vpow2.f32 %v4307_v38 }
 0x86a   : > { %v4309_v35 = vmul.f32 1.442695, %v4271_v40  ;;  %v4311_v22 = vmul.f32 1.442695, %v4272_v36 }
 0x86b   : > { %v9906_v31 = vpop.eup %7092  ;;  %v4195_v53 = vpop.xlane.xlu0 %4194 }
 0x86c   : > { %v4198_v26 = vpop.xlane.xlu1 %4197  ;;  %7104 = vpow2.f32 %v4309_v35  ;;  %v4273_v59 = vsub.f32 %v9608_v0, %v4195_v53  ;;  %v4364_v24 = vsel %vm4168_vm6, %v9906_v31, 0.0 }
 0x86d   : > { %v4274_v46 = vsub.f32 %v9587_v37, %v4198_v26  ;;  %v9912_v42 = vpop.eup %7094  ;;  %7106 = vpow2.f32 %v4311_v22  ;;  %4365 = vadd.xlane.f32.xlu1 %v4364_v24 }
 0x86e   : > { %v4313_v11 = vmul.f32 1.442695, %v4273_v59  ;;  %v4361_v14 = vsel %vm4168_vm6, %v9912_v42, 0.0 }
 0x86f   : > { %v4315_v39 = vmul.f32 1.442695, %v4274_v46  ;;  %v4201_v33 = vpop.xlane.xlu0 %4200  ;;  %4362 = vadd.xlane.f32.xlu0 %v4361_v14 }
 0x870   : > { %v4204_v56 = vpop.xlane.xlu1 %4203  ;;  %7108 = vpow2.f32 %v4313_v11  ;;  %v4275_v0 = vsub.f32 %v9638_v28, %v4201_v33 }
 0x871   : > { %v4276_v37 = vsub.f32 %v9626_v54, %v4204_v56  ;;  %v9918_v61 = vpop.eup %7096  ;;  %7110 = vpow2.f32 %v4315_v39 }
 0x872   : > { %v9920_v23 = vpop.eup %7098  ;;  %v4317_v4 = vmul.f32 1.442695, %v4275_v0  ;;  %v4367_v43 = vsel %vm4168_vm6, %v9918_v61, 0.0 }
 0x873   : > { %v4319_v7 = vmul.f32 1.442695, %v4276_v37  ;;  %v4207_v20 = vpop.xlane.xlu0 %4206  ;;  %4368 = vadd.xlane.f32.xlu0 %v4367_v43  ;;  %v4370_v52 = vsel %vm4168_vm6, %v9920_v23, 0.0 }
 0x874   : > { %v4210_v5 = vpop.xlane.xlu1 %4209  ;;  %7112 = vpow2.f32 %v4317_v4  ;;  %v4277_v28 = vsub.f32 %v9676_v21, %v4207_v20  ;;  %4371 = vadd.xlane.f32.xlu1 %v4370_v52 }
 0x875   : > { %v4278_v54 = vsub.f32 %v9658_v18, %v4210_v5  ;;  %v9928_v41 = vpop.eup %7100  ;;  %7114 = vpow2.f32 %v4319_v7 }
 0x876   : > { %v9930_v49 = vpop.eup %7102  ;;  %v4321_v58 = vmul.f32 1.442695, %v4277_v28  ;;  %v4373_v9 = vsel %vm4168_vm6, %v9928_v41, 0.0 }
 0x877   : > { %v4323_v17 = vmul.f32 1.442695, %v4278_v54  ;;  %v4213_v10 = vpop.xlane.xlu0 %4212  ;;  %4374 = vadd.xlane.f32.xlu0 %v4373_v9  ;;  %v4376_v12 = vsel %vm4168_vm6, %v9930_v49, 0.0 }
 0x878   : > { %v4216_v19 = vpop.xlane.xlu1 %4215  ;;  %7116 = vpow2.f32 %v4321_v58  ;;  %v4279_v21 = vsub.f32 %v9709_v47, %v4213_v10  ;;  %4377 = vadd.xlane.f32.xlu1 %v4376_v12 }
 0x879   : > { %v4280_v18 = vsub.f32 %v9689_v15, %v4216_v19  ;;  %v9938_v50 = vpop.eup %7104  ;;  %7118 = vpow2.f32 %v4323_v17 }
 0x87a   : > { %v9940_v48 = vpop.eup %7106  ;;  %v4325_v13 = vmul.f32 1.442695, %v4279_v21  ;;  %v4379_v3 = vsel %vm4168_vm6, %v9938_v50, 0.0 }
 0x87b   : > { %v4327_v8 = vmul.f32 1.442695, %v4280_v18  ;;  %v4219_v38 = vpop.xlane.xlu0 %4218  ;;  %4380 = vadd.xlane.f32.xlu0 %v4379_v3  ;;  %v4382_v32 = vsel %vm4168_vm6, %v9940_v48, 0.0 }
 0x87c   : > { %v4222_v6 = vpop.xlane.xlu1 %4221  ;;  %7120 = vpow2.f32 %v4325_v13  ;;  %v4281_v47 = vsub.f32 %v9737_v34, %v4219_v38  ;;  %4383 = vadd.xlane.f32.xlu1 %v4382_v32 }
 0x87d   : > { %v4282_v15 = vsub.f32 %v9724_v57, %v4222_v6  ;;  %v9948_v40 = vpop.eup %7108  ;;  %7122 = vpow2.f32 %v4327_v8 }
 0x87e   : > { %v9950_v36 = vpop.eup %7110  ;;  %v4329_v35 = vmul.f32 1.442695, %v4281_v47  ;;  %v4385_v53 = vsel %vm4168_vm6, %v9948_v40, 0.0 }
 0x87f   : > { %v4331_v22 = vmul.f32 1.442695, %v4282_v15  ;;  %v4225_v26 = vpop.xlane.xlu0 %4224  ;;  %4386 = vadd.xlane.f32.xlu0 %v4385_v53  ;;  %v4388_v59 = vsel %vm4168_vm6, %v9950_v36, 0.0 }
 0x880   : > { %v4228_v46 = vpop.xlane.xlu1 %4227  ;;  %7124 = vpow2.f32 %v4329_v35  ;;  %v4283_v34 = vsub.f32 %v9769_v27, %v4225_v26  ;;  %4389 = vadd.xlane.f32.xlu1 %v4388_v59 }
 0x881   : > { %v4284_v57 = vsub.f32 %v9754_v44, %v4228_v46  ;;  %v9958_v24 = vpop.eup %7112  ;;  %7126 = vpow2.f32 %v4331_v22 }
 0x882   : > { %v9960_v11 = vpop.eup %7114  ;;  %v4333_v39 = vmul.f32 1.442695, %v4283_v34  ;;  %v4391_v33 = vsel %vm4168_vm6, %v9958_v24, 0.0 }
 0x883   : > { %v4335_v14 = vmul.f32 1.442695, %v4284_v57  ;;  %v4231_v56 = vpop.xlane.xlu0 %4230  ;;  %4392 = vadd.xlane.f32.xlu0 %v4391_v33  ;;  %v4394_v0 = vsel %vm4168_vm6, %v9960_v11, 0.0 }
 0x884   : > { %v4234_v37 = vpop.xlane.xlu1 %4233  ;;  %7128 = vpow2.f32 %v4333_v39  ;;  %v4285_v27 = vsub.f32 %v9797_v62, %v4231_v56  ;;  %4395 = vadd.xlane.f32.xlu1 %v4394_v0 }
 0x885   : > { %v4286_v44 = vsub.f32 %v9782_v25, %v4234_v37  ;;  %v9968_v4 = vpop.eup %7116  ;;  %7130 = vpow2.f32 %v4335_v14 }
 0x886   : > { %v9970_v7 = vpop.eup %7118  ;;  %v4337_v43 = vmul.f32 1.442695, %v4285_v27  ;;  %v4397_v52 = vsel %vm4168_vm6, %v9968_v4, 0.0 }
 0x887   : > { %v4339_v20 = vmul.f32 1.442695, %v4286_v44  ;;  %v4237_v5 = vpop.xlane.xlu0 %4236  ;;  %4398 = vadd.xlane.f32.xlu0 %v4397_v52  ;;  %v4400_v28 = vsel %vm4168_vm6, %v9970_v7, 0.0 }
 0x888   : > { %v4240_v54 = vpop.xlane.xlu1 %4239  ;;  %7132 = vpow2.f32 %v4337_v43  ;;  %v4287_v62 = vsub.f32 %v9828_v51, %v4237_v5  ;;  %4401 = vadd.xlane.f32.xlu1 %v4400_v28 }
 0x889   : > { %v4288_v25 = vsub.f32 %v9816_v55, %v4240_v54  ;;  %v9978_v58 = vpop.eup %7120  ;;  %7134 = vpow2.f32 %v4339_v20 }
 0x88a   : > { %v9980_v17 = vpop.eup %7122  ;;  %v4341_v9 = vmul.f32 1.442695, %v4287_v62  ;;  %v4403_v12 = vsel %vm4168_vm6, %v9978_v58, 0.0 }
 0x88b   : > { %v4343_v10 = vmul.f32 1.442695, %v4288_v25  ;;  %v4243_v19 = vpop.xlane.xlu0 %4242  ;;  %4404 = vadd.xlane.f32.xlu0 %v4403_v12  ;;  %v4406_v21 = vsel %vm4168_vm6, %v9980_v17, 0.0 }
 0x88c   : > { %v4246_v18 = vpop.xlane.xlu1 %4245  ;;  %7136 = vpow2.f32 %v4341_v9  ;;  %v4289_v51 = vsub.f32 %v9849_v45, %v4243_v19  ;;  %4407 = vadd.xlane.f32.xlu1 %v4406_v21 }
 0x88d   : > { %v4290_v55 = vsub.f32 %v9838_v1, %v4246_v18  ;;  %v9988_v13 = vpop.eup %7124  ;;  %7138 = vpow2.f32 %v4343_v10 }
 0x88e   : > { %v9990_v8 = vpop.eup %7126  ;;  %v4345_v3 = vmul.f32 1.442695, %v4289_v51  ;;  %v4409_v32 = vsel %vm4168_vm6, %v9988_v13, 0.0 }
 0x88f   : > { %v4347_v38 = vmul.f32 1.442695, %v4290_v55  ;;  %v4249_v6 = vpop.xlane.xlu0 %4248  ;;  %4410 = vadd.xlane.f32.xlu0 %v4409_v32  ;;  %v4412_v47 = vsel %vm4168_vm6, %v9990_v8, 0.0 }
 0x890   : > { %v4252_v15 = vpop.xlane.xlu1 %4251  ;;  %7140 = vpow2.f32 %v4345_v3  ;;  %v4291_v45 = vsub.f32 %v9867_v63, %v4249_v6  ;;  %4413 = vadd.xlane.f32.xlu1 %v4412_v47 }
 0x891   : > { %v4292_v1 = vsub.f32 %v9861_v29, %v4252_v15  ;;  %v9998_v35 = vpop.eup %7128  ;;  %7142 = vpow2.f32 %v4347_v38 }
 0x892   : > { %v10000_v22 = vpop.eup %7130  ;;  %v4349_v53 = vmul.f32 1.442695, %v4291_v45  ;;  %v4415_v59 = vsel %vm4168_vm6, %v9998_v35, 0.0 }
 0x893   : > { %v4351_v26 = vmul.f32 1.442695, %v4292_v1  ;;  %v4255_v46 = vpop.xlane.xlu0 %4254  ;;  %4416 = vadd.xlane.f32.xlu0 %v4415_v59  ;;  %v4418_v34 = vsel %vm4168_vm6, %v10000_v22, 0.0 }
 0x894   : > { %v4258_v57 = vpop.xlane.xlu1 %4257  ;;  %7144 = vpow2.f32 %v4349_v53  ;;  %v4293_v63 = vsub.f32 %v9884_v2, %v4255_v46  ;;  %4419 = vadd.xlane.f32.xlu1 %v4418_v34 }
 0x895   : > { %v4294_v29 = vsub.f32 %v9879_v16, %v4258_v57  ;;  %v10008_v39 = vpop.eup %7132  ;;  %7146 = vpow2.f32 %v4351_v26 }
 0x896   : > { %v10010_v14 = vpop.eup %7134  ;;  %v4353_v33 = vmul.f32 1.442695, %v4293_v63  ;;  %v4421_v0 = vsel %vm4168_vm6, %v10008_v39, 0.0 }
 0x897   : > { %v4355_v56 = vmul.f32 1.442695, %v4294_v29  ;;  %v4261_v37 = vpop.xlane.xlu0 %4260  ;;  %4422 = vadd.xlane.f32.xlu0 %v4421_v0  ;;  %v4424_v27 = vsel %vm4168_vm6, %v10010_v14, 0.0 }
 0x898   : > { %v4264_v44 = vpop.xlane.xlu1 %4263  ;;  %7148 = vpow2.f32 %v4353_v33  ;;  %v4295_v2 = vsub.f32 %v9892_v60, %v4261_v37  ;;  %4425 = vadd.xlane.f32.xlu1 %v4424_v27 }
 0x899   : > { %v4296_v16 = vsub.f32 %v9890_v30, %v4264_v44  ;;  %v10018_v43 = vpop.eup %7136  ;;  %7150 = vpow2.f32 %v4355_v56 }
 0x89a   : > { %v10020_v20 = vpop.eup %7138  ;;  %v4357_v52 = vmul.f32 1.442695, %v4295_v2  ;;  %v4427_v28 = vsel %vm4168_vm6, %v10018_v43, 0.0 }
 0x89b   : > { %v4359_v5 = vmul.f32 1.442695, %v4296_v16  ;;  %4428 = vadd.xlane.f32.xlu0 %v4427_v28  ;;  %v4430_v54 = vsel %vm4168_vm6, %v10020_v20, 0.0 }
 0x89c   : > { %7152 = vpow2.f32 %v4357_v52  ;;  %4431 = vadd.xlane.f32.xlu1 %v4430_v54 }
 0x89d   : > { %v10026_v60 = vpop.eup %7140  ;;  %7154 = vpow2.f32 %v4359_v5 }
 0x89e   : > { %v10028_v30 = vpop.eup %7142  ;;  %v4433_v62 = vsel %vm4168_vm6, %v10026_v60, 0.0 }
 0x89f   : > { %4434 = vadd.xlane.f32.xlu0 %v4433_v62  ;;  %v4436_v25 = vsel %vm4168_vm6, %v10028_v30, 0.0 }
 0x8a0   : > { %4437 = vadd.xlane.f32.xlu1 %v4436_v25 }
 0x8a1   : > { %v10034_v9 = vpop.eup %7144 }
 0x8a2   : > { %v10036_v10 = vpop.eup %7146  ;;  %v4439_v12 = vsel %vm4168_vm6, %v10034_v9, 0.0 }
 0x8a3   : > { %4440 = vadd.xlane.f32.xlu0 %v4439_v12  ;;  %v4442_v19 = vsel %vm4168_vm6, %v10036_v10, 0.0 }
 0x8a4   : > { %4443 = vadd.xlane.f32.xlu1 %v4442_v19 }
 0x8a5   : > { %v10042_v21 = vpop.eup %7148 }
 0x8a6   : > { %v10044_v18 = vpop.eup %7150  ;;  %v4445_v51 = vsel %vm4168_vm6, %v10042_v21, 0.0 }
 0x8a7   : > { %4446 = vadd.xlane.f32.xlu0 %v4445_v51  ;;  %v4448_v55 = vsel %vm4168_vm6, %v10044_v18, 0.0 }
 0x8a8   : > { %4449 = vadd.xlane.f32.xlu1 %v4448_v55 }
 0x8a9   : > { %v10050_v3 = vpop.eup %7152 }
 0x8aa   : > { %v10052_v38 = vpop.eup %7154  ;;  %v4451_v32 = vsel %vm4168_vm6, %v10050_v3, 0.0 }
 0x8ab   : > { %4452 = vadd.xlane.f32.xlu0 %v4451_v32  ;;  %v4454_v6 = vsel %vm4168_vm6, %v10052_v38, 0.0 }
 0x8ac   : > { %4455 = vadd.xlane.f32.xlu1 %v4454_v6 }
 0x8f6   : > { %v4366_v47 = vpop.xlane.xlu1 %4365 }
 0x8f7   : > { %7156 = vrcp.f32 %v4366_v47 }
 0x8f8   : > { %v4363_v15 = vpop.xlane.xlu0 %4362 }
 0x8f9   : > { %7158 = vrcp.f32 %v4363_v15 }
 0x8fc   : > { %v4369_v45 = vpop.xlane.xlu0 %4368 }
 0x8fd   : > { %7160 = vrcp.f32 %v4369_v45  ;;  %v4372_v1 = vpop.xlane.xlu1 %4371 }
 0x8fe   : > { %7162 = vrcp.f32 %v4372_v1 }
 0x900   : > { %v4375_v53 = vpop.xlane.xlu0 %4374 }
 0x901   : > { %7164 = vrcp.f32 %v4375_v53  ;;  %v4378_v26 = vpop.xlane.xlu1 %4377 }
 0x902   : > { %7166 = vrcp.f32 %v4378_v26 }
 0x904   : > { %v4381_v59 = vpop.xlane.xlu0 %4380  ;;  %v7157_v46 = vpop.eup %7156 }
 0x905   : > { %7168 = vrcp.f32 %v4381_v59  ;;  %v4384_v34 = vpop.xlane.xlu1 %4383  ;;  %v4522_v33 = vmul.f32 %v7157_v46, %v9906_v31 }
 0x906   : > { %v7159_v57 = vpop.eup %7158  ;;  %7170 = vrcp.f32 %v4384_v34 }
 0x907   : > { %v4521_v63 = vmul.f32 %v7159_v57, %v9912_v42 }
 0x908   : > { %v4387_v29 = vpop.xlane.xlu0 %4386 }
 0x909   : > { %7172 = vrcp.f32 %v4387_v29  ;;  %v4390_v56 = vpop.xlane.xlu1 %4389  ;;  %6915 = vmatprep.mubr.msk.f32.mxu1 %vm4168_vm6, %v4521_v63 }
 0x90a   : > { %v7161_v0 = vpop.eup %7160  ;;  %7174 = vrcp.f32 %v4390_v56  ;;  %6916 = vmatmul.mubr.msk.f32.vlgmr.msra.gmra.mxu1 %vm4168_vm6, %v4522_v33 }
 0x90b   : > { %v7163_v37 = vpop.eup %7162  ;;  %v4523_v27 = vmul.f32 %v7161_v0, %v9918_v61 }
 0x90c   : > { %v4393_v44 = vpop.xlane.xlu0 %4392  ;;  %v4524_v2 = vmul.f32 %v7163_v37, %v9920_v23 }
 0x90d   : > { %7176 = vrcp.f32 %v4393_v44  ;;  %v4396_v16 = vpop.xlane.xlu1 %4395  ;;  %6918 = vmatprep.mubr.msk.f32.mxu1 %vm4168_vm6, %v4523_v27 }
 0x90e   : > { %v7165_v42 = vpop.eup %7164  ;;  %7178 = vrcp.f32 %v4396_v16  ;;  %6919 = vmatmul.mubr.msk.f32.gmra.mxu1 %vm4168_vm6, %v4524_v2 }
 0x90f   : > { %v7167_v31 = vpop.eup %7166  ;;  %v4525_v52 = vmul.f32 %v7165_v42, %v9928_v41 }
 0x910   : > { %v4399_v5 = vpop.xlane.xlu0 %4398  ;;  %v4526_v28 = vmul.f32 %v7167_v31, %v9930_v49 }
 0x911   : > { %7180 = vrcp.f32 %v4399_v5  ;;  %v4402_v54 = vpop.xlane.xlu1 %4401  ;;  %6921 = vmatprep.mubr.msk.f32.mxu1 %vm4168_vm6, %v4525_v52 }
 0x912   : > { %v7169_v61 = vpop.eup %7168  ;;  %7182 = vrcp.f32 %v4402_v54  ;;  %6922 = vmatmul.mubr.msk.f32.gmra.mxu1 %vm4168_vm6, %v4526_v28 }
 0x913   : > { %v7171_v23 = vpop.eup %7170  ;;  %v4527_v62 = vmul.f32 %v7169_v61, %v9938_v50 }
 0x914   : > { %v4405_v25 = vpop.xlane.xlu0 %4404  ;;  %v4528_v12 = vmul.f32 %v7171_v23, %v9940_v48 }
 0x915   : > { %7184 = vrcp.f32 %v4405_v25  ;;  %v4408_v19 = vpop.xlane.xlu1 %4407  ;;  %6924 = vmatprep.mubr.msk.f32.mxu1 %vm4168_vm6, %v4527_v62 }
 0x916   : > { %v7173_v41 = vpop.eup %7172  ;;  %7186 = vrcp.f32 %v4408_v19  ;;  %6925 = vmatmul.mubr.msk.f32.gmra.mxu1 %vm4168_vm6, %v4528_v12 }
 0x917   : > { %v7175_v49 = vpop.eup %7174  ;;  %v4529_v51 = vmul.f32 %v7173_v41, %v9948_v40 }
 0x918   : > { %v4411_v55 = vpop.xlane.xlu0 %4410  ;;  %v4530_v32 = vmul.f32 %v7175_v49, %v9950_v36 }
 0x919   : > { %7188 = vrcp.f32 %v4411_v55  ;;  %v4414_v6 = vpop.xlane.xlu1 %4413  ;;  %6927 = vmatprep.mubr.msk.f32.mxu1 %vm4168_vm6, %v4529_v51 }
 0x91a   : > { %v7177_v50 = vpop.eup %7176  ;;  %7190 = vrcp.f32 %v4414_v6  ;;  %6928 = vmatmul.mubr.msk.f32.gmra.mxu1 %vm4168_vm6, %v4530_v32  ;;  %v10143_v32 = vld [vmem:[%s10844_s5 + $0x8] sm:$0xff]  ;;  %v10148_v6 = vld [vmem:[%s10844_s5] sm:$0xff] }
 0x91b   : > { %v7179_v48 = vpop.eup %7178  ;;  %v4531_v47 = vmul.f32 %v7177_v50, %v9958_v24 }
 0x91c   : > { %v4417_v15 = vpop.xlane.xlu0 %4416  ;;  %v4532_v45 = vmul.f32 %v7179_v48, %v9960_v11  ;;  %v7256_v48 = vmov 0  }
 0x91d   : > { %7192 = vrcp.f32 %v4417_v15  ;;  %v4420_v1 = vpop.xlane.xlu1 %4419  ;;  %6930 = vmatprep.mubr.msk.f32.mxu1 %vm4168_vm6, %v4531_v47  ;;  %7003 = vset.pattern.permute.xlu1 %v7256_v48 }
 0x91e   : > { %v7181_v40 = vpop.eup %7180  ;;  %7194 = vrcp.f32 %v4420_v1  ;;  %6931 = vmatmul.mubr.msk.f32.gmra.mxu1 %vm4168_vm6, %v4532_v45  ;;  %7004 = vset.pattern.permute.xlu0 %v7256_v48  ;;  %v7257_v45 = vmov 1   ;;  %v10159_v1 = vld [vmem:[%s7337_s7 + $0x10] sm:$0xff] }
 0x91f   : > { %v7183_v36 = vpop.eup %7182  ;;  %v4533_v53 = vmul.f32 %v7181_v40, %v9968_v4 }
 0x920   : > { %v4423_v26 = vpop.xlane.xlu0 %4422  ;;  %v4534_v59 = vmul.f32 %v7183_v36, %v9970_v7 }
 0x921   : > { %7196 = vrcp.f32 %v4423_v26  ;;  %v4426_v46 = vpop.xlane.xlu1 %4425  ;;  %6933 = vmatprep.mubr.msk.f32.mxu1 %vm4168_vm6, %v4533_v53  ;;  %v10169_v53 = vld [vmem:[%s7337_s7] sm:$0xff] }
 0x922   : > { %v7185_v24 = vpop.eup %7184  ;;  %7198 = vrcp.f32 %v4426_v46  ;;  %6934 = vmatmul.mubr.msk.f32.gmra.mxu1 %vm4168_vm6, %v4534_v59 }
 0x923   : > { %v7187_v11 = vpop.eup %7186  ;;  %v4535_v34 = vmul.f32 %v7185_v24, %v9978_v58  ;;  %v10181_v24 = vld [vmem:[%s7337_s7 + $0x18] sm:$0xff] }
 0x924   : > { %v4429_v57 = vpop.xlane.xlu0 %4428  ;;  %v4536_v63 = vmul.f32 %v7187_v11, %v9980_v17 }
 0x925   : > { %7200 = vrcp.f32 %v4429_v57  ;;  %v4432_v29 = vpop.xlane.xlu1 %4431  ;;  %6936 = vmatprep.mubr.msk.f32.mxu1 %vm4168_vm6, %v4535_v34  ;;  %v10188_v57 = vld [vmem:[%s7337_s7 + $0x8] sm:$0xff]  ;;  %s7260_s7 = smov 17  }
 0x926   : > { %v7189_v4 = vpop.eup %7188  ;;  %7202 = vrcp.f32 %v4432_v29  ;;  %6937 = vmatmul.mubr.msk.f32.gmra.mxu1 %vm4168_vm6, %v4536_v63 }
 0x927   : > { %v7191_v7 = vpop.eup %7190  ;;  %v4537_v33 = vmul.f32 %v7189_v4, %v9988_v13 }
 0x928   : > { %v4435_v56 = vpop.xlane.xlu0 %4434  ;;  %v4538_v0 = vmul.f32 %v7191_v7, %v9990_v8 }
 0x929   : > { %7204 = vrcp.f32 %v4435_v56  ;;  %v4438_v37 = vpop.xlane.xlu1 %4437  ;;  %6939 = vmatprep.mubr.msk.f32.mxu1 %vm4168_vm6, %v4537_v33 }
 0x92a   : > { %v7193_v58 = vpop.eup %7192  ;;  %7206 = vrcp.f32 %v4438_v37  ;;  %6940 = vmatmul.mubr.msk.f32.gmra.mxu1 %vm4168_vm6, %v4538_v0 }
 0x92b   : > { %v7195_v17 = vpop.eup %7194  ;;  %v4539_v27 = vmul.f32 %v7193_v58, %v9998_v35 }
 0x92c   : > { %v4441_v44 = vpop.xlane.xlu0 %4440  ;;  %v4540_v2 = vmul.f32 %v7195_v17, %v10000_v22 }
 0x92d   : > { %7208 = vrcp.f32 %v4441_v44  ;;  %v4444_v16 = vpop.xlane.xlu1 %4443  ;;  %6942 = vmatprep.mubr.msk.f32.mxu1 %vm4168_vm6, %v4539_v27 }
 0x92e   : > { %v7197_v13 = vpop.eup %7196  ;;  %7210 = vrcp.f32 %v4444_v16  ;;  %6943 = vmatmul.mubr.msk.f32.gmra.mxu1 %vm4168_vm6, %v4540_v2 }
 0x92f   : > { %v7199_v8 = vpop.eup %7198  ;;  %v4541_v42 = vmul.f32 %v7197_v13, %v10008_v39 }
 0x930   : > { %v4447_v31 = vpop.xlane.xlu0 %4446  ;;  %v4542_v52 = vmul.f32 %v7199_v8, %v10010_v14 }
 0x931   : > { %7212 = vrcp.f32 %v4447_v31  ;;  %v4450_v5 = vpop.xlane.xlu1 %4449  ;;  %6945 = vmatprep.mubr.msk.f32.mxu1 %vm4168_vm6, %v4541_v42 }
 0x932   : > { %v7201_v35 = vpop.eup %7200  ;;  %7214 = vrcp.f32 %v4450_v5  ;;  %6946 = vmatmul.mubr.msk.f32.gmra.mxu1 %vm4168_vm6, %v4542_v52 }
 0x933   : > { %v7203_v22 = vpop.eup %7202  ;;  %v4543_v28 = vmul.f32 %v7201_v35, %v10018_v43 }
 0x934   : > { %v4453_v54 = vpop.xlane.xlu0 %4452  ;;  %v4544_v61 = vmul.f32 %v7203_v22, %v10020_v20 }
 0x935   : > { %7216 = vrcp.f32 %v4453_v54  ;;  %v4456_v23 = vpop.xlane.xlu1 %4455  ;;  %6948 = vmatprep.mubr.msk.f32.mxu1 %vm4168_vm6, %v4543_v28 }
 0x936   : > { %v7205_v39 = vpop.eup %7204  ;;  %7218 = vrcp.f32 %v4456_v23  ;;  %6949 = vmatmul.mubr.msk.f32.gmra.mxu1 %vm4168_vm6, %v4544_v61 }
 0x937   : > { %v7207_v14 = vpop.eup %7206  ;;  %v4545_v62 = vmul.f32 %v7205_v39, %v10026_v60 }
 0x938   : > { %v4546_v25 = vmul.f32 %v7207_v14, %v10028_v30 }
 0x939   : > { %6951 = vmatprep.mubr.msk.f32.mxu1 %vm4168_vm6, %v4545_v62 }
 0x93a   : > { %v7209_v12 = vpop.eup %7208  ;;  %6952 = vmatmul.mubr.msk.f32.gmra.mxu1 %vm4168_vm6, %v4546_v25 }
 0x93b   : > { %v7211_v43 = vpop.eup %7210  ;;  %v4547_v20 = vmul.f32 %v7209_v12, %v10034_v9 }
 0x93c   : > { %v4548_v19 = vmul.f32 %v7211_v43, %v10036_v10 }
 0x93d   : > { %6954 = vmatprep.mubr.msk.f32.mxu1 %vm4168_vm6, %v4547_v20 }
 0x93e   : > { %v7213_v41 = vpop.eup %7212  ;;  %6955 = vmatmul.mubr.msk.f32.gmra.mxu1 %vm4168_vm6, %v4548_v19 }
 0x93f   : > { %v7215_v49 = vpop.eup %7214  ;;  %v4549_v60 = vmul.f32 %v7213_v41, %v10042_v21  ;;  %v10125_v21 = vld [vmem:[%s10842_s3] sm:$0xff] }
 0x940   : > { %v4550_v30 = vmul.f32 %v7215_v49, %v10044_v18  ;;  %4874 = vrot.lane.b32.xlu0 %v10125_v21, %s7255_s19  ;;  %v10131_v18 = vld [vmem:[%s10842_s3 + $0x28] sm:$0xff] }
 0x941   : > { %6957 = vmatprep.mubr.msk.f32.mxu1 %vm4168_vm6, %v4549_v60  ;;  %4876 = vrot.lane.b32.xlu1 %v10131_v18, %s7255_s19 }
 0x942   : > { %v7217_v51 = vpop.eup %7216  ;;  %6958 = vmatmul.mubr.msk.f32.gmra.mxu1 %vm4168_vm6, %v4550_v30 }
 0x943   : > { %v7219_v55 = vpop.eup %7218  ;;  %v4551_v9 = vmul.f32 %v7217_v51, %v10050_v3 }
 0x944   : > { %v4552_v10 = vmul.f32 %v7219_v55, %v10052_v38  ;;  %5057 = vperm.xlu0 %7004, %v10148_v6  }
 0x945   : > { %6960 = vmatprep.mubr.msk.f32.mxu1 %vm4168_vm6, %v4551_v9  ;;  %5062 = vperm.xlu1 %7003, %v10143_v32  }
 0x946   : > { %6961 = vmatmul.mubr.msk.f32.gmra.mxu1 %vm4168_vm6, %v4552_v10  ;;  %vm10518_vm6 = vmneg %vm404_vm0 }
 0x948   : > { %5227 = vrot.lane.b32.xlu0 %v10159_v1, %s7258_s8 }
 0x949   : > { %7005 = vset.pattern.permute.xlu1 %v7257_v45 }
 0x94a   : > { %5074 = vperm.xlu1 %7005, %v10143_v32  }
 0x94c   : > { %5223 = vrot.lane.b32.xlu0 %v10169_v53, %s7258_s8 }
 0x94e   : > { %5070 = vperm.xlu1 %7005, %v10148_v6  }
 0x950   : > { %5178 = vrot.lane.b32.xlu0 %v10159_v1, %s7259_s9 }
 0x952   : > { %5229 = vrot.lane.b32.xlu1 %v10181_v24, %s7258_s8 }
 0x954   : > { %5174 = vrot.lane.b32.xlu0 %v10169_v53, %s7259_s9 }
 0x956   : > { %5225 = vrot.lane.b32.xlu1 %v10188_v57, %s7258_s8 }
 0x958   : > { %5146 = vrot.lane.b32.xlu0 %v10159_v1, %s7250_s20 }
 0x95a   : > { %5180 = vrot.lane.b32.xlu1 %v10181_v24, %s7259_s9 }
 0x95c   : > { %5142 = vrot.lane.b32.xlu0 %v10169_v53, %s7250_s20 }
 0x95e   : > { %5176 = vrot.lane.b32.xlu1 %v10188_v57, %s7259_s9 }
 0x960   : > { %5097 = vrot.lane.b32.xlu0 %v10159_v1, %s7260_s7 }
 0x962   : > { %5148 = vrot.lane.b32.xlu1 %v10181_v24, %s7250_s20 }
 0x964   : > { %5093 = vrot.lane.b32.xlu0 %v10169_v53, %s7260_s7 }
 0x966   : > { %5144 = vrot.lane.b32.xlu1 %v10188_v57, %s7250_s20 }
 0x968   : > { %5350 = vrot.lane.b32.xlu0 %v10159_v1, %s7261_s10 }
 0x96a   : > { %5099 = vrot.lane.b32.xlu1 %v10181_v24, %s7260_s7 }
 0x96c   : > { %5346 = vrot.lane.b32.xlu0 %v10169_v53, %s7261_s10 }
 0x96e   : > { %5095 = vrot.lane.b32.xlu1 %v10188_v57, %s7260_s7 }
 0x972   : > { %5352 = vrot.lane.b32.xlu1 %v10181_v24, %s7261_s10 }
 0x976   : > { %5348 = vrot.lane.b32.xlu1 %v10188_v57, %s7261_s10 }
 0x9b2   : > { %v10134_v3 = vpop.permute.xlu0 %4874 }
 0x9b3   : > { %6608 = vmatprep.mubr.msk.f32.mxu1 %vm404_vm0, %v10134_v3  ;;  %v4877_v22 = vpop.permute.xlu1 %4876 }
 0x9bf   : > { %v5058_v61 = vpop.permute.xlu0 %5057 }
 0x9c0   : > { %v5063_v28 = vpop.permute.xlu1 %5062 }
 0x9c5   : > { %v5075_v54 = vpop.permute.xlu1 %5074 }
 0x9c9   : > { %v5071_v62 = vpop.permute.xlu1 %5070 }
 0x9ca   : > { %v10138_v38 = vpop.f32.mrf.mxu1 }
 0x9cc   : > { %v10150_v50 = vpop.f32.mrf.mxu1 }
 0x9ce   : > { %v10154_v47 = vpop.f32.mrf.mxu1 }
 0x9d0   : > { %v10156_v15 = vpop.f32.mrf.mxu1 }
 0x9d2   : > { %v10163_v40 = vpop.f32.mrf.mxu1 }
 0x9d4   : > { %v10166_v36 = vpop.f32.mrf.mxu1 }
 0x9d6   : > { %v10173_v26 = vpop.f32.mrf.mxu1 }
 0x9d8   : > { %v10176_v59 = vpop.f32.mrf.mxu1 }
 0x9da   : > { %v6929_v46 = vpop.f32.mrf.mxu1 }
 0x9dc   : > { %v4755_v11 = vpop.f32.mrf.mxu1 }
 0x9de   : > { %v6932_v34 = vpop.f32.mrf.mxu1 }
 0x9e0   : > { %v4765_v63 = vpop.f32.mrf.mxu1 }
 0x9e2   : > { %v6935_v29 = vpop.f32.mrf.mxu1 }
 0x9e4   : > { %v4775_v4 = vpop.f32.mrf.mxu1 }
 0x9e6   : > { %v6938_v7 = vpop.f32.mrf.mxu1 }
 0x9e8   : > { %v4785_v33 = vpop.f32.mrf.mxu1 }
 0x9ea   : > { %v6941_v56 = vpop.f32.mrf.mxu1 }
 0x9ec   : > { %v4795_v0 = vpop.f32.mrf.mxu1 }
 0x9ee   : > { %v6944_v37 = vpop.f32.mrf.mxu1 }
 0x9f0   : > { %v4805_v58 = vpop.f32.mrf.mxu1 }
 0x9f2   : > { %v6947_v17 = vpop.f32.mrf.mxu1 }
 0x9f4   : > { %v4815_v27 = vpop.f32.mrf.mxu1 }
 0x9f6   : > { %v6950_v44 = vpop.f32.mrf.mxu1 }
 0x9f8   : > { %v4825_v2 = vpop.f32.mrf.mxu1 }
 0x9fa   : > { %v6953_v16 = vpop.f32.mrf.mxu1 }
 0x9fc   : > { %v4835_v13 = vpop.f32.mrf.mxu1 }
 0x9fe   : > { %v6956_v8 = vpop.f32.mrf.mxu1 }
 0xa00   : > { %v4845_v42 = vpop.f32.mrf.mxu1 }
 0xa02   : > { %v6959_v31 = vpop.f32.mrf.mxu1 }
 0xa04   : > { %v4855_v52 = vpop.f32.mrf.mxu1 }
 0xa06   : > { %v6962_v5 = vpop.f32.mrf.mxu1 }
 0xa07   : > { %6576 = vmatprep.subr.msk.mxu1 %vm404_vm0, %v6962_v5 }
 0xa08   : > { %v4865_v35 = vpop.f32.mrf.mxu1  ;;  %6577 = vmatpush3.xpose.msk.msra.mxu1 %vm404_vm0, %v6938_v7  ;;  %v7266_v7 = vmov 2  }
 0xa09   : > { %6578 = vmatprep.subr.msk.mxu1 %vm404_vm0, %v4865_v35  ;;  %7016 = vset.pattern.permute.xlu0 %v7266_v7 }
 0xa0a   : > { %7017 = vset.pattern.permute.xlu1 %v7266_v7 }
 0xa0c   : > { %6579 = vmatpush3.xpose.msk.msra.mxu1 %vm404_vm0, %v4785_v33 }
 0xa0d   : > { %6580 = vmatprep.subr.msk.mxu1 %vm404_vm0, %v6959_v31 }
 0xa10   : > { %6581 = vmatpush3.xpose.msk.msra.mxu1 %vm404_vm0, %v6935_v29  ;;  %v254_v29 = vld [vmem:[%s10842_s3 + $0x10] sm:$0xff] }
 0xa11   : > { %6582 = vmatprep.subr.msk.mxu1 %vm404_vm0, %v4855_v52 }
 0xa14   : > { %6583 = vmatpush3.xpose.msk.msra.mxu1 %vm404_vm0, %v4775_v4  ;;  %v258_v4 = vld [vmem:[%s10842_s3 + $0x30] sm:$0xff] }
 0xa15   : > { %6584 = vmatprep.subr.msk.mxu1 %vm404_vm0, %v6956_v8 }
 0xa18   : > { %6585 = vmatpush3.xpose.msk.msra.mxu1 %vm404_vm0, %v6932_v34 }
 0xa19   : > { %6586 = vmatprep.subr.msk.mxu1 %vm404_vm0, %v4845_v42 }
 0xa1c   : > { %6587 = vmatpush3.xpose.msk.msra.mxu1 %vm404_vm0, %v4765_v63 }
 0xa1d   : > { %6588 = vmatprep.subr.msk.mxu1 %vm404_vm0, %v6953_v16 }
 0xa20   : > { %6589 = vmatpush3.xpose.msk.msra.mxu1 %vm404_vm0, %v6929_v46  ;;  %v7265_v46 = vmov 0.0  }
 0xa21   : > { %6590 = vmatprep.subr.msk.mxu1 %vm404_vm0, %v4835_v13 }
 0xa24   : > { %6591 = vmatpush3.xpose.msk.msra.mxu1 %vm404_vm0, %v4755_v11 }
 0xa25   : > { %6592 = vmatprep.subr.msk.mxu1 %vm404_vm0, %v6950_v44 }
 0xa28   : > { %6593 = vmatpush3.xpose.msk.msra.mxu1 %vm404_vm0, %v10173_v26 }
 0xa29   : > { %6594 = vmatprep.subr.msk.mxu1 %vm404_vm0, %v4825_v2  ;;  %v7268_v2 = vmov 3  }
 0xa2c   : > { %6595 = vmatpush3.xpose.msk.msra.mxu1 %vm404_vm0, %v10176_v59  ;;  %v253_v59 = vld [vmem:[%s10842_s3 + $0x8] sm:$0xff] }
 0xa2d   : > { %6596 = vmatprep.subr.msk.mxu1 %vm404_vm0, %v6947_v17  ;;  %v7006_v11 = vpack.i.bf16 %v10125_v21, %v253_v59  ;;  %v10398_v21 = vld [vmem:[%s10842_s3 + $0x18] sm:$0xff] }
 0xa30   : > { %6597 = vmatpush3.xpose.msk.msra.mxu1 %vm404_vm0, %v10163_v40 }
 0xa31   : > { %6598 = vmatprep.subr.msk.mxu1 %vm404_vm0, %v4815_v27 }
 0xa34   : > { %6599 = vmatpush3.xpose.msk.msra.mxu1 %vm404_vm0, %v10166_v36 }
 0xa35   : > { %6600 = vmatprep.subr.msk.mxu1 %vm404_vm0, %v6944_v37  ;;  %v259_v37 = vld [vmem:[%s10842_s3 + $0x38] sm:$0xff] }
 0xa38   : > { %6601 = vmatpush3.xpose.msk.msra.mxu1 %vm404_vm0, %v10154_v47 }
 0xa39   : > { %6602 = vmatprep.subr.msk.mxu1 %vm404_vm0, %v4805_v58  ;;  %v10412_v58 = vld [vmem:[%s10842_s3 + $0x40] sm:$0xff] }
 0xa3c   : > { %6603 = vmatpush3.xpose.msk.msra.mxu1 %vm404_vm0, %v10156_v15 }
 0xa3d   : > { %6604 = vmatprep.subr.msk.mxu1 %vm404_vm0, %v6941_v56  ;;  %v7011_v56 = vpack.i.bf16 %v10131_v18, %v258_v4 }
 0xa40   : > { %6605 = vmatpush3.xpose.msk.msra.mxu1 %vm404_vm0, %v10138_v38  ;;  %v10332_v38 = vpop.permute.xlu1 %5229 }
 0xa41   : > { %6606 = vmatprep.subr.msk.mxu1 %vm404_vm0, %v4795_v0 }
 0xa44   : > { %6607 = vmatpush3.xpose.msk.msra.mxu1 %vm404_vm0, %v10150_v50  ;;  %v10342_v48 = vpop.permute.xlu1 %5225 }
 0xa47   : > { %6609 = vmatmul.mubr.msk.f32.vlgmr.msra.gmra.mxu1 %vm404_vm0, %v10134_v3  ;;  %v10328_v3 = vpop.permute.xlu0 %5227 }
 0xa48   : > { %6610 = vmatprep.mubr.msk.f32.mxu1 %vm404_vm0, %v4877_v22  ;;  %v10352_v15 = vpop.permute.xlu1 %5180  ;;  %v5241_v59 = vsel %vm5239_vm15, %v10328_v3, %v10332_v38 }
 0xa4b   : > { %6611 = vmatmul.mubr.msk.f32.gmra.mxu1 %vm404_vm0, %v4877_v22  ;;  %v10338_v50 = vpop.permute.xlu0 %5223 }
 0xa4c   : > { %v10362_v40 = vpop.permute.xlu1 %5176  ;;  %5598 = vmatprep.mubr.f32.mxu1 %v7265_v46  ;;  %v5252_v38 = vsel %vm5239_vm15, 0.0, %v10338_v50 }
 0xa4f   : > { %v10348_v47 = vpop.permute.xlu0 %5178 }
 0xa50   : > { %v10372_v26 = vpop.permute.xlu1 %5148 }
 0xa53   : > { %v10358_v45 = vpop.permute.xlu0 %5174 }
 0xa54   : > { %v10387_v63 = vpop.permute.xlu1 %5144 }
 0xa57   : > { %v10368_v36 = vpop.permute.xlu0 %5146 }
 0xa58   : > { %v10404_v0 = vpop.permute.xlu1 %5099 }
 0xa5b   : > { %v10383_v34 = vpop.permute.xlu0 %5142 }
 0xa5c   : > { %v10416_v27 = vpop.permute.xlu1 %5095 }
 0xa5f   : > { %v10400_v33 = vpop.permute.xlu0 %5097 }
 0xa60   : > { %v10423_v44 = vpop.permute.xlu1 %5352 }
 0xa63   : > { %v10414_v17 = vpop.permute.xlu0 %5093 }
 0xa64   : > { %v10429_v13 = vpop.permute.xlu1 %5348 }
 0xa67   : > { %v10420_v18 = vpop.permute.xlu0 %5350 }
 0xa6b   : > { %v10427_v16 = vpop.permute.xlu0 %5346 }
 0xb07   : > { %v5044_v23 = vpop.f32.mrf.mxu1 }
 0xb08   : > { %v5065_v39 = vmul.f32 %v5058_v61, %v5044_v23  ;;  %v271_v23 = vld [vmem:[%s10841_s2 + $0x28] sm:$0x3] }
 0xb09   : > { %v5046_v14 = vpop.f32.mrf.mxu1 }
 0xb0a   : > { %v5066_v25 = vmul.f32 %v5058_v61, %v5046_v14  ;;  %v5077_v12 = vadd.f32 %v5071_v62, %v5065_v39  ;;  %v270_v39 = vld [vmem:[%s10841_s2 + $0x20] sm:$0x3] }
 0xb0b   : > { %v5050_v41 = vpop.f32.mrf.mxu1 }
 0xb0c   : > { %v5078_v43 = vadd.f32 %v5071_v62, %v5066_v25  ;;  %v10264_v20 = vmax.f32 %v5077_v12, 0.0  ;;  %v5067_v49 = vmul.f32 %v5063_v28, %v5050_v41  ;;  %v11312_v62 = vld [vmem:[#allocation3_spill] sm:$0xff] }
 0xb0d   : > { %v5052_v60 = vpop.f32.mrf.mxu1  ;;  %v10454_v25 = vrot.slane %v271_v23, %v11312_v62  ;;  %v10458_v41 = vrot.slane %v270_v39, %v11312_v62 }
 0xb0e   : > { %v10266_v19 = vmax.f32 %v5078_v43, 0.0  ;;  %5231 = vrot.lane.b32.xlu0 %v10264_v20, %s7258_s8  ;;  %v5079_v30 = vadd.f32 %v5075_v54, %v5067_v49  ;;  %v5068_v51 = vmul.f32 %v5063_v28, %v5052_v60 }
 0xb10   : > { %5233 = vrot.lane.b32.xlu1 %v10266_v19, %s7258_s8  ;;  %v10288_v55 = vmax.f32 %v5079_v30, 0.0  ;;  %v5080_v9 = vadd.f32 %v5075_v54, %v5068_v51 }
 0xb12   : > { %5182 = vrot.lane.b32.xlu0 %v10264_v20, %s7259_s9  ;;  %v10294_v10 = vmax.f32 %v5080_v9, 0.0 }
 0xb14   : > { %5184 = vrot.lane.b32.xlu1 %v10266_v19, %s7259_s9 }
 0xb16   : > { %5150 = vrot.lane.b32.xlu0 %v10264_v20, %s7250_s20 }
 0xb18   : > { %5152 = vrot.lane.b32.xlu1 %v10266_v19, %s7250_s20 }
 0xb1a   : > { %5101 = vrot.lane.b32.xlu0 %v10264_v20, %s7260_s7 }
 0xb1c   : > { %5103 = vrot.lane.b32.xlu1 %v10266_v19, %s7260_s7 }
 0xb1e   : > { %5354 = vrot.lane.b32.xlu0 %v10264_v20, %s7261_s10 }
 0xb20   : > { %5356 = vrot.lane.b32.xlu1 %v10266_v19, %s7261_s10 }
 0xb22   : > { %5315 = vrot.lane.b32.xlu0 %v10266_v19, %s7262_s11 }
 0xb24   : > { %5317 = vrot.lane.b32.xlu1 %v10288_v55, %s7262_s11 }
 0xb26   : > { %5235 = vrot.lane.b32.xlu0 %v10288_v55, %s7258_s8 }
 0xb28   : > { %5237 = vrot.lane.b32.xlu1 %v10294_v10, %s7258_s8 }
 0xb2a   : > { %5186 = vrot.lane.b32.xlu0 %v10288_v55, %s7259_s9 }
 0xb2c   : > { %5313 = vrot.lane.b32.xlu1 %v10264_v20, %s7262_s11 }
 0xb2e   : > { %5154 = vrot.lane.b32.xlu0 %v10288_v55, %s7250_s20 }
 0xb30   : > { %5188 = vrot.lane.b32.xlu1 %v10294_v10, %s7259_s9 }
 0xb32   : > { %5105 = vrot.lane.b32.xlu0 %v10288_v55, %s7260_s7 }
 0xb34   : > { %5309 = vrot.lane.b32.xlu1 %v10159_v1, %s7262_s11 }
 0xb36   : > { %5358 = vrot.lane.b32.xlu0 %v10288_v55, %s7261_s10 }
 0xb38   : > { %5305 = vrot.lane.b32.xlu1 %v10169_v53, %s7262_s11 }
 0xb3a   : > { %5311 = vrot.lane.b32.xlu0 %v10181_v24, %s7262_s11 }
 0xb3c   : > { %5156 = vrot.lane.b32.xlu1 %v10294_v10, %s7250_s20 }
 0xb3e   : > { %5307 = vrot.lane.b32.xlu0 %v10188_v57, %s7262_s11 }
 0xb40   : > { %5107 = vrot.lane.b32.xlu1 %v10294_v10, %s7260_s7 }
 0xb42   : > { %5274 = vrot.lane.b32.xlu0 %v10266_v19, %s7263_s13 }
 0xb44   : > { %5276 = vrot.lane.b32.xlu1 %v10288_v55, %s7263_s13 }
 0xb46   : > { %5270 = vrot.lane.b32.xlu0 %v10181_v24, %s7263_s13 }
 0xb48   : > { %5272 = vrot.lane.b32.xlu1 %v10264_v20, %s7263_s13 }
 0xb4a   : > { %5266 = vrot.lane.b32.xlu0 %v10188_v57, %s7263_s13 }
 0xb4c   : > { %5360 = vrot.lane.b32.xlu1 %v10294_v10, %s7261_s10 }
 0xb4e   : > { %5319 = vrot.lane.b32.xlu0 %v10294_v10, %s7262_s11 }
 0xb50   : > { %5268 = vrot.lane.b32.xlu1 %v10159_v1, %s7263_s13 }
 0xb52   : > { %5389 = vrot.lane.b32.xlu0 %v10266_v19, %s7264_s14 }
 0xb54   : > { %5264 = vrot.lane.b32.xlu1 %v10169_v53, %s7263_s13 }
 0xb56   : > { %5278 = vrot.lane.b32.xlu0 %v10294_v10, %s7263_s13 }
 0xb58   : > { %5391 = vrot.lane.b32.xlu1 %v10288_v55, %s7264_s14 }
 0xb5a   : > { %5385 = vrot.lane.b32.xlu0 %v10181_v24, %s7264_s14 }
 0xb5c   : > { %5387 = vrot.lane.b32.xlu1 %v10264_v20, %s7264_s14 }
 0xb5e   : > { %5393 = vrot.lane.b32.xlu0 %v10294_v10, %s7264_s14 }
 0xb60   : > { %5383 = vrot.lane.b32.xlu1 %v10159_v1, %s7264_s14 }
 0xb62   : > { %5381 = vrot.lane.b32.xlu0 %v10188_v57, %s7264_s14 }
 0xb64   : > { %5379 = vrot.lane.b32.xlu1 %v10169_v53, %s7264_s14 }
 0xb66   : > { %7007 = vrot.lane.b32.xlu0 %v7006_v11, %s7267_s24 }
 0xb68   : > { %5430 = vrot.lane.b32.xlu1 %v254_v29, %s7267_s24  ;;  %v5253_v29 = vsel %vm5239_vm15, 0.0, %v10328_v3 }
 0xb69   : > { %v5258_v3 = vmul.f32 %v5253_v29, %v10458_v41 }
 0xb6a   : > { %5432 = vrot.lane.b32.xlu0 %v10398_v21, %s7267_s24 }
 0xb6c   : > { %7012 = vrot.lane.b32.xlu1 %v7011_v56, %s7267_s24  ;;  %v5240_v56 = vsel %vm5239_vm15, %v10338_v50, %v10342_v48 }
 0xb6e   : > { %5438 = vrot.lane.b32.xlu0 %v259_v37, %s7267_s24 }
 0xb70   : > { %5440 = vrot.lane.b32.xlu1 %v10412_v58, %s7267_s24  ;;  %s251_s24 = scalar_lea.vmem %s10845_s6, %s6246_s26 }
 0xb72   : > { %5616 = vperm.xlu0 %7016, %v10143_v32  }
 0xb74   : > { %5612 = vperm.xlu1 %7017, %v10148_v6  }
 0xb76   : > { %7019 = vset.pattern.permute.xlu0 %v7268_v2 }
 0xb77   : > { %5624 = vperm.xlu0 %7019, %v10148_v6  }
 0xb78   : > { %7018 = vset.pattern.permute.xlu1 %v7268_v2  ;;  %v5259_v2 = vmul.f32 %v5241_v59, %v10454_v25  ;;  %v5192_v59 = vsel %vm5190_vm1, %v10348_v47, %v10352_v15 }
 0xb79   : > { %5628 = vperm.xlu1 %7018, %v10143_v32  }
 0xb80   : > { %v5232_v8 = vpop.permute.xlu0 %5231 }
 0xb81   : > { %v5254_v30 = vsel %vm5239_vm15, 0.0, %v5232_v8 }
 0xb82   : > { %v5234_v42 = vpop.permute.xlu1 %5233  ;;  %v5260_v37 = vmul.f32 %v5254_v30, %v10458_v41 }
 0xb83   : > { %v5242_v49 = vsel %vm5239_vm15, %v5232_v8, %v5234_v42  ;;  %v5257_v42 = vmul.f32 %v5240_v56, %v10454_v25 }
 0xb84   : > { %v5183_v31 = vpop.permute.xlu0 %5182  ;;  %v5261_v4 = vmul.f32 %v5242_v49, %v10454_v25 }
 0xb85   : > { %v5205_v30 = vsel %vm5190_vm1, 0.0, %v5183_v31 }
 0xb86   : > { %v5185_v52 = vpop.permute.xlu1 %5184 }
 0xb87   : > { %v5193_v50 = vsel %vm5190_vm1, %v5183_v31, %v5185_v52  ;;  %v5191_v31 = vsel %vm5190_vm1, %v10358_v45, %v10362_v40 }
 0xb88   : > { %v10431_v5 = vpop.permute.xlu0 %5150 }
 0xb8a   : > { %v10433_v35 = vpop.permute.xlu1 %5152 }
 0xb8c   : > { %v10435_v22 = vpop.permute.xlu0 %5101 }
 0xb8e   : > { %v10437_v28 = vpop.permute.xlu1 %5103 }
 0xb90   : > { %v10439_v6 = vpop.permute.xlu0 %5354 }
 0xb92   : > { %v10441_v54 = vpop.permute.xlu1 %5356 }
 0xb94   : > { %v10443_v32 = vpop.permute.xlu0 %5315 }
 0xb96   : > { %v10445_v61 = vpop.permute.xlu1 %5317 }
 0xb98   : > { %v5236_v14 = vpop.permute.xlu0 %5235 }
 0xb99   : > { %v5255_v12 = vsel %vm5239_vm15, 0.0, %v5236_v14 }
 0xb9a   : > { %v5238_v43 = vpop.permute.xlu1 %5237  ;;  %v5262_v11 = vmul.f32 %v5255_v12, %v10458_v41 }
 0xb9b   : > { %v5243_v60 = vsel %vm5239_vm15, %v5236_v14, %v5238_v43  ;;  %v11313_v14 = vld [vmem:[#allocation27_spill] sm:$0xff]  ;;  %v5256_v43 = vmul.f32 %v5252_v38, %v10458_v41 }
 0xb9c   : > { %v5263_v51 = vmul.f32 %v5243_v60, %v10454_v25  ;;  %v5187_v9 = vpop.permute.xlu0 %5186  ;;  %v10483_v62 = vrot.slane %v271_v23, %v11313_v14  ;;  %v10488_v49 = vrot.slane %v270_v39, %v11313_v14  ;;  %v5204_v39 = vsel %vm5190_vm1, 0.0, %v10348_v47 }
 0xb9d   : > { %v5206_v48 = vsel %vm5190_vm1, 0.0, %v5187_v9 }
 0xb9e   : > { %5457 = vmatprep.subr.mxu0 %v5263_v51  ;;  %v10471_v7 = vpop.permute.xlu1 %5313  ;;  %v5220_v52 = vmul.f32 %v10483_v62, %v5193_v50  ;;  %v5219_v29 = vmul.f32 %v10488_v49, %v5205_v30  ;;  %v5218_v15 = vmul.f32 %v10483_v62, %v5192_v59  ;;  %v5217_v47 = vmul.f32 %v10488_v49, %v5204_v39 }
 0xb9f   : > { %5458 = vmatpush1.msra.mxu0 %v5262_v11  ;;  %v5221_v11 = vmul.f32 %v10488_v49, %v5206_v48  ;;  %v5160_v48 = vsel %vm404_vm0, %v10431_v5, %v10433_v35  ;;  %v5159_v50 = vsel %vm404_vm0, %v10368_v36, %v10372_v26  ;;  %v5112_v35 = vsel %vm5109_vm3, %v10435_v22, %v10437_v28 }
 0xba0   : > { %v5155_v8 = vpop.permute.xlu0 %5154  ;;  %5459 = vmatprep.subr.mxu0 %v5261_v4  ;;  %v5203_v4 = vsel %vm5190_vm1, 0.0, %v10358_v45  ;;  %v5124_v26 = vsel %vm5109_vm3, 0.0, %v10435_v22  ;;  %v5111_v28 = vsel %vm5109_vm3, %v10400_v33, %v10404_v0  ;;  %v5110_v59 = vsel %vm5109_vm3, %v10414_v17, %v10416_v27 }
 0xba1   : > { %5460 = vmatpush1.msra.mxu0 %v5260_v37  ;;  %v5216_v37 = vmul.f32 %v10483_v62, %v5191_v31  ;;  %v5215_v40 = vmul.f32 %v10488_v49, %v5203_v4  ;;  %v5138_v0 = vmul.f32 %v10458_v41, %v5124_v26  ;;  %v5365_v4 = vsel %vm5362_vm4, %v10439_v6, %v10441_v54 }
 0xba2   : > { %5461 = vmatprep.subr.mxu0 %v5259_v2  ;;  %v5189_v12 = vpop.permute.xlu1 %5188  ;;  %v5336_v6 = vsel %vm5321_vm5, %v10443_v32, 0.0 }
 0xba3   : > { %v5194_v60 = vsel %vm5190_vm1, %v5187_v9, %v5189_v12  ;;  %5462 = vmatpush1.msra.mxu0 %v5258_v3 }
 0xba4   : > { %v5222_v51 = vmul.f32 %v10483_v62, %v5194_v60  ;;  %v5106_v23 = vpop.permute.xlu0 %5105  ;;  %5463 = vmatprep.subr.mxu0 %v5257_v42 }
 0xba5   : > { %5464 = vmatpush1.msra.mxu0 %v5256_v43  ;;  %v5125_v60 = vsel %vm5109_vm3, 0.0, %v5106_v23 }
 0xba6   : > { %5465 = vmatprep.subr.mxu0 %v5222_v51  ;;  %v10501_v9 = vpop.permute.xlu1 %5309 }
 0xba7   : > { %5466 = vmatpush1.msra.mxu0 %v5221_v11  ;;  %v5137_v11 = vmul.f32 %v10454_v25, %v5111_v28 }
 0xba8   : > { %v5359_v56 = vpop.permute.xlu0 %5358  ;;  %5467 = vmatprep.subr.mxu0 %v5220_v52  ;;  %v5135_v52 = vmul.f32 %v10454_v25, %v5110_v59 }
 0xba9   : > { %5468 = vmatpush1.msra.mxu0 %v5219_v29 }
 0xbaa   : > { %5469 = vmatprep.subr.mxu0 %v5218_v15  ;;  %v10512_v2 = vpop.permute.xlu1 %5305 }
 0xbab   : > { %5470 = vmatpush1.msra.mxu0 %v5217_v47 }
 0xbac   : > { %v10515_v38 = vpop.permute.xlu0 %5311  ;;  %5471 = vmatprep.subr.mxu0 %v5216_v37 }
 0xbad   : > { %5472 = vmatpush1.msra.mxu0 %v5215_v40 }
 0xbae   : > { %v5157_v3 = vpop.permute.xlu1 %5156 }
 0xbaf   : > { %v5161_v42 = vsel %vm404_vm0, %v5155_v8, %v5157_v3  ;;  %v5364_v3 = vsel %vm5362_vm4, %v10420_v18, %v10423_v44  ;;  %v5335_v18 = vsel %vm5321_vm5, %v10515_v38, 0.0 }
 0xbb0   : > { %v10523_v14 = vpop.permute.xlu0 %5307  ;;  %5473 = vmatprep.subr.mxu0 %v5161_v42 }
 0xbb1   : > { %6223 = vmatpush1.msk.msra.mxu0 %vm10518_vm6, %v5155_v8 }
 0xbb2   : > { %5475 = vmatprep.subr.mxu0 %v5160_v48  ;;  %v5108_v12 = vpop.permute.xlu1 %5107 }
 0xbb3   : > { %v5113_v43 = vsel %vm5109_vm3, %v5106_v23, %v5108_v12  ;;  %6225 = vmatpush1.msk.msra.mxu0 %vm10518_vm6, %v10431_v5  ;;  %v5158_v5 = vsel %vm404_vm0, %v10383_v34, %v10387_v63  ;;  %v5140_v23 = vmul.f32 %v10458_v41, %v5125_v60  ;;  %v5139_v63 = vmul.f32 %v10454_v25, %v5112_v35 }
 0xbb4   : > { %v10538_v8 = vpop.permute.xlu0 %5274  ;;  %5477 = vmatprep.subr.mxu0 %v5159_v50  ;;  %v5141_v30 = vmul.f32 %v10454_v25, %v5113_v43  ;;  %v5343_v12 = vmul.f32 %v5336_v6, %v10454_v25  ;;  %v5322_v50 = vsel %vm5321_vm5, %v10512_v2, %v10523_v14 }
 0xbb5   : > { %6227 = vmatpush1.msk.msra.mxu0 %vm10518_vm6, %v10368_v36  ;;  %v5123_v36 = vsel %vm5109_vm3, 0.0, %v10400_v33  ;;  %v5295_v2 = vsel %vm5280_vm7, %v10538_v8, 0.0 }
 0xbb6   : > { %5479 = vmatprep.subr.mxu0 %v5158_v5  ;;  %v10552_v51 = vpop.permute.xlu1 %5276  ;;  %v5136_v33 = vmul.f32 %v10458_v41, %v5123_v36 }
 0xbb7   : > { %6229 = vmatpush1.msk.msra.mxu0 %vm10518_vm6, %v10383_v34  ;;  %v5122_v34 = vsel %vm5109_vm3, 0.0, %v10414_v17 }
 0xbb8   : > { %v10564_v22 = vpop.permute.xlu0 %5270  ;;  %5481 = vmatprep.subr.mxu0 %v5141_v30  ;;  %v5134_v27 = vmul.f32 %v10458_v41, %v5122_v34  ;;  %v5338_v30 = vmul.f32 %v5322_v50, %v10458_v41 }
 0xbb9   : > { %5482 = vmatpush1.msra.mxu0 %v5140_v23 }
 0xbba   : > { %5483 = vmatprep.subr.mxu0 %v5139_v63  ;;  %v5273_v39 = vpop.permute.xlu1 %5272  ;;  %v5302_v63 = vmul.f32 %v5295_v2, %v10483_v62 }
 0xbbb   : > { %5484 = vmatpush1.msra.mxu0 %v5138_v0  ;;  %v5283_v28 = vsel %vm5280_vm7, %v5273_v39, %v10538_v8 }
 0xbbc   : > { %v10575_v31 = vpop.permute.xlu0 %5266  ;;  %5485 = vmatprep.subr.mxu0 %v5137_v11  ;;  %v5301_v0 = vmul.f32 %v5283_v28, %v10488_v49 }
 0xbbd   : > { %5486 = vmatpush1.msra.mxu0 %v5136_v33  ;;  %v5293_v8 = vsel %vm5280_vm7, %v10575_v31, 0.0 }
 0xbbe   : > { %5487 = vmatprep.subr.mxu0 %v5135_v52  ;;  %v5361_v29 = vpop.permute.xlu1 %5360 }
 0xbbf   : > { %v5366_v15 = vsel %vm5362_vm4, %v5359_v56, %v5361_v29  ;;  %5488 = vmatpush1.msra.mxu0 %v5134_v27 }
 0xbc0   : > { %v5320_v17 = vpop.permute.xlu0 %5319  ;;  %6230 = vmatprep.subr.msk.mxu0 %vm5362_vm4, %v5361_v29 }
 0xbc1   : > { %5490 = vmatpush2.msra.mxu0 %v5366_v15  ;;  %v5337_v37 = vsel %vm5321_vm5, %v5320_v17, 0.0  ;;  %v5325_v56 = vsel %vm5321_vm5, %v10445_v61, %v5320_v17  ;;  %v5324_v61 = vsel %vm5321_vm5, %v10471_v7, %v10443_v32  ;;  %v5341_v7 = vmul.f32 %v5335_v18, %v10454_v25 }
 0xbc2   : > { %6231 = vmatprep.subr.msk.mxu0 %vm5362_vm4, %v10441_v54  ;;  %v5269_v47 = vpop.permute.xlu1 %5268  ;;  %v5363_v54 = vsel %vm5362_vm4, %v10427_v16, %v10429_v13  ;;  %v5345_v42 = vmul.f32 %v5337_v37, %v10454_v25  ;;  %v5323_v16 = vsel %vm5321_vm5, %v10501_v9, %v10515_v38  ;;  %v5342_v32 = vmul.f32 %v5324_v61, %v10458_v41 }
 0xbc3   : > { %5492 = vmatpush2.msra.mxu0 %v5365_v4  ;;  %v5340_v35 = vmul.f32 %v5323_v16, %v10458_v41  ;;  %v5282_v11 = vsel %vm5280_vm7, %v5269_v47, %v10564_v22  ;;  %v5298_v37 = vmul.f32 %v5293_v8, %v10483_v62 }
 0xbc4   : > { %v5390_v40 = vpop.permute.xlu0 %5389  ;;  %6232 = vmatprep.subr.msk.mxu0 %vm5362_vm4, %v10423_v44  ;;  %v5344_v44 = vmul.f32 %v5325_v56, %v10458_v41  ;;  %v5299_v4 = vmul.f32 %v5282_v11, %v10488_v49 }
 0xbc5   : > { %5494 = vmatpush2.msra.mxu0 %v5364_v3  ;;  %v5410_v39 = vsel %vm5395_vm8, %v5390_v40, 0.0 }
 0xbc6   : > { %6233 = vmatprep.subr.msk.mxu0 %vm5362_vm4, %v10429_v13  ;;  %v5265_v48 = vpop.permute.xlu1 %5264  ;;  %v5334_v13 = vsel %vm5321_vm5, %v10523_v14, 0.0  ;;  %v5294_v14 = vsel %vm5280_vm7, %v10564_v22, 0.0  ;;  %v5417_v56 = vmul.f32 %v5410_v39, %v10483_v62 }
 0xbc7   : > { %5496 = vmatpush2.msra.mxu0 %v5363_v54  ;;  %v5339_v38 = vmul.f32 %v5334_v13, %v10454_v25  ;;  %v5300_v59 = vmul.f32 %v5294_v14, %v10483_v62  ;;  %v5281_v27 = vsel %vm5280_vm7, %v5265_v48, %v10575_v31 }
 0xbc8   : > { %v5279_v43 = vpop.permute.xlu0 %5278  ;;  %5497 = vmatprep.subr.mxu0 %v5345_v42  ;;  %v5297_v3 = vmul.f32 %v5281_v27, %v10488_v49 }
 0xbc9   : > { %5498 = vmatpush2.msra.mxu0 %v5344_v44  ;;  %v5296_v9 = vsel %vm5280_vm7, %v5279_v43, 0.0  ;;  %v5284_v5 = vsel %vm5280_vm7, %v10552_v51, %v5279_v43 }
 0xbca   : > { %5499 = vmatprep.subr.mxu0 %v5343_v12  ;;  %v5392_v60 = vpop.permute.xlu1 %5391  ;;  %v5304_v23 = vmul.f32 %v5296_v9, %v10483_v62  ;;  %v5303_v51 = vmul.f32 %v5284_v5, %v10488_v49 }
 0xbcb   : > { %5500 = vmatpush2.msra.mxu0 %v5342_v32 }
 0xbcc   : > { %v5386_v26 = vpop.permute.xlu0 %5385  ;;  %5501 = vmatprep.subr.mxu0 %v5341_v7 }
 0xbcd   : > { %5502 = vmatpush2.msra.mxu0 %v5340_v35  ;;  %v5409_v47 = vsel %vm5395_vm8, %v5386_v26, 0.0 }
 0xbce   : > { %5503 = vmatprep.subr.mxu0 %v5339_v38  ;;  %v5388_v36 = vpop.permute.xlu1 %5387  ;;  %v5415_v61 = vmul.f32 %v5409_v47, %v10483_v62 }
 0xbcf   : > { %5504 = vmatpush2.msra.mxu0 %v5338_v30  ;;  %v5398_v29 = vsel %vm5395_vm8, %v5388_v36, %v5390_v40 }
 0xbd0   : > { %v5394_v34 = vpop.permute.xlu0 %5393  ;;  %5505 = vmatprep.subr.mxu0 %v5304_v23  ;;  %v5416_v6 = vmul.f32 %v5398_v29, %v10488_v49 }
 0xbd1   : > { %v5399_v33 = vsel %vm5395_vm8, %v5392_v60, %v5394_v34  ;;  %v5411_v52 = vsel %vm5395_vm8, %v5394_v34, 0.0  ;;  %5506 = vmatpush2.msra.mxu0 %v5303_v51 }
 0xbd2   : > { %v5418_v15 = vmul.f32 %v5399_v33, %v10488_v49  ;;  %v5419_v22 = vmul.f32 %v5411_v52, %v10483_v62  ;;  %5507 = vmatprep.subr.mxu0 %v5302_v63  ;;  %v5384_v17 = vpop.permute.xlu1 %5383 }
 0xbd3   : > { %5508 = vmatpush2.msra.mxu0 %v5301_v0  ;;  %v5397_v31 = vsel %vm5395_vm8, %v5384_v17, %v5386_v26 }
 0xbd4   : > { %5509 = vmatprep.subr.mxu0 %v5300_v59  ;;  %5558 = vmatprep.subr.mxu1 %v5419_v22  ;;  %v5382_v40 = vpop.permute.xlu0 %5381  ;;  %v5414_v18 = vmul.f32 %v5397_v31, %v10488_v49  ;;  %v7233_v31 = vld [vmem:[%s10844_s5] sm:$0xff] }
 0xbd5   : > { %5510 = vmatpush2.msra.mxu0 %v5299_v4  ;;  %5559 = vmatpush1.msra.mxu1 %v5418_v15  ;;  %v5408_v54 = vsel %vm5395_vm8, %v5382_v40, 0.0 }
 0xbd6   : > { %v5413_v42 = vmul.f32 %v5408_v54, %v10483_v62  ;;  %5511 = vmatprep.subr.mxu0 %v5298_v37  ;;  %5560 = vmatprep.subr.mxu1 %v5417_v56  ;;  %v5380_v48 = vpop.permute.xlu1 %5379  ;;  %v7269_v37 = vmov 4   ;;  %v256_v56 = vld [vmem:[%s10842_s3 + $0x20] sm:$0xff] }
 0xbd7   : > { %5512 = vmatpush2.msra.mxu0 %v5297_v3  ;;  %5561 = vmatpush1.msra.mxu1 %v5416_v6  ;;  %v5396_v44 = vsel %vm5395_vm8, %v5380_v48, %v5382_v40  ;;  %v7270_v40 = vmov 5  }
 0xbd8   : > { %5513 = vmatprep.subr.mxu0 %v10294_v10  ;;  %v5412_v12 = vmul.f32 %v5396_v44, %v10488_v49  ;;  %v7008_v16 = vpop.permute.xlu0 %7007  ;;  %5562 = vmatprep.subr.mxu1 %v5415_v61 }
 0xbd9   : > { %5514 = vmatpush2.msra.mxu0 %v10288_v55  ;;  %v7009_v43 = vunpack.i.l.bf16 %v7008_v16  ;;  %5563 = vmatpush1.msra.mxu1 %v5414_v18  ;;  %v7010_v13 = vunpack.i.h.bf16 %v7008_v16 }
 0xbda   : > { %5515 = vmatprep.subr.mxu0 %v10266_v19  ;;  %v5431_v32 = vpop.permute.xlu1 %5430  ;;  %5564 = vmatprep.subr.mxu1 %v5413_v42 }
 0xbdb   : > { %5516 = vmatpush2.msra.mxu0 %v10264_v20  ;;  %v5444_v7 = vsel %vm5442_vm9, %v7009_v43, %v5431_v32  ;;  %5565 = vmatpush1.msra.mxu1 %v5412_v12  ;;  %v5443_v20 = vsel %vm5442_vm9, %v7010_v13, %v7009_v43 }
 0xbdc   : > { %5517 = vmatprep.subr.mxu0 %v10181_v24  ;;  %v5433_v10 = vpop.permute.xlu0 %5432  ;;  %5521 = vmatprep.mubr.f32.mxu0 %v5444_v7 }
 0xbdd   : > { %5518 = vmatpush2.msra.mxu0 %v10159_v1  ;;  %v5445_v55 = vsel %vm5442_vm9, %v5431_v32, %v5433_v10  ;;  %7021 = vset.pattern.permute.xlu1 %v7269_v37 }
 0xbde   : > { %5519 = vmatprep.subr.mxu0 %v10188_v57  ;;  %6234 = vmatmul.mubr.msk.f32.vlgmr.msra.gmra.mxu1 %vm3940_vm13, %v5445_v55  ;;  %v7013_v19 = vpop.permute.xlu1 %7012 }
 0xbdf   : > { %5520 = vmatpush2.msra.mxu0 %v10169_v53  ;;  %v7015_v50 = vunpack.i.h.bf16 %v7013_v19  ;;  %v7014_v60 = vunpack.i.l.bf16 %v7013_v19  ;;  %5604 = vmatprep.mubr.f32.mxu1 %v7265_v46 }
 0xbe0   : > { %5522 = vmatmul.mubr.f32.vlgmr.msra.gmra.mxu0 %v5443_v20  ;;  %v5439_v24 = vpop.permute.xlu0 %5438  ;;  %7020 = vset.pattern.permute.xlu0 %v7269_v37 }
 0xbe1   : > { %v5447_v35 = vsel %vm5442_vm9, %v7014_v60, %v5439_v24  ;;  %v5446_v1 = vsel %vm5442_vm9, %v7015_v50, %v7014_v60 }
 0xbe2   : > { %v5441_v9 = vpop.permute.xlu1 %5440  ;;  %5527 = vmatprep.mubr.f32.mxu0 %v5447_v35 }
 0xbe3   : > { %v5448_v57 = vsel %vm5442_vm9, %v5439_v24, %v5441_v9 }
 0xbe4   : > { %5528 = vmatmul.mubr.f32.gmra.mxu0 %v5446_v1  ;;  %6235 = vmatmul.mubr.msk.f32.gmra.mxu1 %vm3940_vm13, %v5448_v57  ;;  %vm5805_vm13 = vcmask 998400  }
 0xbed   : > { %v5617_v53 = vpop.permute.xlu0 %5616 }
 0xbef   : > { %v5613_v26 = vpop.permute.xlu1 %5612 }
 0xbf2   : > { %v5625_v2 = vpop.permute.xlu0 %5624 }
 0xbf4   : > { %v5629_v33 = vpop.permute.xlu1 %5628 }
 0xc9e   : > { %v5600_v38 = vpop.f32.mrf.mxu1 }
 0xca0   : > { %v5523_v5 = vpop.f32.mrf.mxu0  ;;  %v5602_v14 = vpop.f32.mrf.mxu1 }
 0xca1   : > { %v5601_v30 = vadd.f32 %v5600_v38, %v5523_v5 }
 0xca2   : > { %v5525_v46 = vpop.f32.mrf.mxu0 }
 0xca3   : > { %v5619_v28 = vmul.f32 %v5613_v26, %v5601_v30  ;;  %v5603_v23 = vadd.f32 %v5602_v14, %v5525_v46 }
 0xca4   : > { %v5606_v59 = vpop.f32.mrf.mxu1  ;;  %v5529_v0 = vpop.f32.mrf.mxu0 }
 0xca5   : > { %v5631_v36 = vadd.f32 %v5625_v2, %v5619_v28  ;;  %v5620_v63 = vmul.f32 %v5613_v26, %v5603_v23  ;;  %v5607_v34 = vadd.f32 %v5606_v59, %v5529_v0 }
 0xca6   : > { %v5531_v52 = vpop.f32.mrf.mxu0  ;;  %v5608_v27 = vpop.f32.mrf.mxu1 }
 0xca7   : > { %v10677_v51 = vmax.f32 %v5631_v36, 0.0  ;;  %v5632_v11 = vadd.f32 %v5625_v2, %v5620_v63  ;;  %v5621_v39 = vmul.f32 %v5617_v53, %v5607_v34  ;;  %v5609_v15 = vadd.f32 %v5608_v27, %v5531_v52 }
 0xca9   : > { %5739 = vrot.lane.b32.xlu1 %v10677_v51, %s7262_s11  ;;  %5759 = vrot.lane.b32.xlu0 %v10677_v51, %s7261_s10  ;;  %v10687_v8 = vmax.f32 %v5632_v11, 0.0  ;;  %v5633_v29 = vadd.f32 %v5629_v33, %v5621_v39  ;;  %v5622_v17 = vmul.f32 %v5617_v53, %v5609_v15 }
 0xcab   : > { %v10697_v22 = vmax.f32 %v5633_v29, 0.0  ;;  %v5634_v4 = vadd.f32 %v5629_v33, %v5622_v17 }
 0xcad   : > { %5719 = vrot.lane.b32.xlu1 %v10677_v51, %s7263_s13  ;;  %5699 = vrot.lane.b32.xlu0 %v10677_v51, %s7258_s8  ;;  %v10707_v47 = vmax.f32 %v5634_v4, 0.0 }
 0xcb1   : > { %5761 = vrot.lane.b32.xlu1 %v10687_v8, %s7261_s10  ;;  %5741 = vrot.lane.b32.xlu0 %v10687_v8, %s7262_s11 }
 0xcb5   : > { %5701 = vrot.lane.b32.xlu1 %v10687_v8, %s7258_s8  ;;  %5721 = vrot.lane.b32.xlu0 %v10687_v8, %s7263_s13 }
 0xcb9   : > { %5763 = vrot.lane.b32.xlu1 %v10697_v22, %s7261_s10  ;;  %5703 = vrot.lane.b32.xlu0 %v10697_v22, %s7258_s8 }
 0xcbd   : > { %5743 = vrot.lane.b32.xlu1 %v10697_v22, %s7262_s11  ;;  %5683 = vrot.lane.b32.xlu0 %v10697_v22, %s7259_s9 }
 0xcc1   : > { %5723 = vrot.lane.b32.xlu1 %v10697_v22, %s7263_s13  ;;  %5745 = vrot.lane.b32.xlu0 %v10707_v47, %s7262_s11 }
 0xcc5   : > { %5765 = vrot.lane.b32.xlu1 %v10707_v47, %s7261_s10  ;;  %5725 = vrot.lane.b32.xlu0 %v10707_v47, %s7263_s13 }
 0xcc9   : > { %5681 = vrot.lane.b32.xlu1 %v10687_v8, %s7259_s9  ;;  %5679 = vrot.lane.b32.xlu0 %v10677_v51, %s7259_s9 }
 0xccd   : > { %5665 = vrot.lane.b32.xlu1 %v10687_v8, %s7250_s20  ;;  %5667 = vrot.lane.b32.xlu0 %v10697_v22, %s7250_s20 }
 0xcd1   : > { %5645 = vrot.lane.b32.xlu1 %v10687_v8, %s7260_s7  ;;  %5647 = vrot.lane.b32.xlu0 %v10697_v22, %s7260_s7 }
 0xcd5   : > { %5705 = vrot.lane.b32.xlu1 %v10707_v47, %s7258_s8  ;;  %5663 = vrot.lane.b32.xlu0 %v10677_v51, %s7250_s20 }
 0xcd9   : > { %5685 = vrot.lane.b32.xlu1 %v10707_v47, %s7259_s9  ;;  %5643 = vrot.lane.b32.xlu0 %v10677_v51, %s7260_s7 }
 0xcdd   : > { %5669 = vrot.lane.b32.xlu1 %v10707_v47, %s7250_s20  ;;  %5781 = vrot.lane.b32.xlu0 %v10707_v47, %s7264_s14 }
 0xce1   : > { %5649 = vrot.lane.b32.xlu1 %v10707_v47, %s7260_s7  ;;  %5777 = vrot.lane.b32.xlu0 %v10687_v8, %s7264_s14 }
 0xce5   : > { %5779 = vrot.lane.b32.xlu1 %v10697_v22, %s7264_s14  ;;  %5797 = vrot.lane.b32.xlu0 %v10398_v21, %s7245_s12  ;;  %v261_v21 = vld [vmem:[%s10842_s3 + $0x48] sm:$0xff] }
 0xce9   : > { %5775 = vrot.lane.b32.xlu1 %v10677_v51, %s7264_s14  ;;  %5801 = vrot.lane.b32.xlu0 %v10412_v58, %s7245_s12  ;;  %v7234_v58 = vld [vmem:[%s10844_s5 + $0x8] sm:$0xff] }
 0xced   : > { %5799 = vrot.lane.b32.xlu1 %v256_v56, %s7245_s12  ;;  %5892 = vperm.xlu0 %7020, %v7233_v31  }
 0xcf1   : > { %5803 = vrot.lane.b32.xlu1 %v261_v21, %s7245_s12  ;;  %7023 = vset.pattern.permute.xlu0 %v7270_v40 }
 0xcf2   : > { %5908 = vperm.xlu0 %7023, %v7234_v58  }
 0xcf5   : > { %5896 = vperm.xlu1 %7021, %v7234_v58  }
 0xcf9   : > { %7022 = vset.pattern.permute.xlu1 %v7270_v40 }
 0xcfa   : > { %5904 = vperm.xlu1 %7022, %v7233_v31  }
 0xd1b   : > { %v5740_v3 = vpop.permute.xlu1 %5739  ;;  %v5760_v6 = vpop.permute.xlu0 %5759 }
 0xd1f   : > { %v5720_v54 = vpop.permute.xlu1 %5719  ;;  %v5700_v61 = vpop.permute.xlu0 %5699 }
 0xd20   : > { %v5713_v29 = vsel %vm5239_vm15, 0.0, %v5700_v61 }
 0xd23   : > { %v5762_v42 = vpop.permute.xlu1 %5761  ;;  %v5742_v48 = vpop.permute.xlu0 %5741 }
 0xd24   : > { %v5753_v60 = vsel %vm5321_vm5, %v5742_v48, 0.0  ;;  %v5767_v24 = vsel %vm5362_vm4, %v5760_v6, %v5762_v42  ;;  %v5747_v35 = vsel %vm5321_vm5, %v5740_v3, %v5742_v48 }
 0xd25   : > { %v5756_v5 = vmul.f32 %v5753_v60, %v10454_v25  ;;  %v5755_v30 = vmul.f32 %v5747_v35, %v10458_v41 }
 0xd27   : > { %v5702_v18 = vpop.permute.xlu1 %5701  ;;  %v5722_v44 = vpop.permute.xlu0 %5721 }
 0xd28   : > { %v5733_v2 = vsel %vm5280_vm7, %v5722_v44, 0.0  ;;  %v5727_v46 = vsel %vm5280_vm7, %v5720_v54, %v5722_v44  ;;  %v5707_v52 = vsel %vm5239_vm15, %v5700_v61, %v5702_v18 }
 0xd29   : > { %v5736_v63 = vmul.f32 %v5733_v2, %v10483_v62  ;;  %v5735_v59 = vmul.f32 %v5727_v46, %v10488_v49 }
 0xd2b   : > { %v5764_v12 = vpop.permute.xlu1 %5763  ;;  %v5704_v16 = vpop.permute.xlu0 %5703 }
 0xd2c   : > { %v5714_v34 = vsel %vm5239_vm15, 0.0, %v5704_v16 }
 0xd2d   : > { %v5717_v17 = vmul.f32 %v5714_v34, %v10458_v41 }
 0xd2f   : > { %v5744_v43 = vpop.permute.xlu1 %5743  ;;  %v5684_v32 = vpop.permute.xlu0 %5683 }
 0xd33   : > { %v5724_v13 = vpop.permute.xlu1 %5723  ;;  %v5746_v7 = vpop.permute.xlu0 %5745 }
 0xd34   : > { %v5754_v10 = vsel %vm5321_vm5, %v5746_v7, 0.0  ;;  %v5748_v20 = vsel %vm5321_vm5, %v5744_v43, %v5746_v7 }
 0xd35   : > { %v5758_v1 = vmul.f32 %v5754_v10, %v10454_v25  ;;  %v5757_v9 = vmul.f32 %v5748_v20, %v10458_v41 }
 0xd37   : > { %v5766_v55 = vpop.permute.xlu1 %5765  ;;  %v5726_v19 = vpop.permute.xlu0 %5725 }
 0xd38   : > { %v5768_v50 = vsel %vm5362_vm4, %v5764_v12, %v5766_v55  ;;  %6236 = vmatprep.subr.msk.mxu1 %vm5362_vm4, %v5766_v55  ;;  %v5734_v57 = vsel %vm5280_vm7, %v5726_v19, 0.0  ;;  %v5728_v26 = vsel %vm5280_vm7, %v5724_v13, %v5726_v19 }
 0xd39   : > { %5815 = vmatpush1.msra.mxu1 %v5768_v50  ;;  %v5738_v14 = vmul.f32 %v5734_v57, %v10483_v62  ;;  %v5737_v28 = vmul.f32 %v5728_v26, %v10488_v49 }
 0xd3a   : > { %6237 = vmatprep.subr.msk.mxu1 %vm5362_vm4, %v5762_v42 }
 0xd3b   : > { %5817 = vmatpush1.msra.mxu1 %v5767_v24  ;;  %v5682_v53 = vpop.permute.xlu1 %5681  ;;  %v5680_v38 = vpop.permute.xlu0 %5679 }
 0xd3c   : > { %5818 = vmatprep.subr.mxu1 %v5758_v1  ;;  %v5687_v37 = vsel %vm5190_vm1, %v5680_v38, %v5682_v53  ;;  %v5693_v31 = vsel %vm5190_vm1, 0.0, %v5680_v38 }
 0xd3d   : > { %5819 = vmatpush1.msra.mxu1 %v5757_v9  ;;  %v5696_v58 = vmul.f32 %v5687_v37, %v10483_v62  ;;  %v5695_v54 = vmul.f32 %v5693_v31, %v10488_v49 }
 0xd3e   : > { %5820 = vmatprep.subr.mxu1 %v5756_v5 }
 0xd3f   : > { %5821 = vmatpush1.msra.mxu1 %v5755_v30  ;;  %v5666_v23 = vpop.permute.xlu1 %5665  ;;  %v5668_v36 = vpop.permute.xlu0 %5667 }
 0xd40   : > { %5822 = vmatprep.subr.mxu1 %v5738_v14 }
 0xd41   : > { %5823 = vmatpush1.msra.mxu1 %v5737_v28 }
 0xd42   : > { %5824 = vmatprep.subr.mxu1 %v5736_v63 }
 0xd43   : > { %5825 = vmatpush1.msra.mxu1 %v5735_v59  ;;  %v5646_v0 = vpop.permute.xlu1 %5645  ;;  %v5648_v11 = vpop.permute.xlu0 %5647 }
 0xd44   : > { %5826 = vmatprep.subr.mxu1 %v10707_v47  ;;  %v5658_v42 = vsel %vm5109_vm3, 0.0, %v5648_v11 }
 0xd45   : > { %5827 = vmatpush1.msra.mxu1 %v10697_v22  ;;  %v5716_v22 = vmul.f32 %v5707_v52, %v10454_v25  ;;  %v5661_v13 = vmul.f32 %v5658_v42, %v10458_v41 }
 0xd46   : > { %5828 = vmatprep.subr.mxu1 %v10687_v8  ;;  %v5694_v8 = vsel %vm5190_vm1, 0.0, %v5684_v32 }
 0xd47   : > { %5829 = vmatpush1.msra.mxu1 %v10677_v51  ;;  %v5706_v39 = vpop.permute.xlu1 %5705  ;;  %v5664_v33 = vpop.permute.xlu0 %5663  ;;  %v5715_v51 = vmul.f32 %v5713_v29, %v10458_v41  ;;  %v5697_v40 = vmul.f32 %v5694_v8, %v10488_v49 }
 0xd48   : > { %v5708_v27 = vsel %vm5239_vm15, %v5704_v16, %v5706_v39  ;;  %v5671_v12 = vsel %vm404_vm0, %v5664_v33, %v5666_v23 }
 0xd49   : > { %v5718_v15 = vmul.f32 %v5708_v27, %v10454_v25 }
 0xd4b   : > { %5830 = vmatprep.subr.mxu1 %v5718_v15  ;;  %v5686_v4 = vpop.permute.xlu1 %5685  ;;  %v5644_v47 = vpop.permute.xlu0 %5643 }
 0xd4c   : > { %v5688_v56 = vsel %vm5190_vm1, %v5684_v32, %v5686_v4  ;;  %5831 = vmatpush1.msra.mxu1 %v5717_v17  ;;  %v5651_v18 = vsel %vm5109_vm3, %v5644_v47, %v5646_v0  ;;  %v5657_v16 = vsel %vm5109_vm3, 0.0, %v5644_v47 }
 0xd4d   : > { %v5698_v21 = vmul.f32 %v5688_v56, %v10483_v62  ;;  %5832 = vmatprep.subr.mxu1 %v5716_v22  ;;  %v5660_v10 = vmul.f32 %v5651_v18, %v10454_v25  ;;  %v5659_v19 = vmul.f32 %v5657_v16, %v10458_v41 }
 0xd4e   : > { %5833 = vmatpush1.msra.mxu1 %v5715_v51 }
 0xd4f   : > { %5834 = vmatprep.subr.mxu1 %v5698_v21  ;;  %v5670_v3 = vpop.permute.xlu1 %5669  ;;  %v5782_v6 = vpop.permute.xlu0 %5781 }
 0xd50   : > { %5835 = vmatpush1.msra.mxu1 %v5697_v40  ;;  %v5672_v61 = vsel %vm404_vm0, %v5668_v36, %v5670_v3  ;;  %v5790_v7 = vsel %vm5395_vm8, %v5782_v6, 0.0 }
 0xd51   : > { %5836 = vmatprep.subr.mxu1 %v5696_v58  ;;  %v5794_v60 = vmul.f32 %v5790_v7, %v10483_v62 }
 0xd52   : > { %5837 = vmatpush1.msra.mxu1 %v5695_v54 }
 0xd53   : > { %5838 = vmatprep.subr.mxu1 %v5672_v61  ;;  %v5650_v48 = vpop.permute.xlu1 %5649  ;;  %v5778_v32 = vpop.permute.xlu0 %5777 }
 0xd54   : > { %v5652_v44 = vsel %vm5109_vm3, %v5648_v11, %v5650_v48  ;;  %6239 = vmatpush1.msk.msra.mxu1 %vm10518_vm6, %v5668_v36  ;;  %v5789_v20 = vsel %vm5395_vm8, %v5778_v32, 0.0 }
 0xd55   : > { %v5662_v43 = vmul.f32 %v5652_v44, %v10454_v25  ;;  %5840 = vmatprep.subr.mxu1 %v5671_v12  ;;  %v5792_v45 = vmul.f32 %v5789_v20, %v10483_v62 }
 0xd56   : > { %6241 = vmatpush1.msk.msra.mxu1 %vm10518_vm6, %v5664_v33 }
 0xd57   : > { %5842 = vmatprep.subr.mxu1 %v5662_v43  ;;  %v5780_v55 = vpop.permute.xlu1 %5779  ;;  %v5798_v25 = vpop.permute.xlu0 %5797 }
 0xd58   : > { %v5784_v50 = vsel %vm5395_vm8, %v5780_v55, %v5782_v6  ;;  %5843 = vmatpush1.msra.mxu1 %v5661_v13 }
 0xd59   : > { %v5793_v24 = vmul.f32 %v5784_v50, %v10488_v49  ;;  %5844 = vmatprep.subr.mxu1 %v5660_v10 }
 0xd5a   : > { %5845 = vmatpush1.msra.mxu1 %v5659_v19 }
 0xd5b   : > { %5874 = vmatprep.subr.mxu1 %v5794_v60  ;;  %v5776_v35 = vpop.permute.xlu1 %5775  ;;  %v5802_v53 = vpop.permute.xlu0 %5801 }
 0xd5c   : > { %v5783_v1 = vsel %vm5395_vm8, %v5776_v35, %v5778_v32  ;;  %5875 = vmatpush2.msra.mxu1 %v5793_v24 }
 0xd5d   : > { %v5791_v41 = vmul.f32 %v5783_v1, %v10488_v49  ;;  %5876 = vmatprep.subr.mxu1 %v5792_v45 }
 0xd5f   : > { %5877 = vmatpush2.msra.mxu1 %v5791_v41  ;;  %v5800_v9 = vpop.permute.xlu1 %5799 }
 0xd60   : > { %v5806_v57 = vsel %vm5805_vm13, %v5798_v25, %v5800_v9  ;;  %6242 = vmatprep.mubr.msk.f32.mxu1 %vm404_vm0, %v5800_v9 }
 0xd61   : > { %5879 = vmatmul.mubr.f32.vlgmr.msra.gmra.mxu1 %v5806_v57 }
 0xd63   : > { %v5804_v38 = vpop.permute.xlu1 %5803 }
 0xd64   : > { %v5807_v62 = vsel %vm5805_vm13, %v5802_v53, %v5804_v38  ;;  %6243 = vmatprep.mubr.msk.f32.mxu1 %vm404_vm0, %v5804_v38 }
 0xd65   : > { %5885 = vmatmul.mubr.f32.gmra.mxu1 %v5807_v62 }
 0xd68   : > { %v5893_v26 = vpop.permute.xlu0 %5892 }
 0xd6d   : > { %v5909_v36 = vpop.permute.xlu0 %5908 }
 0xd70   : > { %v5897_v5 = vpop.permute.xlu1 %5896 }
 0xd75   : > { %v5905_v2 = vpop.permute.xlu1 %5904 }
 0xe21   : > { %v5880_v30 = vpop.f32.mrf.mxu1 }
 0xe22   : > { %v5899_v49 = vmul.f32 %v5893_v26, %v5880_v30 }
 0xe23   : > { %v5882_v46 = vpop.f32.mrf.mxu1 }
 0xe24   : > { %v5900_v14 = vmul.f32 %v5893_v26, %v5882_v46  ;;  %v5911_v28 = vadd.f32 %v5905_v2, %v5899_v49 }
 0xe25   : > { %v5886_v23 = vpop.f32.mrf.mxu1 }
 0xe26   : > { %v5901_v63 = vmul.f32 %v5897_v5, %v5886_v23  ;;  %v5912_v59 = vadd.f32 %v5905_v2, %v5900_v14  ;;  %v5915_v0 = vmax.f32 %v5911_v28, 0.0 }
 0xe27   : > { %v5888_v11 = vpop.f32.mrf.mxu1 }
 0xe28   : > { %v5916_v34 = vmax.f32 %v5912_v59, 0.0  ;;  %5919 = vst [vmem:[%s251_s24] sm:$0xff] %v5915_v0  ;;  %v5902_v39 = vmul.f32 %v5897_v5, %v5888_v11  ;;  %v5913_v33 = vadd.f32 %v5909_v36, %v5901_v63 }
 0xe2a   : > { %5920 = vst [vmem:[%s251_s24 + $0x8] sm:$0xff] %v5916_v34  ;;  %v5914_v52 = vadd.f32 %v5909_v36, %v5902_v39  ;;  %v5917_v27 = vmax.f32 %v5913_v33, 0.0 }
 0xe2c   : > { %v5918_v29 = vmax.f32 %v5914_v52, 0.0  ;;  %5921 = vst [vmem:[%s251_s24 + $0x10] sm:$0xff] %v5917_v27 }
 0xe2e   : > { %5922 = vst [vmem:[%s251_s24 + $0x18] sm:$0xff] %v5918_v29 }
 0xe2f PF: > { %s16_s21 = sadd.s32 1, %s7241_s21  }
 0xe30   : > { %p13_p4 = scmp.ge.s32.totalorder %s16_s21, 4  }
 0xe32   :  { %15 = sbr.rel (!%p13_p4) target bundleno = 1 (0x1), region = 74 }

</bundles_post_ra>
